<compile_context>
chip_gen: v6e
topology: v6e:2x2x1
jax: 0.10.0
libtpu: 0.0.40
codegen_flags: <defaults>
</compile_context>

<pallas_src>
import functools

import jax
import jax.numpy as jnp
from jax import lax
from jax.experimental import pallas as pl
from jax.experimental.pallas import tpu as pltpu


# ----------------------------- fused residual-block kernel -----------------------------
def _resmp_kernel(x_ref, w1_ref, b1_ref, w2_ref, b2_ref, cm_ref, csel_ref,
                  out_ref, taps_ref, h_ref, *, C, H, W):
    # x_ref   : (1, C, H*W)   input block, flat spatial layout (W contiguous per row)
    # w*_ref  : (C, 9*C)      folded conv*BNscale weights, w[co, t*C+ci], t = ky*3+kx
    # b*_ref  : (C, 1)        folded BN shift (+ conv bias)
    # cm_ref  : (2, H*W)      col masks: row0 zero where col==W-1 (dx=+1), row1 where col==0 (dx=-1)
    # csel_ref: (W, Wo)       0/1 even-column selection matrix
    # out_ref : (1, Ho*C, Wo) pooled output, row = i*C + c  (lane-dense Wo)
    # taps_ref: (9*C, H*W)    VMEM scratch: tap-stacked activation for the MXU matmul
    # h_ref   : (C, H*W)      VMEM scratch: relu(bn1(conv1(x)))
    HW = H * W
    Ho = H // 2

    def build_taps(load_src):
        """Fill taps_ref: rows [t*C:(t+1)*C] hold src shifted by (dy, dx), zero-padded
        at the image border, with t = (dy+1)*3 + (dx+1)."""
        for dx in (0, 1, -1):
            src = load_src()                                        # (C, HW)
            if dx == 1:     # value at col+1, zeroed where col == W-1
                base = pltpu.roll(src, HW - 1, axis=1) * cm_ref[0:1, :]
            elif dx == -1:  # value at col-1, zeroed where col == 0
                base = pltpu.roll(src, 1, axis=1) * cm_ref[1:2, :]
            else:
                base = src
            for dy in (-1, 0, 1):
                t = (dy + 1) * 3 + (dx + 1)
                r0 = t * C
                if dy == 0:
                    taps_ref[r0:r0 + C, :] = base
                elif dy == 1:   # value at row+1: lane-aligned slab copy, zero last row
                    taps_ref[r0:r0 + C, 0:HW - W] = base[:, W:HW]
                    taps_ref[r0:r0 + C, HW - W:HW] = jnp.zeros((C, W), jnp.float32)
                else:           # dy == -1: zero first row
                    taps_ref[r0:r0 + C, W:HW] = base[:, 0:HW - W]
                    taps_ref[r0:r0 + C, 0:W] = jnp.zeros((C, W), jnp.float32)

    # ---- conv1 + bn1 + relu  (single stacked MXU matmul) ----
    build_taps(lambda: x_ref[0])
    y1 = jnp.dot(w1_ref[...], taps_ref[...], preferred_element_type=jnp.float32)
    h_ref[...] = jnp.maximum(y1 + b1_ref[...], 0.0)

    # ---- conv2 + bn2 + residual add + relu ----
    build_taps(lambda: h_ref[...])
    y2 = jnp.dot(w2_ref[...], taps_ref[...], preferred_element_type=jnp.float32)
    a = jnp.maximum(x_ref[0] + y2 + b2_ref[...], 0.0)               # (C, HW)

    # ---- 2x2 max-pool ----
    # horizontal pair-max: max(a[p], a[p+1]); wrap only contaminates odd columns,
    # which the even-column selection matmul discards.
    m1 = jnp.maximum(a, pltpu.roll(a, HW - 1, axis=1))
    # vertical pair-max computed only on the even rows we keep, via static
    # lane-group-aligned slab slices; rows[i*C + c, :] = max over rows 2i, 2i+1 of channel c.
    slabs = [jnp.maximum(m1[:, (2 * i) * W:(2 * i + 1) * W],
                         m1[:, (2 * i + 1) * W:(2 * i + 2) * W])
             for i in range(Ho)]
    rows = jnp.concatenate(slabs, axis=0)                            # (Ho*C, W)
    # even-column compaction: exact 0/1 selection matmul -> lane-dense (Ho*C, Wo)
    out_ref[0] = jnp.dot(rows, csel_ref[...], preferred_element_type=jnp.float32)


# ----------------------------- host-side wrapper -----------------------------
def conv3_2d_resmp(x, params, eps=1e-5):
    n, c, h, w = x.shape
    assert h % 2 == 0 and w % 2 == 0, "2x2 max-pool needs even H and W"
    assert params["conv1"]["w"].shape == (c, c, 3, 3)
    hw = h * w
    ho, wo = h // 2, w // 2

    def fold(p):
        # BN (eval mode, running stats): y = scale*conv(x) + shift, with the conv bias folded in.
        scale = p["gamma"] / jnp.sqrt(p["var"] + eps)
        shift = p["beta"] + scale * (p["bias"] - p["mean"])
        # w_mat[co, t*C + ci], t = ky*3 + kx, with the BN scale folded into the weights.
        w_mat = (p["w"] * scale[:, None, None, None]).transpose(0, 2, 3, 1).reshape(c, 9 * c)
        return w_mat, shift.reshape(c, 1)

    w1m, b1 = fold(params["conv1"])
    w2m, b2 = fold(params["conv2"])

    # Hoisted constants (built once on the host, kept resident in VMEM).
    col = jnp.arange(hw, dtype=jnp.int32) % w
    cmask = jnp.stack([(col != w - 1), (col != 0)]).astype(jnp.float32)        # (2, HW)
    csel = (jnp.arange(w)[:, None] == 2 * jnp.arange(wo)[None, :]).astype(jnp.float32)  # (W, Wo)

    x_flat = x.reshape(n, c, hw)
    kern = functools.partial(_resmp_kernel, C=c, H=h, W=w)
    const2d = lambda i: (0, 0)

    out = pl.pallas_call(
        kern,
        out_shape=jax.ShapeDtypeStruct((n, ho * c, wo), jnp.float32),
        grid=(n,),
        in_specs=[
            pl.BlockSpec((1, c, hw), lambda i: (i, 0, 0)),   # x (flat spatial)
            pl.BlockSpec((c, 9 * c), const2d),               # w1 (folded, tap-stacked)
            pl.BlockSpec((c, 1), const2d),                   # shift1
            pl.BlockSpec((c, 9 * c), const2d),               # w2
            pl.BlockSpec((c, 1), const2d),                   # shift2
            pl.BlockSpec((2, hw), const2d),                  # column border masks
            pl.BlockSpec((w, wo), const2d),                  # even-column selection
        ],
        out_specs=pl.BlockSpec((1, ho * c, wo), lambda i: (i, 0, 0)),
        scratch_shapes=[
            pltpu.VMEM((9 * c, hw), jnp.float32),            # tap-stacked activation
            pltpu.VMEM((c, hw), jnp.float32),                # conv1 activation
        ],
        compiler_params=pltpu.CompilerParams(
            dimension_semantics=("parallel",),               # batch sharded across TCs (v7x)
            vmem_limit_bytes=32 * 1024 * 1024,
        ),
    )(x_flat, w1m, b1, w2m, b2, cmask, csel)

    # rows are ordered i*C + c  ->  (N, Ho, C, Wo) -> (N, C, Ho, Wo); pure layout plumbing.
    return out.reshape(n, ho, c, wo).transpose(0, 2, 1, 3)


# ----------------------------- pure-JAX reference -----------------------------
def reference_forward(x, params, eps=1e-5):
    def bc(v):
        return v[None, :, None, None]

    def conv_bn(z, p):
        y = lax.conv_general_dilated(
            z, p["w"], (1, 1), ((1, 1), (1, 1)),
            dimension_numbers=("NCHW", "OIHW", "NCHW"),
            precision=lax.Precision.HIGHEST)
        y = y + bc(p["bias"])
        inv = lax.rsqrt(p["var"] + eps)
        return bc(p["gamma"]) * (y - bc(p["mean"])) * bc(inv) + bc(p["beta"])

    hact = jax.nn.relu(conv_bn(x, params["conv1"]))
    out = conv_bn(hact, params["conv2"])
    out = jax.nn.relu(x + out)
    return lax.reduce_window(out, -jnp.inf, lax.max,
                             (1, 1, 2, 2), (1, 1, 2, 2), "VALID")


# ----------------------------- parameters -----------------------------
def init_params(key, c):
    def conv_bn_params(k):
        kw, kb, kg, kbt, km, kv = jax.random.split(k, 6)
        bound = (c * 9) ** -0.5
        return {
            "w": jax.random.uniform(kw, (c, c, 3, 3), jnp.float32, -bound, bound),
            "bias": jax.random.uniform(kb, (c,), jnp.float32, -bound, bound),
            "gamma": 1.0 + 0.1 * jax.random.normal(kg, (c,), jnp.float32),
            "beta": 0.1 * jax.random.normal(kbt, (c,), jnp.float32),
            "mean": 0.1 * jax.random.normal(km, (c,), jnp.float32),
            "var": jax.random.uniform(kv, (c,), jnp.float32, 0.5, 1.5),
        }

    k1, k2 = jax.random.split(key)
    return {"conv1": conv_bn_params(k1), "conv2": conv_bn_params(k2)}


if __name__ == "__main__":
    key = jax.random.PRNGKey(0)
    kp, kx = jax.random.split(key)
    # W = 256 keeps the flat activations lane-group aligned and the pooled output
    # (Wo = 128) lane-dense; N = 2 gives two "parallel" grid steps (both v7x TCs busy).
    N, C, H, W = 2, 8, 16, 256
    params = init_params(kp, C)
    x = jax.random.normal(kx, (N, C, H, W), jnp.float32)

    fwd = jax.jit(conv3_2d_resmp)
    out = jax.block_until_ready(fwd(x, params))
    assert out.shape == (N, C, H // 2, W // 2), out.shape
    assert bool(jnp.all(jnp.isfinite(out)))

    ref = jax.block_until_ready(jax.jit(reference_forward)(x, params))
    err = float(jnp.max(jnp.abs(out - ref)))
    assert err < 1e-3, f"max abs error vs pure-JAX reference: {err}"
    print("KERNEL_OK")
</pallas_src>

<mosaic_0001>
module attributes {stable_mosaic.version = 11 : i64} {
  func.func @_resmp_kernel(%arg0: i32, %arg1: memref<1x8x4096xf32, #tpu.memory_space<vmem>>, %arg2: memref<8x72xf32, #tpu.memory_space<vmem>>, %arg3: memref<8x1xf32, #tpu.memory_space<vmem>>, %arg4: memref<8x72xf32, #tpu.memory_space<vmem>>, %arg5: memref<8x1xf32, #tpu.memory_space<vmem>>, %arg6: memref<2x4096xf32, #tpu.memory_space<vmem>>, %arg7: memref<256x128xf32, #tpu.memory_space<vmem>>, %arg8: memref<1x64x128xf32, #tpu.memory_space<vmem>>, %arg9: memref<72x4096xf32, #tpu.memory_space<vmem>>, %arg10: memref<8x4096xf32, #tpu.memory_space<vmem>>) attributes {dimension_semantics = [#tpu.dimension_semantics<parallel>], iteration_bounds = array<i64: 2>, scalar_prefetch = 0 : i64, scratch_operands = 2 : i64, tpu.core_type = #tpu.core_type<tc>, window_params = [{transform_indices = @transform_0, window_bounds = array<i64: 1, 8, 4096>}, {pipeline_mode = #tpu.pipeline_mode<synchronous>, transform_indices = @transform_1, window_bounds = array<i64: 8, 72>}, {pipeline_mode = #tpu.pipeline_mode<synchronous>, transform_indices = @transform_2, window_bounds = array<i64: 8, 1>}, {pipeline_mode = #tpu.pipeline_mode<synchronous>, transform_indices = @transform_3, window_bounds = array<i64: 8, 72>}, {pipeline_mode = #tpu.pipeline_mode<synchronous>, transform_indices = @transform_4, window_bounds = array<i64: 8, 1>}, {pipeline_mode = #tpu.pipeline_mode<synchronous>, transform_indices = @transform_5, window_bounds = array<i64: 2, 4096>}, {pipeline_mode = #tpu.pipeline_mode<synchronous>, transform_indices = @transform_6, window_bounds = array<i64: 256, 128>}, {transform_indices = @transform_7, window_bounds = array<i64: 1, 64, 128>}]} {
    %c0 = arith.constant 0 : index
    %c0_0 = arith.constant 0 : index
    %c0_1 = arith.constant 0 : index
    %0 = vector.load %arg1[%c0, %c0_0, %c0_1] : memref<1x8x4096xf32, #tpu.memory_space<vmem>>, vector<1x8x4096xf32>
    %1 = vector.shape_cast %0 : vector<1x8x4096xf32> to vector<8x4096xf32>
    %2 = vector.extract_strided_slice %1 {offsets = [0, 0], sizes = [8, 3840], strides = [1, 1]} : vector<8x4096xf32> to vector<8x3840xf32>
    %c8 = arith.constant 8 : index
    %c256 = arith.constant 256 : index
    %3 = vector.load %arg9[%c8, %c256] : memref<72x4096xf32, #tpu.memory_space<vmem>>, vector<8x3840xf32>
    tpu.vector_store %arg9[%c8, %c256], %2 {strides = array<i32>} : memref<72x4096xf32, #tpu.memory_space<vmem>>, vector<8x3840xf32>,
    %cst = arith.constant 0.000000e+00 : f32
    %4 = vector.broadcast %cst : f32 to vector<8x256xf32>
    %c8_2 = arith.constant 8 : index
    %c0_3 = arith.constant 0 : index
    %5 = vector.load %arg9[%c8_2, %c0_3] : memref<72x4096xf32, #tpu.memory_space<vmem>>, vector<8x256xf32>
    tpu.vector_store %arg9[%c8_2, %c0_3], %4 {strides = array<i32>} : memref<72x4096xf32, #tpu.memory_space<vmem>>, vector<8x256xf32>,
    %c32 = arith.constant 32 : index
    %c0_4 = arith.constant 0 : index
    %6 = vector.load %arg9[%c32, %c0_4] : memref<72x4096xf32, #tpu.memory_space<vmem>>, vector<8x4096xf32>
    tpu.vector_store %arg9[%c32, %c0_4], %1 {strides = array<i32>} : memref<72x4096xf32, #tpu.memory_space<vmem>>, vector<8x4096xf32>,
    %7 = vector.extract_strided_slice %1 {offsets = [0, 256], sizes = [8, 3840], strides = [1, 1]} : vector<8x4096xf32> to vector<8x3840xf32>
    %c56 = arith.constant 56 : index
    %c0_5 = arith.constant 0 : index
    %8 = vector.load %arg9[%c56, %c0_5] : memref<72x4096xf32, #tpu.memory_space<vmem>>, vector<8x3840xf32>
    tpu.vector_store %arg9[%c56, %c0_5], %7 {strides = array<i32>} : memref<72x4096xf32, #tpu.memory_space<vmem>>, vector<8x3840xf32>,
    %cst_6 = arith.constant 0.000000e+00 : f32
    %9 = vector.broadcast %cst_6 : f32 to vector<8x256xf32>
    %c56_7 = arith.constant 56 : index
    %c3840 = arith.constant 3840 : index
    %10 = vector.load %arg9[%c56_7, %c3840] : memref<72x4096xf32, #tpu.memory_space<vmem>>, vector<8x256xf32>
    tpu.vector_store %arg9[%c56_7, %c3840], %9 {strides = array<i32>} : memref<72x4096xf32, #tpu.memory_space<vmem>>, vector<8x256xf32>,
    %c0_8 = arith.constant 0 : index
    %c0_9 = arith.constant 0 : index
    %c0_10 = arith.constant 0 : index
    %11 = vector.load %arg1[%c0_8, %c0_9, %c0_10] : memref<1x8x4096xf32, #tpu.memory_space<vmem>>, vector<1x8x4096xf32>
    %12 = vector.shape_cast %11 : vector<1x8x4096xf32> to vector<8x4096xf32>
    %c4095_i32 = arith.constant 4095 : i32
    %13 = tpu.dynamic_rotate %12 by %c4095_i32 dim 1 : vector<8x4096xf32>, i32 -> vector<8x4096xf32>
    %c0_11 = arith.constant 0 : index
    %c0_12 = arith.constant 0 : index
    %14 = vector.load %arg6[%c0_11, %c0_12] : memref<2x4096xf32, #tpu.memory_space<vmem>>, vector<1x4096xf32>
    %15 = vector.broadcast %14 : vector<1x4096xf32> to vector<8x4096xf32>
    %16 = arith.mulf %13, %15 : vector<8x4096xf32>
    %17 = vector.extract_strided_slice %16 {offsets = [0, 0], sizes = [8, 3840], strides = [1, 1]} : vector<8x4096xf32> to vector<8x3840xf32>
    %c16 = arith.constant 16 : index
    %c256_13 = arith.constant 256 : index
    %18 = vector.load %arg9[%c16, %c256_13] : memref<72x4096xf32, #tpu.memory_space<vmem>>, vector<8x3840xf32>
    tpu.vector_store %arg9[%c16, %c256_13], %17 {strides = array<i32>} : memref<72x4096xf32, #tpu.memory_space<vmem>>, vector<8x3840xf32>,
    %cst_14 = arith.constant 0.000000e+00 : f32
    %19 = vector.broadcast %cst_14 : f32 to vector<8x256xf32>
    %c16_15 = arith.constant 16 : index
    %c0_16 = arith.constant 0 : index
    %20 = vector.load %arg9[%c16_15, %c0_16] : memref<72x4096xf32, #tpu.memory_space<vmem>>, vector<8x256xf32>
    tpu.vector_store %arg9[%c16_15, %c0_16], %19 {strides = array<i32>} : memref<72x4096xf32, #tpu.memory_space<vmem>>, vector<8x256xf32>,
    %c40 = arith.constant 40 : index
    %c0_17 = arith.constant 0 : index
    %21 = vector.load %arg9[%c40, %c0_17] : memref<72x4096xf32, #tpu.memory_space<vmem>>, vector<8x4096xf32>
    tpu.vector_store %arg9[%c40, %c0_17], %16 {strides = array<i32>} : memref<72x4096xf32, #tpu.memory_space<vmem>>, vector<8x4096xf32>,
    %22 = vector.extract_strided_slice %16 {offsets = [0, 256], sizes = [8, 3840], strides = [1, 1]} : vector<8x4096xf32> to vector<8x3840xf32>
    %c64 = arith.constant 64 : index
    %c0_18 = arith.constant 0 : index
    %23 = vector.load %arg9[%c64, %c0_18] : memref<72x4096xf32, #tpu.memory_space<vmem>>, vector<8x3840xf32>
    tpu.vector_store %arg9[%c64, %c0_18], %22 {strides = array<i32>} : memref<72x4096xf32, #tpu.memory_space<vmem>>, vector<8x3840xf32>,
    %cst_19 = arith.constant 0.000000e+00 : f32
    %24 = vector.broadcast %cst_19 : f32 to vector<8x256xf32>
    %c64_20 = arith.constant 64 : index
    %c3840_21 = arith.constant 3840 : index
    %25 = vector.load %arg9[%c64_20, %c3840_21] : memref<72x4096xf32, #tpu.memory_space<vmem>>, vector<8x256xf32>
    tpu.vector_store %arg9[%c64_20, %c3840_21], %24 {strides = array<i32>} : memref<72x4096xf32, #tpu.memory_space<vmem>>, vector<8x256xf32>,
    %c0_22 = arith.constant 0 : index
    %c0_23 = arith.constant 0 : index
    %c0_24 = arith.constant 0 : index
    %26 = vector.load %arg1[%c0_22, %c0_23, %c0_24] : memref<1x8x4096xf32, #tpu.memory_space<vmem>>, vector<1x8x4096xf32>
    %27 = vector.shape_cast %26 : vector<1x8x4096xf32> to vector<8x4096xf32>
    %c1_i32 = arith.constant 1 : i32
    %28 = tpu.dynamic_rotate %27 by %c1_i32 dim 1 : vector<8x4096xf32>, i32 -> vector<8x4096xf32>
    %c1 = arith.constant 1 : index
    %c0_25 = arith.constant 0 : index
    %29 = vector.load %arg6[%c1, %c0_25] : memref<2x4096xf32, #tpu.memory_space<vmem>>, vector<1x4096xf32>
    %30 = vector.broadcast %29 : vector<1x4096xf32> to vector<8x4096xf32>
    %31 = arith.mulf %28, %30 : vector<8x4096xf32>
    %32 = vector.extract_strided_slice %31 {offsets = [0, 0], sizes = [8, 3840], strides = [1, 1]} : vector<8x4096xf32> to vector<8x3840xf32>
    %c0_26 = arith.constant 0 : index
    %c256_27 = arith.constant 256 : index
    %33 = vector.load %arg9[%c0_26, %c256_27] : memref<72x4096xf32, #tpu.memory_space<vmem>>, vector<8x3840xf32>
    tpu.vector_store %arg9[%c0_26, %c256_27], %32 {strides = array<i32>} : memref<72x4096xf32, #tpu.memory_space<vmem>>, vector<8x3840xf32>,
    %cst_28 = arith.constant 0.000000e+00 : f32
    %34 = vector.broadcast %cst_28 : f32 to vector<8x256xf32>
    %c0_29 = arith.constant 0 : index
    %c0_30 = arith.constant 0 : index
    %35 = vector.load %arg9[%c0_29, %c0_30] : memref<72x4096xf32, #tpu.memory_space<vmem>>, vector<8x256xf32>
    tpu.vector_store %arg9[%c0_29, %c0_30], %34 {strides = array<i32>} : memref<72x4096xf32, #tpu.memory_space<vmem>>, vector<8x256xf32>,
    %c24 = arith.constant 24 : index
    %c0_31 = arith.constant 0 : index
    %36 = vector.load %arg9[%c24, %c0_31] : memref<72x4096xf32, #tpu.memory_space<vmem>>, vector<8x4096xf32>
    tpu.vector_store %arg9[%c24, %c0_31], %31 {strides = array<i32>} : memref<72x4096xf32, #tpu.memory_space<vmem>>, vector<8x4096xf32>,
    %37 = vector.extract_strided_slice %31 {offsets = [0, 256], sizes = [8, 3840], strides = [1, 1]} : vector<8x4096xf32> to vector<8x3840xf32>
    %c48 = arith.constant 48 : index
    %c0_32 = arith.constant 0 : index
    %38 = vector.load %arg9[%c48, %c0_32] : memref<72x4096xf32, #tpu.memory_space<vmem>>, vector<8x3840xf32>
    tpu.vector_store %arg9[%c48, %c0_32], %37 {strides = array<i32>} : memref<72x4096xf32, #tpu.memory_space<vmem>>, vector<8x3840xf32>,
    %cst_33 = arith.constant 0.000000e+00 : f32
    %39 = vector.broadcast %cst_33 : f32 to vector<8x256xf32>
    %c48_34 = arith.constant 48 : index
    %c3840_35 = arith.constant 3840 : index
    %40 = vector.load %arg9[%c48_34, %c3840_35] : memref<72x4096xf32, #tpu.memory_space<vmem>>, vector<8x256xf32>
    tpu.vector_store %arg9[%c48_34, %c3840_35], %39 {strides = array<i32>} : memref<72x4096xf32, #tpu.memory_space<vmem>>, vector<8x256xf32>,
    %c0_36 = arith.constant 0 : index
    %c0_37 = arith.constant 0 : index
    %41 = vector.load %arg2[%c0_36, %c0_37] : memref<8x72xf32, #tpu.memory_space<vmem>>, vector<8x72xf32>
    %c0_38 = arith.constant 0 : index
    %c0_39 = arith.constant 0 : index
    %42 = vector.load %arg9[%c0_38, %c0_39] : memref<72x4096xf32, #tpu.memory_space<vmem>>, vector<72x4096xf32>
    %cst_40 = arith.constant dense<0.000000e+00> : vector<8x4096xf32>
    %43 = tpu.matmul %41, %42, %cst_40 {dimension_numbers = #tpu.dot_dimension_numbers<[1], [0], [0], [1], [0, 0, 1, 1], [], []>} : vector<8x72xf32>, vector<72x4096xf32>, vector<8x4096xf32> -> vector<8x4096xf32>
    %c0_41 = arith.constant 0 : index
    %c0_42 = arith.constant 0 : index
    %44 = vector.load %arg3[%c0_41, %c0_42] : memref<8x1xf32, #tpu.memory_space<vmem>>, vector<8x1xf32>
    %45 = vector.broadcast %44 : vector<8x1xf32> to vector<8x4096xf32>
    %46 = arith.addf %43, %45 : vector<8x4096xf32>
    %cst_43 = arith.constant 0.000000e+00 : f32
    %47 = vector.broadcast %cst_43 : f32 to vector<8x4096xf32>
    %48 = arith.maximumf %46, %47 : vector<8x4096xf32>
    %c0_44 = arith.constant 0 : index
    %c0_45 = arith.constant 0 : index
    %49 = vector.load %arg10[%c0_44, %c0_45] : memref<8x4096xf32, #tpu.memory_space<vmem>>, vector<8x4096xf32>
    tpu.vector_store %arg10[%c0_44, %c0_45], %48 {strides = array<i32>} : memref<8x4096xf32, #tpu.memory_space<vmem>>, vector<8x4096xf32>,
    %c0_46 = arith.constant 0 : index
    %c0_47 = arith.constant 0 : index
    %50 = vector.load %arg10[%c0_46, %c0_47] : memref<8x4096xf32, #tpu.memory_space<vmem>>, vector<8x4096xf32>
    %51 = vector.extract_strided_slice %50 {offsets = [0, 0], sizes = [8, 3840], strides = [1, 1]} : vector<8x4096xf32> to vector<8x3840xf32>
    %c8_48 = arith.constant 8 : index
    %c256_49 = arith.constant 256 : index
    %52 = vector.load %arg9[%c8_48, %c256_49] : memref<72x4096xf32, #tpu.memory_space<vmem>>, vector<8x3840xf32>
    tpu.vector_store %arg9[%c8_48, %c256_49], %51 {strides = array<i32>} : memref<72x4096xf32, #tpu.memory_space<vmem>>, vector<8x3840xf32>,
    %cst_50 = arith.constant 0.000000e+00 : f32
    %53 = vector.broadcast %cst_50 : f32 to vector<8x256xf32>
    %c8_51 = arith.constant 8 : index
    %c0_52 = arith.constant 0 : index
    %54 = vector.load %arg9[%c8_51, %c0_52] : memref<72x4096xf32, #tpu.memory_space<vmem>>, vector<8x256xf32>
    tpu.vector_store %arg9[%c8_51, %c0_52], %53 {strides = array<i32>} : memref<72x4096xf32, #tpu.memory_space<vmem>>, vector<8x256xf32>,
    %c32_53 = arith.constant 32 : index
    %c0_54 = arith.constant 0 : index
    %55 = vector.load %arg9[%c32_53, %c0_54] : memref<72x4096xf32, #tpu.memory_space<vmem>>, vector<8x4096xf32>
    tpu.vector_store %arg9[%c32_53, %c0_54], %50 {strides = array<i32>} : memref<72x4096xf32, #tpu.memory_space<vmem>>, vector<8x4096xf32>,
    %56 = vector.extract_strided_slice %50 {offsets = [0, 256], sizes = [8, 3840], strides = [1, 1]} : vector<8x4096xf32> to vector<8x3840xf32>
    %c56_55 = arith.constant 56 : index
    %c0_56 = arith.constant 0 : index
    %57 = vector.load %arg9[%c56_55, %c0_56] : memref<72x4096xf32, #tpu.memory_space<vmem>>, vector<8x3840xf32>
    tpu.vector_store %arg9[%c56_55, %c0_56], %56 {strides = array<i32>} : memref<72x4096xf32, #tpu.memory_space<vmem>>, vector<8x3840xf32>,
    %cst_57 = arith.constant 0.000000e+00 : f32
    %58 = vector.broadcast %cst_57 : f32 to vector<8x256xf32>
    %c56_58 = arith.constant 56 : index
    %c3840_59 = arith.constant 3840 : index
    %59 = vector.load %arg9[%c56_58, %c3840_59] : memref<72x4096xf32, #tpu.memory_space<vmem>>, vector<8x256xf32>
    tpu.vector_store %arg9[%c56_58, %c3840_59], %58 {strides = array<i32>} : memref<72x4096xf32, #tpu.memory_space<vmem>>, vector<8x256xf32>,
    %c0_60 = arith.constant 0 : index
    %c0_61 = arith.constant 0 : index
    %60 = vector.load %arg10[%c0_60, %c0_61] : memref<8x4096xf32, #tpu.memory_space<vmem>>, vector<8x4096xf32>
    %c4095_i32_62 = arith.constant 4095 : i32
    %61 = tpu.dynamic_rotate %60 by %c4095_i32_62 dim 1 : vector<8x4096xf32>, i32 -> vector<8x4096xf32>
    %c0_63 = arith.constant 0 : index
    %c0_64 = arith.constant 0 : index
    %62 = vector.load %arg6[%c0_63, %c0_64] : memref<2x4096xf32, #tpu.memory_space<vmem>>, vector<1x4096xf32>
    %63 = vector.broadcast %62 : vector<1x4096xf32> to vector<8x4096xf32>
    %64 = arith.mulf %61, %63 : vector<8x4096xf32>
    %65 = vector.extract_strided_slice %64 {offsets = [0, 0], sizes = [8, 3840], strides = [1, 1]} : vector<8x4096xf32> to vector<8x3840xf32>
    %c16_65 = arith.constant 16 : index
    %c256_66 = arith.constant 256 : index
    %66 = vector.load %arg9[%c16_65, %c256_66] : memref<72x4096xf32, #tpu.memory_space<vmem>>, vector<8x3840xf32>
    tpu.vector_store %arg9[%c16_65, %c256_66], %65 {strides = array<i32>} : memref<72x4096xf32, #tpu.memory_space<vmem>>, vector<8x3840xf32>,
    %cst_67 = arith.constant 0.000000e+00 : f32
    %67 = vector.broadcast %cst_67 : f32 to vector<8x256xf32>
    %c16_68 = arith.constant 16 : index
    %c0_69 = arith.constant 0 : index
    %68 = vector.load %arg9[%c16_68, %c0_69] : memref<72x4096xf32, #tpu.memory_space<vmem>>, vector<8x256xf32>
    tpu.vector_store %arg9[%c16_68, %c0_69], %67 {strides = array<i32>} : memref<72x4096xf32, #tpu.memory_space<vmem>>, vector<8x256xf32>,
    %c40_70 = arith.constant 40 : index
    %c0_71 = arith.constant 0 : index
    %69 = vector.load %arg9[%c40_70, %c0_71] : memref<72x4096xf32, #tpu.memory_space<vmem>>, vector<8x4096xf32>
    tpu.vector_store %arg9[%c40_70, %c0_71], %64 {strides = array<i32>} : memref<72x4096xf32, #tpu.memory_space<vmem>>, vector<8x4096xf32>,
    %70 = vector.extract_strided_slice %64 {offsets = [0, 256], sizes = [8, 3840], strides = [1, 1]} : vector<8x4096xf32> to vector<8x3840xf32>
    %c64_72 = arith.constant 64 : index
    %c0_73 = arith.constant 0 : index
    %71 = vector.load %arg9[%c64_72, %c0_73] : memref<72x4096xf32, #tpu.memory_space<vmem>>, vector<8x3840xf32>
    tpu.vector_store %arg9[%c64_72, %c0_73], %70 {strides = array<i32>} : memref<72x4096xf32, #tpu.memory_space<vmem>>, vector<8x3840xf32>,
    %cst_74 = arith.constant 0.000000e+00 : f32
    %72 = vector.broadcast %cst_74 : f32 to vector<8x256xf32>
    %c64_75 = arith.constant 64 : index
    %c3840_76 = arith.constant 3840 : index
    %73 = vector.load %arg9[%c64_75, %c3840_76] : memref<72x4096xf32, #tpu.memory_space<vmem>>, vector<8x256xf32>
    tpu.vector_store %arg9[%c64_75, %c3840_76], %72 {strides = array<i32>} : memref<72x4096xf32, #tpu.memory_space<vmem>>, vector<8x256xf32>,
    %c0_77 = arith.constant 0 : index
    %c0_78 = arith.constant 0 : index
    %74 = vector.load %arg10[%c0_77, %c0_78] : memref<8x4096xf32, #tpu.memory_space<vmem>>, vector<8x4096xf32>
    %c1_i32_79 = arith.constant 1 : i32
    %75 = tpu.dynamic_rotate %74 by %c1_i32_79 dim 1 : vector<8x4096xf32>, i32 -> vector<8x4096xf32>
    %c1_80 = arith.constant 1 : index
    %c0_81 = arith.constant 0 : index
    %76 = vector.load %arg6[%c1_80, %c0_81] : memref<2x4096xf32, #tpu.memory_space<vmem>>, vector<1x4096xf32>
    %77 = vector.broadcast %76 : vector<1x4096xf32> to vector<8x4096xf32>
    %78 = arith.mulf %75, %77 : vector<8x4096xf32>
    %79 = vector.extract_strided_slice %78 {offsets = [0, 0], sizes = [8, 3840], strides = [1, 1]} : vector<8x4096xf32> to vector<8x3840xf32>
    %c0_82 = arith.constant 0 : index
    %c256_83 = arith.constant 256 : index
    %80 = vector.load %arg9[%c0_82, %c256_83] : memref<72x4096xf32, #tpu.memory_space<vmem>>, vector<8x3840xf32>
    tpu.vector_store %arg9[%c0_82, %c256_83], %79 {strides = array<i32>} : memref<72x4096xf32, #tpu.memory_space<vmem>>, vector<8x3840xf32>,
    %cst_84 = arith.constant 0.000000e+00 : f32
    %81 = vector.broadcast %cst_84 : f32 to vector<8x256xf32>
    %c0_85 = arith.constant 0 : index
    %c0_86 = arith.constant 0 : index
    %82 = vector.load %arg9[%c0_85, %c0_86] : memref<72x4096xf32, #tpu.memory_space<vmem>>, vector<8x256xf32>
    tpu.vector_store %arg9[%c0_85, %c0_86], %81 {strides = array<i32>} : memref<72x4096xf32, #tpu.memory_space<vmem>>, vector<8x256xf32>,
    %c24_87 = arith.constant 24 : index
    %c0_88 = arith.constant 0 : index
    %83 = vector.load %arg9[%c24_87, %c0_88] : memref<72x4096xf32, #tpu.memory_space<vmem>>, vector<8x4096xf32>
    tpu.vector_store %arg9[%c24_87, %c0_88], %78 {strides = array<i32>} : memref<72x4096xf32, #tpu.memory_space<vmem>>, vector<8x4096xf32>,
    %84 = vector.extract_strided_slice %78 {offsets = [0, 256], sizes = [8, 3840], strides = [1, 1]} : vector<8x4096xf32> to vector<8x3840xf32>
    %c48_89 = arith.constant 48 : index
    %c0_90 = arith.constant 0 : index
    %85 = vector.load %arg9[%c48_89, %c0_90] : memref<72x4096xf32, #tpu.memory_space<vmem>>, vector<8x3840xf32>
    tpu.vector_store %arg9[%c48_89, %c0_90], %84 {strides = array<i32>} : memref<72x4096xf32, #tpu.memory_space<vmem>>, vector<8x3840xf32>,
    %cst_91 = arith.constant 0.000000e+00 : f32
    %86 = vector.broadcast %cst_91 : f32 to vector<8x256xf32>
    %c48_92 = arith.constant 48 : index
    %c3840_93 = arith.constant 3840 : index
    %87 = vector.load %arg9[%c48_92, %c3840_93] : memref<72x4096xf32, #tpu.memory_space<vmem>>, vector<8x256xf32>
    tpu.vector_store %arg9[%c48_92, %c3840_93], %86 {strides = array<i32>} : memref<72x4096xf32, #tpu.memory_space<vmem>>, vector<8x256xf32>,
    %c0_94 = arith.constant 0 : index
    %c0_95 = arith.constant 0 : index
    %88 = vector.load %arg4[%c0_94, %c0_95] : memref<8x72xf32, #tpu.memory_space<vmem>>, vector<8x72xf32>
    %c0_96 = arith.constant 0 : index
    %c0_97 = arith.constant 0 : index
    %89 = vector.load %arg9[%c0_96, %c0_97] : memref<72x4096xf32, #tpu.memory_space<vmem>>, vector<72x4096xf32>
    %cst_98 = arith.constant dense<0.000000e+00> : vector<8x4096xf32>
    %90 = tpu.matmul %88, %89, %cst_98 {dimension_numbers = #tpu.dot_dimension_numbers<[1], [0], [0], [1], [0, 0, 1, 1], [], []>} : vector<8x72xf32>, vector<72x4096xf32>, vector<8x4096xf32> -> vector<8x4096xf32>
    %c0_99 = arith.constant 0 : index
    %c0_100 = arith.constant 0 : index
    %c0_101 = arith.constant 0 : index
    %91 = vector.load %arg1[%c0_99, %c0_100, %c0_101] : memref<1x8x4096xf32, #tpu.memory_space<vmem>>, vector<1x8x4096xf32>
    %92 = vector.shape_cast %91 : vector<1x8x4096xf32> to vector<8x4096xf32>
    %93 = arith.addf %92, %90 : vector<8x4096xf32>
    %c0_102 = arith.constant 0 : index
    %c0_103 = arith.constant 0 : index
    %94 = vector.load %arg5[%c0_102, %c0_103] : memref<8x1xf32, #tpu.memory_space<vmem>>, vector<8x1xf32>
    %95 = vector.broadcast %94 : vector<8x1xf32> to vector<8x4096xf32>
    %96 = arith.addf %93, %95 : vector<8x4096xf32>
    %cst_104 = arith.constant 0.000000e+00 : f32
    %97 = vector.broadcast %cst_104 : f32 to vector<8x4096xf32>
    %98 = arith.maximumf %96, %97 : vector<8x4096xf32>
    %c4095_i32_105 = arith.constant 4095 : i32
    %99 = tpu.dynamic_rotate %98 by %c4095_i32_105 dim 1 : vector<8x4096xf32>, i32 -> vector<8x4096xf32>
    %100 = arith.maximumf %98, %99 : vector<8x4096xf32>
    %101 = vector.extract_strided_slice %100 {offsets = [0, 0], sizes = [8, 256], strides = [1, 1]} : vector<8x4096xf32> to vector<8x256xf32>
    %102 = vector.extract_strided_slice %100 {offsets = [0, 256], sizes = [8, 256], strides = [1, 1]} : vector<8x4096xf32> to vector<8x256xf32>
    %103 = arith.maximumf %101, %102 : vector<8x256xf32>
    %104 = vector.extract_strided_slice %100 {offsets = [0, 512], sizes = [8, 256], strides = [1, 1]} : vector<8x4096xf32> to vector<8x256xf32>
    %105 = vector.extract_strided_slice %100 {offsets = [0, 768], sizes = [8, 256], strides = [1, 1]} : vector<8x4096xf32> to vector<8x256xf32>
    %106 = arith.maximumf %104, %105 : vector<8x256xf32>
    %107 = vector.extract_strided_slice %100 {offsets = [0, 1024], sizes = [8, 256], strides = [1, 1]} : vector<8x4096xf32> to vector<8x256xf32>
    %108 = vector.extract_strided_slice %100 {offsets = [0, 1280], sizes = [8, 256], strides = [1, 1]} : vector<8x4096xf32> to vector<8x256xf32>
    %109 = arith.maximumf %107, %108 : vector<8x256xf32>
    %110 = vector.extract_strided_slice %100 {offsets = [0, 1536], sizes = [8, 256], strides = [1, 1]} : vector<8x4096xf32> to vector<8x256xf32>
    %111 = vector.extract_strided_slice %100 {offsets = [0, 1792], sizes = [8, 256], strides = [1, 1]} : vector<8x4096xf32> to vector<8x256xf32>
    %112 = arith.maximumf %110, %111 : vector<8x256xf32>
    %113 = vector.extract_strided_slice %100 {offsets = [0, 2048], sizes = [8, 256], strides = [1, 1]} : vector<8x4096xf32> to vector<8x256xf32>
    %114 = vector.extract_strided_slice %100 {offsets = [0, 2304], sizes = [8, 256], strides = [1, 1]} : vector<8x4096xf32> to vector<8x256xf32>
    %115 = arith.maximumf %113, %114 : vector<8x256xf32>
    %116 = vector.extract_strided_slice %100 {offsets = [0, 2560], sizes = [8, 256], strides = [1, 1]} : vector<8x4096xf32> to vector<8x256xf32>
    %117 = vector.extract_strided_slice %100 {offsets = [0, 2816], sizes = [8, 256], strides = [1, 1]} : vector<8x4096xf32> to vector<8x256xf32>
    %118 = arith.maximumf %116, %117 : vector<8x256xf32>
    %119 = vector.extract_strided_slice %100 {offsets = [0, 3072], sizes = [8, 256], strides = [1, 1]} : vector<8x4096xf32> to vector<8x256xf32>
    %120 = vector.extract_strided_slice %100 {offsets = [0, 3328], sizes = [8, 256], strides = [1, 1]} : vector<8x4096xf32> to vector<8x256xf32>
    %121 = arith.maximumf %119, %120 : vector<8x256xf32>
    %122 = vector.extract_strided_slice %100 {offsets = [0, 3584], sizes = [8, 256], strides = [1, 1]} : vector<8x4096xf32> to vector<8x256xf32>
    %123 = vector.extract_strided_slice %100 {offsets = [0, 3840], sizes = [8, 256], strides = [1, 1]} : vector<8x4096xf32> to vector<8x256xf32>
    %124 = arith.maximumf %122, %123 : vector<8x256xf32>
    %125 = tpu.concatenate %103, %106, %109, %112, %115, %118, %121, %124 in 0 : vector<8x256xf32>, vector<8x256xf32>, vector<8x256xf32>, vector<8x256xf32>, vector<8x256xf32>, vector<8x256xf32>, vector<8x256xf32>, vector<8x256xf32> -> vector<64x256xf32>
    %c0_106 = arith.constant 0 : index
    %c0_107 = arith.constant 0 : index
    %126 = vector.load %arg7[%c0_106, %c0_107] : memref<256x128xf32, #tpu.memory_space<vmem>>, vector<256x128xf32>
    %cst_108 = arith.constant dense<0.000000e+00> : vector<64x128xf32>
    %127 = tpu.matmul %125, %126, %cst_108 {dimension_numbers = #tpu.dot_dimension_numbers<[1], [0], [0], [1], [0, 0, 1, 1], [], []>} : vector<64x256xf32>, vector<256x128xf32>, vector<64x128xf32> -> vector<64x128xf32>
    %c0_109 = arith.constant 0 : index
    %c0_110 = arith.constant 0 : index
    %c0_111 = arith.constant 0 : index
    %128 = vector.load %arg8[%c0_109, %c0_110, %c0_111] : memref<1x64x128xf32, #tpu.memory_space<vmem>>, vector<1x64x128xf32>
    %129 = vector.shape_cast %128 : vector<1x64x128xf32> to vector<64x128xf32>
    %130 = vector.shape_cast %127 : vector<64x128xf32> to vector<1x64x128xf32>
    tpu.vector_store %arg8[%c0_109, %c0_110, %c0_111], %130 {strides = array<i32>} : memref<1x64x128xf32, #tpu.memory_space<vmem>>, vector<1x64x128xf32>,
    return
  }
  func.func @transform_0(%arg0: i32) -> (i32, i32, i32) {
    %c0_i32 = arith.constant 0 : i32
    %c0_i32_0 = arith.constant 0 : i32
    %c0_i32_1 = arith.constant 0 : i32
    return %arg0, %c0_i32, %c0_i32_0 : i32, i32, i32
  }
  func.func @transform_1(%arg0: i32) -> (i32, i32) {
    %c0_i32 = arith.constant 0 : i32
    %c0_i32_0 = arith.constant 0 : i32
    %c0_i32_1 = arith.constant 0 : i32
    return %c0_i32, %c0_i32_0 : i32, i32
  }
  func.func @transform_2(%arg0: i32) -> (i32, i32) {
    %c0_i32 = arith.constant 0 : i32
    %c0_i32_0 = arith.constant 0 : i32
    %c0_i32_1 = arith.constant 0 : i32
    return %c0_i32, %c0_i32_0 : i32, i32
  }
  func.func @transform_3(%arg0: i32) -> (i32, i32) {
    %c0_i32 = arith.constant 0 : i32
    %c0_i32_0 = arith.constant 0 : i32
    %c0_i32_1 = arith.constant 0 : i32
    return %c0_i32, %c0_i32_0 : i32, i32
  }
  func.func @transform_4(%arg0: i32) -> (i32, i32) {
    %c0_i32 = arith.constant 0 : i32
    %c0_i32_0 = arith.constant 0 : i32
    %c0_i32_1 = arith.constant 0 : i32
    return %c0_i32, %c0_i32_0 : i32, i32
  }
  func.func @transform_5(%arg0: i32) -> (i32, i32) {
    %c0_i32 = arith.constant 0 : i32
    %c0_i32_0 = arith.constant 0 : i32
    %c0_i32_1 = arith.constant 0 : i32
    return %c0_i32, %c0_i32_0 : i32, i32
  }
  func.func @transform_6(%arg0: i32) -> (i32, i32) {
    %c0_i32 = arith.constant 0 : i32
    %c0_i32_0 = arith.constant 0 : i32
    %c0_i32_1 = arith.constant 0 : i32
    return %c0_i32, %c0_i32_0 : i32, i32
  }
  func.func @transform_7(%arg0: i32) -> (i32, i32, i32) {
    %c0_i32 = arith.constant 0 : i32
    %c0_i32_0 = arith.constant 0 : i32
    %c0_i32_1 = arith.constant 0 : i32
    return %arg0, %c0_i32, %c0_i32_0 : i32, i32, i32
  }
}

</mosaic_0001>

<bundles_post_ra>
// kernel: conv3_2d_resmp.1
= control target key start
LH: loop header
LB: loop body
LE: loop exit
PB: predicated region body
PF: predicated region fallthrough
CT: control target
= control target key end

     0   :  { %s5912_s24 = smov 0   ;;  %s8613_s0 = inlined_call_operand.vmem [shape: f32[2,8,4096], index: 0, kind: input, shape index: {}]   ;;  %s8614_s1 = inlined_call_operand.vmem [shape: f32[8,72], index: 1, kind: input, shape index: {}]   ;;  %s8615_s2 = inlined_call_operand.vmem [shape: f32[8,1], index: 2, kind: input, shape index: {}]   ;;  %s8616_s3 = inlined_call_operand.vmem [shape: f32[8,72], index: 3, kind: input, shape index: {}]   ;;  %s8617_s4 = inlined_call_operand.vmem [shape: f32[8,1], index: 4, kind: input, shape index: {}]   ;;  %s8618_s5 = inlined_call_operand.vmem [shape: f32[2,4096], index: 5, kind: input, shape index: {}]   ;;  %s8619_s6 = inlined_call_operand.vmem [shape: f32[256,128], index: 6, kind: input, shape index: {}]   ;;  %s8620_s7 = inlined_call_operand.vmem [shape: f32[2,64,128], index: 7, kind: output, shape index: {}]  }
   0x1 LB: > { %s5647_s25 = sadd.s32 4294967295, %s5866_s24   ;;  %p5651_p0 = scmp.ge.s32.totalorder %s5866_s24, 1  ;;  %s5866_s24 = sphi %s5912_s24, %s17_s24  }
   0x2   : > { %p237_p1 = scmp.lt.s32.totalorder %s5866_s24, 3 }
   0x4   : > { %p238_p2 = pnand %p5651_p0, %p237_p1 }
   0x6   : > { %241 = sbr.rel (%p238_p2) target bundleno = 1309 (0x51d), region = 48 }
   0xb   : > { %p269_p3 = scmp.lt.s32.totalorder %s5647_s25, 1  ;;  %s5868_s30 = smov 127   ;;  %v8621_v5 = vmov 0.0   ;;  %v5871_v27 = vmov 0   ;;  %v503_v32 = vlaneseq  ;;  %v6128_v41 = vld [vmem:[%s8618_s5] ss:$2 sm:$0xff] }
   0xc   : > { %s5869_s8 = smov 1   ;;  %1629 = vmatprep.mubr.f32.mxu1 %v8621_v5  ;;  %1771 = vmatprep.mubr.f32.mxu0 %v8621_v5  ;;  %v6140_v44 = vld [vmem:[%s8618_s5 + $0x1] ss:$2 sm:$0xff]  ;;  %vm1561_vm2 = vcmask 588800  }
   0xd   : > { %s8743_s25 = smov (!%p269_p3, %s5647_s25), 1  ;;  %5774 = vset.pattern.permute.xlu0 %v5871_v27  ;;  %v6112_v34 = vshrl.u32 %v503_v32, 7  ;;  %v6114_v35 = vand.u32 127, %v503_v32  ;;  %v1555_v63 = vld [vmem:[%s8615_s2] sm:$0xff] }
   0xe   : > { %s5704_s26 = sshll.u32 %s8743_s25, 8 }
   0xf   : > { %s5926_s29 = scalar_lea.vmem %s8613_s0, %s5704_s26  ;;  %v6119_v36 = vsub.s32 3, %v6112_v34  ;;  %v6123_v38 = vsub.s32 2, %v6112_v34  ;;  %vm505_vm0 = vcmp.lt.s32.totalorder %v6114_v35, 127  ;;  %vm933_vm1 = vcmp.lt.s32.totalorder %v6114_v35, 1 }
  0x10   : > { %v5929_v0 = vld [vmem:[%s5926_s29 + $0x18] sm:$0xff]  ;;  %v5932_v1 = vld [vmem:[%s5926_s29 + $0x10] sm:$0xff]  ;;  %v5939_v2 = vld [vmem:[%s5926_s29 + $0x20] sm:$0xff]  ;;  %v6148_v49 = vsub.s32 1, %v6112_v34  ;;  %v6159_v53 = vsub.s32 0, %v6112_v34 }
  0x11   : > { %445 = vrot.lane.b32.xlu0 %v5929_v0, %s5868_s30  ;;  %443 = vrot.lane.b32.xlu1 %v5932_v1, %s5868_s30  ;;  %v5946_v3 = vld [vmem:[%s5926_s29 + $0x8] sm:$0xff]  ;;  %v5953_v4 = vld [vmem:[%s5926_s29] sm:$0xff]  ;;  %v564_v42 = vrot.slane %v6128_v41, %v6119_v36  ;;  %v560_v43 = vrot.slane %v6128_v41, %v6123_v38  ;;  %v993_v51 = vrot.slane %v6140_v44, %v6119_v36 }
  0x12   : > { %v5962_v6 = vld [vmem:[%s5926_s29 + $0xf8] sm:$0xff]  ;;  %v5969_v7 = vld [vmem:[%s5926_s29 + $0x28] sm:$0xff]  ;;  %v5972_v8 = vld [vmem:[%s5926_s29 + $0x30] sm:$0xff]  ;;  %8685 = vst [vmem:[#allocation9_spill] sm:$0xff] %v6148_v49  ;;  %v989_v52 = vrot.slane %v6140_v44, %v6123_v38  ;;  %v556_v59 = vrot.slane %v6128_v41, %v6148_v49  ;;  %v552_v62 = vrot.slane %v6128_v41, %v6159_v53  ;;  %v985_v27 = vrot.slane %v6140_v44, %v6148_v49 }
  0x13   : > { %v5983_v9 = vld [vmem:[%s5926_s29 + $0x48] sm:$0xff]  ;;  %v5986_v10 = vld [vmem:[%s5926_s29 + $0x50] sm:$0xff]  ;;  %v5993_v11 = vld [vmem:[%s5926_s29 + $0x40] sm:$0xff] }
  0x14   : > { %v6000_v12 = vld [vmem:[%s5926_s29 + $0x38] sm:$0xff]  ;;  %v6011_v13 = vld [vmem:[%s5926_s29 + $0x68] sm:$0xff]  ;;  %v6014_v14 = vld [vmem:[%s5926_s29 + $0x70] sm:$0xff] }
  0x15   : > { %447 = vrot.lane.b32.xlu0 %v5939_v2, %s5868_s30  ;;  %873 = vrot.lane.b32.xlu1 %v5932_v1, %s5869_s8  ;;  %v6021_v15 = vld [vmem:[%s5926_s29 + $0x60] sm:$0xff]  ;;  %v6028_v16 = vld [vmem:[%s5926_s29 + $0x58] sm:$0xff] }
  0x16   : > { %v6039_v17 = vld [vmem:[%s5926_s29 + $0x88] sm:$0xff]  ;;  %v6042_v18 = vld [vmem:[%s5926_s29 + $0x90] sm:$0xff]  ;;  %v6049_v19 = vld [vmem:[%s5926_s29 + $0x80] sm:$0xff] }
  0x17   : > { %8680 = vst [vmem:[#allocation4_spill] sm:$0xff] %v6042_v18  ;;  %v6056_v20 = vld [vmem:[%s5926_s29 + $0x78] sm:$0xff]  ;;  %v6067_v21 = vld [vmem:[%s5926_s29 + $0xa8] sm:$0xff]  ;;  %v429_v22 = vld [vmem:[%s5926_s29 + $0xb0] sm:$0xff] }
  0x18   : > { %8681 = vst [vmem:[#allocation5_spill] sm:$0xff] %v6067_v21  ;;  %v6074_v23 = vld [vmem:[%s5926_s29 + $0xa0] sm:$0xff]  ;;  %v6081_v24 = vld [vmem:[%s5926_s29 + $0x98] sm:$0xff]  ;;  %v432_v25 = vld [vmem:[%s5926_s29 + $0xc8] sm:$0xff] }
  0x19   : > { %875 = vrot.lane.b32.xlu0 %v5929_v0, %s5869_s8  ;;  %871 = vrot.lane.b32.xlu1 %v5946_v3, %s5869_s8  ;;  %8682 = vst [vmem:[#allocation6_spill] sm:$0xff] %v6074_v23  ;;  %8683 = vst [vmem:[#allocation7_spill] sm:$0xff] %v6081_v24  ;;  %v433_v26 = vld [vmem:[%s5926_s29 + $0xd0] sm:$0xff]  ;;  %v431_v28 = vld [vmem:[%s5926_s29 + $0xc0] sm:$0xff] }
  0x1a   : > { %v6099_v29 = vld [vmem:[%s5926_s29 + $0xb8] sm:$0xff]  ;;  %v436_v30 = vld [vmem:[%s5926_s29 + $0xe8] sm:$0xff]  ;;  %v437_v31 = vld [vmem:[%s5926_s29 + $0xf0] sm:$0xff] }
  0x1b   : > { %8684 = vst [vmem:[#allocation8_spill] sm:$0xff] %v6099_v29  ;;  %v435_v33 = vld [vmem:[%s5926_s29 + $0xe0] sm:$0xff]  ;;  %v864_v37 = vld [vmem:[%s5926_s29 + $0xd8] sm:$0xff] }
  0x1d   : > { %441 = vrot.lane.b32.xlu0 %v5946_v3, %s5868_s30  ;;  %439 = vrot.lane.b32.xlu1 %v5953_v4, %s5868_s30 }
  0x21   : > { %869 = vrot.lane.b32.xlu0 %v5953_v4, %s5869_s8  ;;  %931 = vrot.lane.b32.xlu1 %v5962_v6, %s5869_s8 }
  0x25   : > { %449 = vrot.lane.b32.xlu0 %v5969_v7, %s5868_s30  ;;  %451 = vrot.lane.b32.xlu1 %v5972_v8, %s5868_s30 }
  0x29   : > { %877 = vrot.lane.b32.xlu0 %v5939_v2, %s5869_s8  ;;  %879 = vrot.lane.b32.xlu1 %v5969_v7, %s5869_s8 }
  0x2d   : > { %457 = vrot.lane.b32.xlu0 %v5983_v9, %s5868_s30  ;;  %459 = vrot.lane.b32.xlu1 %v5986_v10, %s5868_s30 }
  0x31   : > { %455 = vrot.lane.b32.xlu0 %v5993_v11, %s5868_s30  ;;  %885 = vrot.lane.b32.xlu1 %v5993_v11, %s5869_s8 }
  0x35   : > { %887 = vrot.lane.b32.xlu0 %v5983_v9, %s5869_s8  ;;  %883 = vrot.lane.b32.xlu1 %v6000_v12, %s5869_s8 }
  0x39   : > { %453 = vrot.lane.b32.xlu0 %v6000_v12, %s5868_s30  ;;  %881 = vrot.lane.b32.xlu1 %v5972_v8, %s5869_s8 }
  0x3d   : > { %465 = vrot.lane.b32.xlu0 %v6011_v13, %s5868_s30  ;;  %467 = vrot.lane.b32.xlu1 %v6014_v14, %s5868_s30 }
  0x41   : > { %463 = vrot.lane.b32.xlu0 %v6021_v15, %s5868_s30  ;;  %893 = vrot.lane.b32.xlu1 %v6021_v15, %s5869_s8 }
  0x45   : > { %895 = vrot.lane.b32.xlu0 %v6011_v13, %s5869_s8  ;;  %891 = vrot.lane.b32.xlu1 %v6028_v16, %s5869_s8 }
  0x49   : > { %461 = vrot.lane.b32.xlu0 %v6028_v16, %s5868_s30  ;;  %889 = vrot.lane.b32.xlu1 %v5986_v10, %s5869_s8 }
  0x4d   : > { %473 = vrot.lane.b32.xlu0 %v6039_v17, %s5868_s30  ;;  %475 = vrot.lane.b32.xlu1 %v6042_v18, %s5868_s30 }
  0x51   : > { %471 = vrot.lane.b32.xlu0 %v6049_v19, %s5868_s30  ;;  %901 = vrot.lane.b32.xlu1 %v6049_v19, %s5869_s8 }
  0x55   : > { %903 = vrot.lane.b32.xlu0 %v6039_v17, %s5869_s8  ;;  %899 = vrot.lane.b32.xlu1 %v6056_v20, %s5869_s8 }
  0x59   : > { %469 = vrot.lane.b32.xlu0 %v6056_v20, %s5868_s30  ;;  %897 = vrot.lane.b32.xlu1 %v6014_v14, %s5869_s8 }
  0x5d   : > { %481 = vrot.lane.b32.xlu0 %v6067_v21, %s5868_s30  ;;  %483 = vrot.lane.b32.xlu1 %v429_v22, %s5868_s30 }
  0x61   : > { %479 = vrot.lane.b32.xlu0 %v6074_v23, %s5868_s30  ;;  %909 = vrot.lane.b32.xlu1 %v6074_v23, %s5869_s8  ;;  %v6314_v23 = vld [vmem:[%s8618_s5 + $0x11] ss:$2 sm:$0xff] }
  0x65   : > { %911 = vrot.lane.b32.xlu0 %v6067_v21, %s5869_s8  ;;  %907 = vrot.lane.b32.xlu1 %v6081_v24, %s5869_s8 }
  0x69   : > { %477 = vrot.lane.b32.xlu0 %v6081_v24, %s5868_s30  ;;  %905 = vrot.lane.b32.xlu1 %v6042_v18, %s5869_s8 }
  0x6d   : > { %489 = vrot.lane.b32.xlu0 %v432_v25, %s5868_s30  ;;  %491 = vrot.lane.b32.xlu1 %v433_v26, %s5868_s30 }
  0x71   : > { %487 = vrot.lane.b32.xlu0 %v431_v28, %s5868_s30  ;;  %917 = vrot.lane.b32.xlu1 %v431_v28, %s5869_s8 }
  0x75   : > { %919 = vrot.lane.b32.xlu0 %v432_v25, %s5869_s8  ;;  %915 = vrot.lane.b32.xlu1 %v6099_v29, %s5869_s8 }
  0x79   : > { %485 = vrot.lane.b32.xlu0 %v6099_v29, %s5868_s30  ;;  %913 = vrot.lane.b32.xlu1 %v429_v22, %s5869_s8 }
  0x7d   : > { %497 = vrot.lane.b32.xlu0 %v436_v30, %s5868_s30  ;;  %499 = vrot.lane.b32.xlu1 %v437_v31, %s5868_s30 }
  0x81   : > { %495 = vrot.lane.b32.xlu0 %v435_v33, %s5868_s30  ;;  %925 = vrot.lane.b32.xlu1 %v435_v33, %s5869_s8 }
  0x83   : > { %v446_v39 = vpop.permute.xlu0 %445  ;;  %v444_v40 = vpop.permute.xlu1 %443 }
  0x84   : > { %v534_v45 = vsel %vm505_vm0, %v444_v40, %v446_v39 }
  0x85   : > { %927 = vrot.lane.b32.xlu0 %v436_v30, %s5869_s8  ;;  %923 = vrot.lane.b32.xlu1 %v864_v37, %s5869_s8  ;;  %v6161_v54 = vmul.f32 %v560_v43, %v534_v45  ;;  %v6221_v45 = vsub.s32 4, %v6112_v34 }
  0x87   : > { %v448_v46 = vpop.permute.xlu0 %447  ;;  %v874_v47 = vpop.permute.xlu1 %873 }
  0x88   : > { %v533_v48 = vsel %vm505_vm0, %v446_v39, %v448_v46 }
  0x89   : > { %493 = vrot.lane.b32.xlu0 %v864_v37, %s5868_s30  ;;  %921 = vrot.lane.b32.xlu1 %v433_v26, %s5869_s8  ;;  %v6152_v50 = vmul.f32 %v564_v42, %v533_v48  ;;  %v6206_v37 = vsub.s32 5, %v6112_v34 }
  0x8b   : > { %1579 = vmatprep.subr.mxu1 %v6152_v50  ;;  %v876_v55 = vpop.permute.xlu0 %875  ;;  %v872_v56 = vpop.permute.xlu1 %871 }
  0x8c   : > { %v962_v57 = vsel %vm933_vm1, %v874_v47, %v876_v55  ;;  %v963_v58 = vsel %vm933_vm1, %v872_v56, %v874_v47  ;;  %1580 = vmatpush1.msra.mxu1 %v6161_v54 }
  0x8d   : > { %501 = vrot.lane.b32.xlu0 %v5962_v6, %s5868_s30  ;;  %929 = vrot.lane.b32.xlu1 %v437_v31, %s5869_s8  ;;  %v6174_v60 = vmul.f32 %v993_v51, %v962_v57  ;;  %v6176_v61 = vmul.f32 %v989_v52, %v963_v58  ;;  %v981_v31 = vrot.slane %v6140_v44, %v6159_v53 }
  0x8e   : > { %1581 = vmatprep.subr.mxu1 %v5929_v0  ;;  %v572_v51 = vrot.slane %v6128_v41, %v6206_v37 }
  0x8f   : > { %1582 = vmatpush1.msra.mxu1 %v5932_v1  ;;  %v442_v22 = vpop.permute.xlu0 %441  ;;  %v6185_v25 = vpop.permute.xlu1 %439 }
  0x90   : > { %8686 = vst [vmem:[#allocation10_spill] sm:$0xff] %v6185_v25  ;;  %v535_v6 = vsel %vm505_vm0, %v442_v22, %v444_v40  ;;  %v536_v26 = vsel %vm505_vm0, %v6185_v25, %v442_v22  ;;  %1583 = vmatprep.subr.mxu1 %v6174_v60 }
  0x91   : > { %1584 = vmatpush1.msra.mxu1 %v6176_v61  ;;  %v6196_v28 = vmul.f32 %v556_v59, %v535_v6  ;;  %v6198_v30 = vmul.f32 %v552_v62, %v536_v26  ;;  %1558 = vperm.xlu0 %5774, %v1555_v63   ;;  %v1001_v63 = vrot.slane %v6140_v44, %v6206_v37  ;;  %v6246_v6 = vld [vmem:[%s8614_s1] sm:$0xff] }
  0x92   : > { %v997_v26 = vrot.slane %v6140_v44, %v6221_v45 }
  0x93   : > { %v870_v32 = vpop.permute.xlu0 %869  ;;  %v6202_v33 = vpop.permute.xlu1 %931  ;;  %1585 = vmatprep.subr.mxu1 %v6196_v28 }
  0x94   : > { %8687 = vst [vmem:[#allocation11_spill] sm:$0xff] %v6202_v33  ;;  %v964_v39 = vsel %vm933_vm1, %v870_v32, %v872_v56  ;;  %v965_v40 = vsel %vm933_vm1, %v6202_v33, %v870_v32  ;;  %1586 = vmatpush1.msra.mxu1 %v6198_v30  ;;  %v568_v56 = vrot.slane %v6128_v41, %v6221_v45 }
  0x95   : > { %1587 = vmatprep.subr.mxu1 %v5946_v3  ;;  %v6215_v42 = vmul.f32 %v985_v27, %v964_v39  ;;  %v6217_v43 = vmul.f32 %v981_v31, %v965_v40 }
  0x96   : > { %1588 = vmatpush1.msra.mxu1 %v5953_v4 }
  0x97   : > { %v450_v47 = vpop.permute.xlu0 %449  ;;  %v452_v48 = vpop.permute.xlu1 %451  ;;  %1589 = vmatprep.subr.mxu1 %v6215_v42 }
  0x98   : > { %v531_v52 = vsel %vm505_vm0, %v450_v47, %v452_v48  ;;  %1590 = vmatpush1.msra.mxu1 %v6217_v43  ;;  %v532_v57 = vsel %vm505_vm0, %v448_v46, %v450_v47 }
  0x99   : > { %1591 = vmatprep.subr.mxu1 %v8621_v5  ;;  %v6236_v62 = vmul.f32 %v572_v51, %v531_v52  ;;  %v6249_v46 = vmul.f32 %v568_v56, %v532_v57  ;;  %v6273_v51 = vsub.s32 7, %v6112_v34  ;;  %v6276_v52 = vsub.s32 6, %v6112_v34 }
  0x9a   : > { %1592 = vmatpush1.msra.mxu1 %v8621_v5 }
  0x9b   : > { %v878_v58 = vpop.permute.xlu0 %877  ;;  %v880_v59 = vpop.permute.xlu1 %879  ;;  %1593 = vmatprep.subr.mxu1 %v8621_v5  ;;  %v580_v34 = vrot.slane %v6128_v41, %v6273_v51  ;;  %v1005_v21 = vrot.slane %v6140_v44, %v6276_v52 }
  0x9c   : > { %v960_v22 = vsel %vm933_vm1, %v878_v58, %v880_v59  ;;  %1594 = vmatpush1.msra.mxu1 %v8621_v5  ;;  %v961_v27 = vsel %vm933_vm1, %v876_v55, %v878_v58  ;;  %v6286_v58 = vld [vmem:[%s8618_s5 + $0x10] ss:$2 sm:$0xff] }
  0x9d   : > { %1595 = vmatprep.subr.mxu1 %v8621_v5  ;;  %v6261_v39 = vmul.f32 %v1001_v63, %v960_v22  ;;  %v6266_v40 = vmul.f32 %v997_v26, %v961_v27  ;;  %v576_v63 = vrot.slane %v6128_v41, %v6276_v52  ;;  %v1009_v27 = vrot.slane %v6140_v44, %v6273_v51 }
  0x9e   : > { %1596 = vmatpush1.msra.mxu1 %v8621_v5  ;;  %v588_v41 = vrot.slane %v6286_v58, %v6148_v49  ;;  %v584_v29 = vrot.slane %v6286_v58, %v6159_v53  ;;  %v1017_v44 = vrot.slane %v6314_v23, %v6148_v49 }
  0x9f   : > { %v458_v31 = vpop.permute.xlu0 %457  ;;  %v6256_v32 = vpop.permute.xlu1 %459  ;;  %5663 = vmatmul.mubr.msk.f32.vlgmr.msra.gmra.mxu1 %vm1561_vm2, %v6246_v6  ;;  %1650 = vmatprep.subr.mxu1 %v6236_v62 }
  0xa0   : > { %1651 = vmatpush1.msra.mxu1 %v6249_v46  ;;  %1700 = vmatprep.mubr.f32.mxu1 %v8621_v5 }
  0xa1   : > { %1652 = vmatprep.subr.mxu1 %v5969_v7 }
  0xa2   : > { %1653 = vmatpush1.msra.mxu1 %v5939_v2 }
  0xa3   : > { %v456_v55 = vpop.permute.xlu0 %455  ;;  %v886_v47 = vpop.permute.xlu1 %885  ;;  %1654 = vmatprep.subr.mxu1 %v6261_v39 }
  0xa4   : > { %1655 = vmatpush1.msra.mxu1 %v6266_v40 }
  0xa5   : > { %1656 = vmatprep.subr.mxu1 %v6152_v50 }
  0xa6   : > { %1657 = vmatpush1.msra.mxu1 %v6161_v54 }
  0xa7   : > { %v6279_v56 = vpop.permute.xlu0 %887  ;;  %v884_v57 = vpop.permute.xlu1 %883  ;;  %1658 = vmatprep.subr.mxu1 %v5929_v0 }
  0xa8   : > { %1659 = vmatpush1.msra.mxu1 %v5932_v1 }
  0xa9   : > { %1660 = vmatprep.subr.mxu1 %v6174_v60 }
  0xaa   : > { %1661 = vmatpush1.msra.mxu1 %v6176_v61 }
  0xab   : > { %v454_v22 = vpop.permute.xlu0 %453  ;;  %v882_v26 = vpop.permute.xlu1 %881  ;;  %1662 = vmatprep.subr.mxu1 %v6196_v28  ;;  %v527_v28 = vsel %vm505_vm0, %v458_v31, %v6256_v32 }
  0xac   : > { %v529_v5 = vsel %vm505_vm0, %v454_v22, %v456_v55  ;;  %v530_v33 = vsel %vm505_vm0, %v452_v48, %v454_v22  ;;  %v958_v25 = vsel %vm933_vm1, %v882_v26, %v884_v57  ;;  %1663 = vmatpush1.msra.mxu1 %v6198_v30  ;;  %v528_v22 = vsel %vm505_vm0, %v456_v55, %v458_v31 }
  0xad   : > { %1664 = vmatprep.subr.mxu1 %v5946_v3  ;;  %v6317_v48 = vmul.f32 %v580_v34, %v529_v5  ;;  %v6319_v30 = vmul.f32 %v576_v63, %v530_v33  ;;  %v959_v18 = vsel %vm933_vm1, %v880_v59, %v882_v26  ;;  %v6334_v5 = vmul.f32 %v1009_v27, %v958_v25 }
  0xae   : > { %1665 = vmatpush1.msra.mxu1 %v5953_v4  ;;  %v6338_v4 = vmul.f32 %v588_v41, %v527_v28  ;;  %v6342_v33 = vmul.f32 %v584_v29, %v528_v22  ;;  %v956_v59 = vsel %vm933_vm1, %v886_v47, %v6279_v56  ;;  %v957_v25 = vsel %vm933_vm1, %v884_v57, %v886_v47 }
  0xaf   : > { %1721 = vmatprep.subr.mxu0 %v6317_v48  ;;  %v6329_v24 = vpop.permute.xlu0 %465  ;;  %v6331_v3 = vpop.permute.xlu1 %467  ;;  %1666 = vmatprep.subr.mxu1 %v6215_v42  ;;  %v1013_v42 = vrot.slane %v6314_v23, %v6159_v53  ;;  %v6356_v29 = vmul.f32 %v1005_v21, %v959_v18  ;;  %v6364_v55 = vmul.f32 %v1017_v44, %v956_v59  ;;  %v8688_v59 = vmov 0.0  }
  0xb0   : > { %1667 = vmatpush1.msra.mxu1 %v6217_v43  ;;  %1722 = vmatpush1.msra.mxu0 %v6319_v30  ;;  %v596_v63 = vrot.slane %v6286_v58, %v6119_v36  ;;  %v592_v27 = vrot.slane %v6286_v58, %v6123_v38  ;;  %v1025_v22 = vrot.slane %v6314_v23, %v6119_v36 }
  0xb1   : > { %5664 = vmatmul.mubr.msk.f32.vlgmr.msra.gmra.mxu1 %vm1561_vm2, %v6246_v6  ;;  %1723 = vmatprep.subr.mxu0 %v6000_v12  ;;  %v6366_v47 = vmul.f32 %v1013_v42, %v957_v25  ;;  %v1029_v25 = vrot.slane %v6314_v23, %v6221_v45 }
  0xb2   : > { %1792 = vmatprep.subr.mxu1 %v6338_v4  ;;  %1724 = vmatpush1.msra.mxu0 %v5972_v8 }
  0xb3   : > { %1793 = vmatpush1.msra.mxu1 %v6342_v33  ;;  %v464_v43 = vpop.permute.xlu0 %463  ;;  %v6359_v31 = vpop.permute.xlu1 %893  ;;  %1725 = vmatprep.subr.mxu0 %v6334_v5 }
  0xb4   : > { %1794 = vmatprep.subr.mxu1 %v5983_v9  ;;  %1726 = vmatpush1.msra.mxu0 %v6356_v29 }
  0xb5   : > { %1795 = vmatpush1.msra.mxu1 %v5993_v11  ;;  %1727 = vmatprep.subr.mxu0 %v6236_v62 }
  0xb6   : > { %1796 = vmatprep.subr.mxu1 %v6364_v55  ;;  %1728 = vmatpush1.msra.mxu0 %v6249_v46 }
  0xb7   : > { %1797 = vmatpush1.msra.mxu1 %v6366_v47  ;;  %v6373_v18 = vpop.permute.xlu0 %895  ;;  %v892_v21 = vpop.permute.xlu1 %891  ;;  %1729 = vmatprep.subr.mxu0 %v5969_v7 }
  0xb8   : > { %1798 = vmatprep.subr.mxu1 %v6317_v48  ;;  %1730 = vmatpush1.msra.mxu0 %v5939_v2 }
  0xb9   : > { %1799 = vmatpush1.msra.mxu1 %v6319_v30  ;;  %1731 = vmatprep.subr.mxu0 %v6261_v39 }
  0xba   : > { %1800 = vmatprep.subr.mxu1 %v6000_v12  ;;  %1732 = vmatpush1.msra.mxu0 %v6266_v40 }
  0xbb   : > { %1801 = vmatpush1.msra.mxu1 %v5972_v8  ;;  %v462_v57 = vpop.permute.xlu0 %461  ;;  %v890_v34 = vpop.permute.xlu1 %889  ;;  %1733 = vmatprep.subr.mxu0 %v6152_v50 }
  0xbc   : > { %v525_v26 = vsel %vm505_vm0, %v462_v57, %v464_v43  ;;  %1802 = vmatprep.subr.mxu1 %v6334_v5  ;;  %1734 = vmatpush1.msra.mxu0 %v6161_v54  ;;  %v526_v50 = vsel %vm505_vm0, %v6256_v32, %v462_v57  ;;  %v1021_v32 = vrot.slane %v6314_v23, %v6123_v38 }
  0xbd   : > { %1803 = vmatpush1.msra.mxu1 %v6356_v29  ;;  %1735 = vmatprep.subr.mxu0 %v5929_v0  ;;  %v6404_v28 = vmul.f32 %v596_v63, %v525_v26  ;;  %v954_v0 = vsel %vm933_vm1, %v890_v34, %v892_v21 }
  0xbe   : > { %1804 = vmatprep.subr.mxu1 %v6236_v62  ;;  %1736 = vmatpush1.msra.mxu0 %v5932_v1  ;;  %v604_v1 = vrot.slane %v6286_v58, %v6206_v37  ;;  %v523_v62 = vsel %vm505_vm0, %v6329_v24, %v6331_v3  ;;  %v6441_v44 = vmul.f32 %v1025_v22, %v954_v0 }
  0xbf   : > { %1805 = vmatpush1.msra.mxu1 %v6249_v46  ;;  %v6400_v41 = vpop.permute.xlu0 %473  ;;  %v6402_v54 = vpop.permute.xlu1 %475  ;;  %1737 = vmatprep.subr.mxu0 %v6174_v60  ;;  %v600_v46 = vrot.slane %v6286_v58, %v6221_v45  ;;  %v524_v60 = vsel %vm505_vm0, %v464_v43, %v6329_v24  ;;  %v953_v43 = vsel %vm933_vm1, %v892_v21, %v6359_v31 }
  0xc0   : > { %1806 = vmatprep.subr.mxu1 %v5969_v7  ;;  %1738 = vmatpush1.msra.mxu0 %v6176_v61  ;;  %v6425_v7 = vmul.f32 %v592_v27, %v526_v50  ;;  %v955_v61 = vsel %vm933_vm1, %v6279_v56, %v890_v34  ;;  %v6445_v42 = vmul.f32 %v604_v1, %v523_v62  ;;  %v6507_v62 = vld [vmem:[%s8618_s5 + $0x20] ss:$2 sm:$0xff] }
  0xc1   : > { %1807 = vmatpush1.msra.mxu1 %v5939_v2  ;;  %5665 = vmatmul.mubr.msk.f32.vlgmr.msra.gmra.mxu0 %vm1561_vm2, %v6246_v6  ;;  %v6449_v56 = vmul.f32 %v600_v46, %v524_v60  ;;  %v6463_v57 = vmul.f32 %v1021_v32, %v955_v61  ;;  %v612_v50 = vrot.slane %v6286_v58, %v6273_v51 }
  0xc2   : > { %1808 = vmatprep.subr.mxu1 %v6261_v39  ;;  %1863 = vmatprep.subr.mxu0 %v6404_v28  ;;  %v1033_v39 = vrot.slane %v6314_v23, %v6206_v37  ;;  %v1037_v32 = vrot.slane %v6314_v23, %v6276_v52 }
  0xc3   : > { %1809 = vmatpush1.msra.mxu1 %v6266_v40  ;;  %v6437_v2 = vpop.permute.xlu0 %471  ;;  %v6439_v24 = vpop.permute.xlu1 %901  ;;  %1842 = vmatprep.mubr.f32.mxu1 %v8688_v59  ;;  %v952_v40 = vsel %vm933_vm1, %v6359_v31, %v6373_v18  ;;  %v6477_v31 = vmul.f32 %v1029_v25, %v953_v43 }
  0xc4   : > { %1864 = vmatpush1.msra.mxu0 %v6425_v7  ;;  %5666 = vmatmul.mubr.msk.f32.vlgmr.msra.gmra.mxu1 %vm1561_vm2, %v6246_v6  ;;  %v6475_v26 = vmul.f32 %v1033_v39, %v952_v40 }
  0xc5   : > { %1865 = vmatprep.subr.mxu0 %v6028_v16  ;;  %1934 = vmatprep.subr.mxu1 %v6445_v42 }
  0xc6   : > { %1866 = vmatpush1.msra.mxu0 %v5986_v10  ;;  %1935 = vmatpush1.msra.mxu1 %v6449_v56 }
  0xc7   : > { %1867 = vmatprep.subr.mxu0 %v6441_v44  ;;  %v6469_v34 = vpop.permute.xlu0 %903  ;;  %v6471_v63 = vpop.permute.xlu1 %899  ;;  %1936 = vmatprep.subr.mxu1 %v6011_v13 }
  0xc8   : > { %1868 = vmatpush1.msra.mxu0 %v6463_v57  ;;  %1937 = vmatpush1.msra.mxu1 %v6021_v15  ;;  %v949_v40 = vsel %vm933_vm1, %v6471_v63, %v6439_v24 }
  0xc9   : > { %1869 = vmatprep.subr.mxu0 %v6338_v4  ;;  %1938 = vmatprep.subr.mxu1 %v6475_v26 }
  0xca   : > { %1870 = vmatpush1.msra.mxu0 %v6342_v33  ;;  %1939 = vmatpush1.msra.mxu1 %v6477_v31 }
  0xcb   : > { %1871 = vmatprep.subr.mxu0 %v5983_v9  ;;  %v470_v21 = vpop.permute.xlu0 %469  ;;  %v898_v27 = vpop.permute.xlu1 %897  ;;  %1940 = vmatprep.subr.mxu1 %v6404_v28 }
  0xcc   : > { %1872 = vmatpush1.msra.mxu0 %v5993_v11  ;;  %1941 = vmatpush1.msra.mxu1 %v6425_v7  ;;  %v521_v22 = vsel %vm505_vm0, %v470_v21, %v6437_v2 }
  0xcd   : > { %1873 = vmatprep.subr.mxu0 %v6364_v55  ;;  %1942 = vmatprep.subr.mxu1 %v6028_v16  ;;  %v6515_v46 = vmul.f32 %v612_v50, %v521_v22  ;;  %v628_v50 = vrot.slane %v6507_v62, %v6119_v36 }
  0xce   : > { %1874 = vmatpush1.msra.mxu0 %v6366_v47  ;;  %1943 = vmatpush1.msra.mxu1 %v5986_v10 }
  0xcf   : > { %1875 = vmatprep.subr.mxu0 %v6317_v48  ;;  %v6498_v0 = vpop.permute.xlu0 %481  ;;  %v6500_v1 = vpop.permute.xlu1 %483  ;;  %1944 = vmatprep.subr.mxu1 %v6441_v44  ;;  %v608_v48 = vrot.slane %v6286_v58, %v6276_v52  ;;  %v1041_v58 = vrot.slane %v6314_v23, %v6273_v51 }
  0xd0   : > { %1876 = vmatpush1.msra.mxu0 %v6319_v30  ;;  %1945 = vmatpush1.msra.mxu1 %v6463_v57  ;;  %v522_v30 = vsel %vm505_vm0, %v6331_v3, %v470_v21  ;;  %v620_v3 = vrot.slane %v6507_v62, %v6148_v49 }
  0xd1   : > { %1877 = vmatprep.subr.mxu0 %v6000_v12  ;;  %1946 = vmatprep.subr.mxu1 %v6338_v4  ;;  %v616_v4 = vrot.slane %v6507_v62, %v6159_v53 }
  0xd2   : > { %1878 = vmatpush1.msra.mxu0 %v5972_v8  ;;  %1947 = vmatpush1.msra.mxu1 %v6342_v33  ;;  %v950_v8 = vsel %vm933_vm1, %v898_v27, %v6471_v63  ;;  %v6544_v33 = vld [vmem:[%s8618_s5 + $0x21] ss:$2 sm:$0xff] }
  0xd3   : > { %1879 = vmatprep.subr.mxu0 %v6334_v5  ;;  %v6522_v60 = vpop.permute.xlu0 %479  ;;  %v6524_v12 = vpop.permute.xlu1 %909  ;;  %1948 = vmatprep.subr.mxu1 %v5983_v9  ;;  %v519_v5 = vsel %vm505_vm0, %v6400_v41, %v6402_v54  ;;  %v520_v9 = vsel %vm505_vm0, %v6437_v2, %v6400_v41  ;;  %v6566_v41 = vmul.f32 %v1041_v58, %v950_v8 }
  0xd4   : > { %1880 = vmatpush1.msra.mxu0 %v6356_v29  ;;  %1949 = vmatpush1.msra.mxu1 %v5993_v11  ;;  %v6552_v29 = vmul.f32 %v608_v48, %v522_v30  ;;  %v951_v11 = vsel %vm933_vm1, %v6373_v18, %v898_v27  ;;  %v6570_v23 = vmul.f32 %v620_v3, %v519_v5 }
  0xd5   : > { %1913 = vmatprep.mubr.f32.mxu0 %v8688_v59  ;;  %1950 = vmatprep.subr.mxu1 %v6364_v55  ;;  %v1049_v55 = vrot.slane %v6544_v33, %v6148_v49  ;;  %v6574_v2 = vmul.f32 %v616_v4, %v520_v9  ;;  %v1045_v18 = vrot.slane %v6544_v33, %v6159_v53  ;;  %v8689_v4 = vld [vmem:[#allocation7_spill] sm:$0xff] }
  0xd6   : > { %2005 = vmatprep.subr.mxu0 %v6515_v46  ;;  %5667 = vmatmul.mubr.msk.f32.vlgmr.msra.gmra.mxu0 %vm1561_vm2, %v6246_v6  ;;  %v6591_v25 = vmul.f32 %v1037_v32, %v951_v11  ;;  %v624_v30 = vrot.slane %v6507_v62, %v6123_v38  ;;  %v1061_v5 = vrot.slane %v6544_v33, %v6221_v45  ;;  %v8690_v11 = vld [vmem:[#allocation4_spill] sm:$0xff] }
  0xd7   : > { %1951 = vmatpush1.msra.mxu1 %v6366_v47  ;;  %v6564_v61 = vpop.permute.xlu0 %911  ;;  %1984 = vmatprep.mubr.f32.mxu1 %v8688_v59  ;;  %v948_v47 = vsel %vm933_vm1, %v6439_v24, %v6469_v34  ;;  %v6585_v39 = vpop.permute.xlu1 %907  ;;  %v6601_v27 = vmul.f32 %v1045_v18, %v949_v40 }
  0xd8   : > { %2006 = vmatpush1.msra.mxu0 %v6552_v29  ;;  %5668 = vmatmul.mubr.msk.f32.vlgmr.msra.gmra.mxu1 %vm1561_vm2, %v6246_v6  ;;  %v6599_v21 = vmul.f32 %v1049_v55, %v948_v47  ;;  %v945_v9 = vsel %vm933_vm1, %v6585_v39, %v6524_v12  ;;  %v8691_v55 = vld [vmem:[#allocation5_spill] sm:$0xff] }
  0xd9   : > { %2007 = vmatprep.subr.mxu0 %v6056_v20  ;;  %2076 = vmatprep.subr.mxu1 %v6570_v23  ;;  %v6713_v18 = vmul.f32 %v1061_v5, %v945_v9 }
  0xda   : > { %2008 = vmatpush1.msra.mxu0 %v6014_v14  ;;  %2077 = vmatpush1.msra.mxu1 %v6574_v2 }
  0xdb   : > { %2009 = vmatprep.subr.mxu0 %v6566_v41  ;;  %v478_v43 = vpop.permute.xlu0 %477  ;;  %2078 = vmatprep.subr.mxu1 %v6039_v17  ;;  %v906_v24 = vpop.permute.xlu1 %905 }
  0xdc   : > { %2010 = vmatpush1.msra.mxu0 %v6591_v25  ;;  %2079 = vmatpush1.msra.mxu1 %v6049_v19  ;;  %v517_v22 = vsel %vm505_vm0, %v478_v43, %v6522_v60 }
  0xdd   : > { %2011 = vmatprep.subr.mxu0 %v6445_v42  ;;  %2080 = vmatprep.subr.mxu1 %v6599_v21 }
  0xde   : > { %2012 = vmatpush1.msra.mxu0 %v6449_v56  ;;  %2081 = vmatpush1.msra.mxu1 %v6601_v27 }
  0xdf   : > { %2013 = vmatprep.subr.mxu0 %v6011_v13  ;;  %2082 = vmatprep.subr.mxu1 %v6515_v46  ;;  %v6611_v63 = vpop.permute.xlu0 %489  ;;  %v6626_v48 = vpop.permute.xlu1 %491 }
  0xe0   : > { %2014 = vmatpush1.msra.mxu0 %v6021_v15  ;;  %2083 = vmatpush1.msra.mxu1 %v6552_v29 }
  0xe1   : > { %2015 = vmatprep.subr.mxu0 %v6475_v26  ;;  %2084 = vmatprep.subr.mxu1 %v6056_v20 }
  0xe2   : > { %2016 = vmatpush1.msra.mxu0 %v6477_v31  ;;  %2085 = vmatpush1.msra.mxu1 %v6014_v14 }
  0xe3   : > { %2017 = vmatprep.subr.mxu0 %v6404_v28  ;;  %2086 = vmatprep.subr.mxu1 %v6566_v41  ;;  %v6634_v58 = vpop.permute.xlu0 %487  ;;  %v6636_v28 = vmul.f32 %v628_v50, %v517_v22  ;;  %v6673_v8 = vpop.permute.xlu1 %917 }
  0xe4   : > { %2018 = vmatpush1.msra.mxu0 %v6425_v7  ;;  %2087 = vmatpush1.msra.mxu1 %v6591_v25  ;;  %v518_v7 = vsel %vm505_vm0, %v6402_v54, %v478_v43  ;;  %v515_v54 = vsel %vm505_vm0, %v6498_v0, %v6500_v1  ;;  %v644_v43 = vrot.slane %v6507_v62, %v6273_v51 }
  0xe5   : > { %2019 = vmatprep.subr.mxu0 %v6028_v16  ;;  %2088 = vmatprep.subr.mxu1 %v6445_v42  ;;  %v1057_v16 = vrot.slane %v6544_v33, %v6119_v36  ;;  %v946_v42 = vsel %vm933_vm1, %v906_v24, %v6585_v39 }
  0xe6   : > { %2020 = vmatpush1.msra.mxu0 %v5986_v10  ;;  %2089 = vmatpush1.msra.mxu1 %v6449_v56  ;;  %v636_v10 = vrot.slane %v6507_v62, %v6206_v37  ;;  %v6664_v56 = vmul.f32 %v624_v30, %v518_v7  ;;  %v6743_v30 = vld [vmem:[%s8618_s5 + $0x30] ss:$2 sm:$0xff]  ;;  %v640_v7 = vrot.slane %v6507_v62, %v6276_v52 }
  0xe7   : > { %2021 = vmatprep.subr.mxu0 %v6441_v44  ;;  %2090 = vmatprep.subr.mxu1 %v6011_v13  ;;  %v632_v44 = vrot.slane %v6507_v62, %v6221_v45  ;;  %v516_v13 = vsel %vm505_vm0, %v6522_v60, %v6498_v0  ;;  %v6678_v0 = vmul.f32 %v1057_v16, %v946_v42  ;;  %v6715_v40 = vpop.permute.xlu1 %915 }
  0xe8   : > { %2022 = vmatpush1.msra.mxu0 %v6463_v57  ;;  %2091 = vmatpush1.msra.mxu1 %v6021_v15  ;;  %v1053_v57 = vrot.slane %v6544_v33, %v6123_v38  ;;  %v947_v15 = vsel %vm933_vm1, %v6469_v34, %v906_v24  ;;  %v6684_v60 = vmul.f32 %v636_v10, %v515_v54  ;;  %v8693_v54 = vld [vmem:[#allocation8_spill] sm:$0xff] }
  0xe9   : > { %2055 = vmatprep.mubr.f32.mxu0 %v8688_v59  ;;  %2092 = vmatprep.subr.mxu1 %v6475_v26  ;;  %v6682_v26 = vpop.permute.xlu0 %919  ;;  %v1065_v34 = vrot.slane %v6544_v33, %v6206_v37  ;;  %v6688_v3 = vmul.f32 %v632_v44, %v516_v13  ;;  %v648_v62 = vrot.slane %v6743_v30, %v6159_v53  ;;  %v6823_v44 = vld [vmem:[%s5926_s29 + $0xc8] sm:$0xff] }
  0xea   : > { %2147 = vmatprep.subr.mxu0 %v6636_v28  ;;  %5669 = vmatmul.mubr.msk.f32.vlgmr.msra.gmra.mxu0 %vm1561_vm2, %v6246_v6  ;;  %v6703_v32 = vmul.f32 %v1053_v57, %v947_v15  ;;  %v941_v13 = vsel %vm933_vm1, %v6715_v40, %v6673_v8  ;;  %v6834_v15 = vld [vmem:[%s5926_s29 + $0xc0] sm:$0xff] }
  0xeb   : > { %2093 = vmatpush1.msra.mxu1 %v6477_v31  ;;  %2126 = vmatprep.mubr.f32.mxu1 %v8688_v59  ;;  %v944_v31 = vsel %vm933_vm1, %v6524_v12, %v6564_v61  ;;  %v8692_v12 = vld [vmem:[#allocation6_spill] sm:$0xff]  ;;  %v914_v50 = vpop.permute.xlu1 %913 }
  0xec   : > { %2148 = vmatpush1.msra.mxu0 %v6664_v56  ;;  %5670 = vmatmul.mubr.msk.f32.vlgmr.msra.gmra.mxu1 %vm1561_vm2, %v6246_v6  ;;  %v6711_v47 = vmul.f32 %v1065_v34, %v944_v31 }
  0xed   : > { %2149 = vmatprep.subr.mxu0 %v8689_v4  ;;  %2218 = vmatprep.subr.mxu1 %v6684_v60  ;;  %v486_v39 = vpop.permute.xlu0 %485 }
  0xee   : > { %2150 = vmatpush1.msra.mxu0 %v8690_v11  ;;  %2219 = vmatpush1.msra.mxu1 %v6688_v3  ;;  %v513_v24 = vsel %vm505_vm0, %v486_v39, %v6634_v58 }
  0xef   : > { %2151 = vmatprep.subr.mxu0 %v6678_v0  ;;  %2220 = vmatprep.subr.mxu1 %v8691_v55  ;;  %v6749_v16 = vmul.f32 %v644_v43, %v513_v24  ;;  %v5855_v43 = vld [vmem:[%s5926_s29 + $0x90] sm:$0xff] }
  0xf0   : > { %2152 = vmatpush1.msra.mxu0 %v6703_v32  ;;  %2221 = vmatpush1.msra.mxu1 %v8692_v12 }
  0xf1   : > { %2153 = vmatprep.subr.mxu0 %v6570_v23  ;;  %2222 = vmatprep.subr.mxu1 %v6711_v47  ;;  %v6736_v22 = vpop.permute.xlu0 %497 }
  0xf2   : > { %2154 = vmatpush1.msra.mxu0 %v6574_v2  ;;  %2223 = vmatpush1.msra.mxu1 %v6713_v18 }
  0xf3   : > { %2155 = vmatprep.subr.mxu0 %v6039_v17  ;;  %2224 = vmatprep.subr.mxu1 %v6636_v28 }
  0xf4   : > { %2156 = vmatpush1.msra.mxu0 %v6049_v19  ;;  %2225 = vmatpush1.msra.mxu1 %v6664_v56 }
  0xf5   : > { %2157 = vmatprep.subr.mxu0 %v6599_v21  ;;  %2226 = vmatprep.subr.mxu1 %v8689_v4  ;;  %v6790_v42 = vpop.permute.xlu0 %495 }
  0xf6   : > { %2158 = vmatpush1.msra.mxu0 %v6601_v27  ;;  %2227 = vmatpush1.msra.mxu1 %v8690_v11  ;;  %v660_v11 = vrot.slane %v6743_v30, %v6119_v36 }
  0xf7   : > { %2159 = vmatprep.subr.mxu0 %v6515_v46  ;;  %2228 = vmatprep.subr.mxu1 %v6678_v0  ;;  %v514_v46 = vsel %vm505_vm0, %v6500_v1, %v486_v39  ;;  %v511_v1 = vsel %vm505_vm0, %v6611_v63, %v6626_v48 }
  0xf8   : > { %2160 = vmatpush1.msra.mxu0 %v6552_v29  ;;  %2229 = vmatpush1.msra.mxu1 %v6703_v32  ;;  %v1073_v29 = vrot.slane %v6544_v33, %v6273_v51 }
  0xf9   : > { %2161 = vmatprep.subr.mxu0 %v6056_v20  ;;  %2230 = vmatprep.subr.mxu1 %v6570_v23  ;;  %v942_v20 = vsel %vm933_vm1, %v914_v50, %v6715_v40  ;;  %v512_v23 = vsel %vm505_vm0, %v6634_v58, %v6611_v63  ;;  %v940_v58 = vsel %vm933_vm1, %v6673_v8, %v6682_v26  ;;  %v6842_v5 = vpop.permute.xlu0 %927 }
  0xfa   : > { %2162 = vmatpush1.msra.mxu0 %v6014_v14  ;;  %2231 = vmatpush1.msra.mxu1 %v6574_v2  ;;  %v652_v14 = vrot.slane %v6743_v30, %v6148_v49  ;;  %v6786_v2 = vmul.f32 %v640_v7, %v514_v46  ;;  %v6797_v10 = vmul.f32 %v1073_v29, %v942_v20  ;;  %v6909_v29 = vld [vmem:[%s5926_s29 + $0xd8] sm:$0xff] }
  0xfb   : > { %2163 = vmatprep.subr.mxu0 %v6566_v41  ;;  %2232 = vmatprep.subr.mxu1 %v6039_v17  ;;  %v6776_v41 = vld [vmem:[%s8618_s5 + $0x31] ss:$2 sm:$0xff]  ;;  %v6778_v17 = vpop.permute.xlu1 %499  ;;  %v508_v7 = vsel %vm505_vm0, %v6790_v42, %v6736_v22 }
  0xfc   : > { %2164 = vmatpush1.msra.mxu0 %v6591_v25  ;;  %2233 = vmatpush1.msra.mxu1 %v6049_v19  ;;  %v1069_v25 = vrot.slane %v6544_v33, %v6276_v52  ;;  %v943_v19 = vsel %vm933_vm1, %v6564_v61, %v914_v50  ;;  %v6803_v33 = vld [vmem:[%s5926_s29 + $0xb0] sm:$0xff]  ;;  %v6809_v63 = vmul.f32 %v652_v14, %v511_v1  ;;  %v5856_v50 = vld [vmem:[%s5926_s29 + $0xa8] sm:$0xff] }
  0xfd   : > { %2197 = vmatprep.mubr.f32.mxu0 %v8688_v59  ;;  %2234 = vmatprep.subr.mxu1 %v6599_v21  ;;  %v1081_v21 = vrot.slane %v6776_v41, %v6148_v49  ;;  %v6811_v61 = vmul.f32 %v648_v62, %v512_v23  ;;  %v494_v40 = vpop.permute.xlu0 %493  ;;  %v1097_v1 = vrot.slane %v6776_v41, %v6206_v37  ;;  %v6940_v23 = vld [vmem:[%s5926_s29 + $0xe8] sm:$0xff] }
  0xfe   : > { %2289 = vmatprep.subr.mxu0 %v6749_v16  ;;  %5671 = vmatmul.mubr.msk.f32.vlgmr.msra.gmra.mxu0 %vm1561_vm2, %v6246_v6  ;;  %v6829_v57 = vmul.f32 %v1069_v25, %v943_v19  ;;  %v6950_v19 = vld [vmem:[%s5926_s29 + $0xe0] sm:$0xff] }
  0xff   : > { %2235 = vmatpush1.msra.mxu1 %v6601_v27  ;;  %2268 = vmatprep.mubr.f32.mxu1 %v8688_v59  ;;  %v1077_v27 = vrot.slane %v6776_v41, %v6159_v53  ;;  %v6836_v34 = vpop.permute.xlu1 %925  ;;  %v6840_v31 = vmul.f32 %v1081_v21, %v940_v58 }
 0x100   : > { %2290 = vmatpush1.msra.mxu0 %v6786_v2  ;;  %5672 = vmatmul.mubr.msk.f32.vlgmr.msra.gmra.mxu1 %vm1561_vm2, %v6246_v6  ;;  %v936_v62 = vsel %vm933_vm1, %v6836_v34, %v6842_v5 }
 0x101   : > { %2291 = vmatprep.subr.mxu0 %v8693_v54  ;;  %2360 = vmatprep.subr.mxu1 %v6809_v63  ;;  %v6846_v8 = vmul.f32 %v1077_v27, %v941_v13  ;;  %v6954_v21 = vmul.f32 %v1097_v1, %v936_v62  ;;  %v502_v27 = vpop.permute.xlu0 %501  ;;  %v5858_v13 = vld [vmem:[%s5926_s29 + $0xb8] sm:$0xff] }
 0x102   : > { %2292 = vmatpush1.msra.mxu0 %v6803_v33  ;;  %2361 = vmatpush1.msra.mxu1 %v6811_v61 }
 0x103   : > { %2293 = vmatprep.subr.mxu0 %v6797_v10  ;;  %2362 = vmatprep.subr.mxu1 %v6823_v44  ;;  %v924_v9 = vpop.permute.xlu1 %923 }
 0x104   : > { %2294 = vmatpush1.msra.mxu0 %v6829_v57  ;;  %2363 = vmatpush1.msra.mxu1 %v6834_v15  ;;  %v937_v25 = vsel %vm933_vm1, %v924_v9, %v6836_v34  ;;  %v672_v34 = vrot.slane %v6743_v30, %v6276_v52 }
 0x105   : > { %2295 = vmatprep.subr.mxu0 %v6684_v60  ;;  %2364 = vmatprep.subr.mxu1 %v6840_v31 }
 0x106   : > { %2296 = vmatpush1.msra.mxu0 %v6688_v3  ;;  %2365 = vmatpush1.msra.mxu1 %v6846_v8 }
 0x107   : > { %2297 = vmatprep.subr.mxu0 %v8691_v55  ;;  %2366 = vmatprep.subr.mxu1 %v6749_v16  ;;  %v509_v55 = vsel %vm505_vm0, %v494_v40, %v6790_v42  ;;  %v922_v24 = vpop.permute.xlu1 %921 }
 0x108   : > { %2298 = vmatpush1.msra.mxu0 %v8692_v12  ;;  %2367 = vmatpush1.msra.mxu1 %v6786_v2  ;;  %v656_v12 = vrot.slane %v6743_v30, %v6123_v38  ;;  %v6873_v39 = vmul.f32 %v660_v11, %v509_v55  ;;  %v939_v20 = vsel %vm933_vm1, %v6682_v26, %v922_v24 }
 0x109   : > { %2299 = vmatprep.subr.mxu0 %v6711_v47  ;;  %2368 = vmatprep.subr.mxu1 %v8693_v54  ;;  %v676_v54 = vrot.slane %v6743_v30, %v6273_v51 }
 0x10a   : > { %2300 = vmatpush1.msra.mxu0 %v6713_v18  ;;  %2369 = vmatpush1.msra.mxu1 %v6803_v33 }
 0x10b   : > { %2301 = vmatprep.subr.mxu0 %v6636_v28  ;;  %2370 = vmatprep.subr.mxu1 %v6797_v10  ;;  %v510_v28 = vsel %vm505_vm0, %v6626_v48, %v494_v40  ;;  %v507_v48 = vsel %vm505_vm0, %v6736_v22, %v6778_v17  ;;  %v6920_v22 = vld [vmem:[%s5926_s29 + $0xd0] sm:$0xff] }
 0x10c   : > { %2302 = vmatpush1.msra.mxu0 %v6664_v56  ;;  %2371 = vmatpush1.msra.mxu1 %v6829_v57  ;;  %v1089_v56 = vrot.slane %v6776_v41, %v6119_v36  ;;  %v6902_v46 = vmul.f32 %v656_v12, %v510_v28 }
 0x10d   : > { %2303 = vmatprep.subr.mxu0 %v8689_v4  ;;  %2372 = vmatprep.subr.mxu1 %v6684_v60  ;;  %v668_v4 = vrot.slane %v6743_v30, %v6206_v37  ;;  %v938_v60 = vsel %vm933_vm1, %v922_v24, %v924_v9  ;;  %v8694_v9 = vld [vmem:[#allocation10_spill] sm:$0xff] }
 0x10e   : > { %2304 = vmatpush1.msra.mxu0 %v5855_v43  ;;  %2373 = vmatpush1.msra.mxu1 %v6688_v3  ;;  %v5857_v3 = vld [vmem:[%s5926_s29 + $0xa0] sm:$0xff]  ;;  %v6914_v14 = vmul.f32 %v1089_v56, %v938_v60  ;;  %v537_v11 = vsel %vm505_vm0, %v502_v27, %v8694_v9 }
 0x10f   : > { %2305 = vmatprep.subr.mxu0 %v6678_v0  ;;  %2374 = vmatprep.subr.mxu1 %v5856_v50  ;;  %v664_v0 = vrot.slane %v6743_v30, %v6221_v45  ;;  %v740_v30 = vmul.f32 %v676_v54, %v537_v11 }
 0x110   : > { %2306 = vmatpush1.msra.mxu0 %v6703_v32  ;;  %2375 = vmatpush1.msra.mxu1 %v5857_v3  ;;  %v1085_v32 = vrot.slane %v6776_v41, %v6123_v38 }
 0x111   : > { %2339 = vmatprep.mubr.f32.mxu0 %v8688_v59  ;;  %2376 = vmatprep.subr.mxu1 %v6711_v47  ;;  %v6922_v47 = vmul.f32 %v668_v4, %v507_v48  ;;  %v6928_v26 = vmul.f32 %v664_v0, %v508_v7 }
 0x112   : > { %2431 = vmatprep.subr.mxu0 %v6873_v39  ;;  %5673 = vmatmul.mubr.msk.f32.vlgmr.msra.gmra.mxu0 %vm1561_vm2, %v6246_v6  ;;  %v6945_v42 = vmul.f32 %v1085_v32, %v939_v20 }
 0x113   : > { %2377 = vmatpush1.msra.mxu1 %v6713_v18  ;;  %2410 = vmatprep.mubr.f32.mxu1 %v8688_v59  ;;  %v1093_v18 = vrot.slane %v6776_v41, %v6221_v45 }
 0x114   : > { %2432 = vmatpush1.msra.mxu0 %v6902_v46  ;;  %5674 = vmatmul.mubr.msk.f32.vlgmr.msra.gmra.mxu1 %vm1561_vm2, %v6246_v6 }
 0x115   : > { %2433 = vmatprep.subr.mxu0 %v6909_v29  ;;  %2502 = vmatprep.subr.mxu1 %v6922_v47  ;;  %v6958_v58 = vmul.f32 %v1093_v18, %v937_v25 }
 0x116   : > { %2434 = vmatpush1.msra.mxu0 %v6920_v22  ;;  %2503 = vmatpush1.msra.mxu1 %v6928_v26 }
 0x117   : > { %2435 = vmatprep.subr.mxu0 %v6914_v14  ;;  %2504 = vmatprep.subr.mxu1 %v6940_v23 }
 0x118   : > { %2436 = vmatpush1.msra.mxu0 %v6945_v42  ;;  %2505 = vmatpush1.msra.mxu1 %v6950_v19 }
 0x119   : > { %2437 = vmatprep.subr.mxu0 %v6809_v63  ;;  %2506 = vmatprep.subr.mxu1 %v6954_v21 }
 0x11a   : > { %2438 = vmatpush1.msra.mxu0 %v6811_v61  ;;  %2507 = vmatpush1.msra.mxu1 %v6958_v58 }
 0x11b   : > { %2439 = vmatprep.subr.mxu0 %v6823_v44  ;;  %2508 = vmatprep.subr.mxu1 %v6873_v39 }
 0x11c   : > { %2440 = vmatpush1.msra.mxu0 %v6834_v15  ;;  %2509 = vmatpush1.msra.mxu1 %v6902_v46 }
 0x11d   : > { %2441 = vmatprep.subr.mxu0 %v6840_v31  ;;  %2510 = vmatprep.subr.mxu1 %v6909_v29 }
 0x11e   : > { %2442 = vmatpush1.msra.mxu0 %v6846_v8  ;;  %2511 = vmatpush1.msra.mxu1 %v6920_v22 }
 0x11f   : > { %2443 = vmatprep.subr.mxu0 %v6749_v16  ;;  %2512 = vmatprep.subr.mxu1 %v6914_v14  ;;  %v506_v16 = vsel %vm505_vm0, %v6778_v17, %v502_v27  ;;  %v1101_v17 = vrot.slane %v6776_v41, %v6276_v52 }
 0x120   : > { %2444 = vmatpush1.msra.mxu0 %v6786_v2  ;;  %2513 = vmatpush1.msra.mxu1 %v6945_v42  ;;  %v930_v2 = vpop.permute.xlu1 %929 }
 0x121   : > { %2445 = vmatprep.subr.mxu0 %v5858_v13  ;;  %2514 = vmatprep.subr.mxu1 %v6809_v63  ;;  %v1105_v63 = vrot.slane %v6776_v41, %v6273_v51 }
 0x122   : > { %2446 = vmatpush1.msra.mxu0 %v6803_v33  ;;  %2515 = vmatpush1.msra.mxu1 %v6811_v61  ;;  %v739_v33 = vmul.f32 %v672_v34, %v506_v16  ;;  %v8695_v61 = vld [vmem:[#allocation11_spill] sm:$0xff] }
 0x123   : > { %2447 = vmatprep.subr.mxu0 %v6797_v10  ;;  %2516 = vmatprep.subr.mxu1 %v6823_v44  ;;  %v934_v10 = vsel %vm933_vm1, %v930_v2, %v8695_v61  ;;  %v310_v44 = vld [vmem:[%s5926_s29 + $0xf8] sm:$0xff] }
 0x124   : > { %2448 = vmatpush1.msra.mxu0 %v6829_v57  ;;  %2481 = vmatprep.mubr.f32.mxu0 %v8688_v59  ;;  %v935_v57 = vsel %vm933_vm1, %v6842_v5, %v930_v2  ;;  %v1169_v41 = vmul.f32 %v1105_v63, %v934_v10 }
 0x125   : > { %2517 = vmatpush1.msra.mxu1 %v6834_v15  ;;  %5675 = vmatmul.mubr.msk.f32.vlgmr.msra.gmra.mxu0 %vm1561_vm2, %v6246_v6  ;;  %v309_v15 = vld [vmem:[%s5926_s29 + $0xf0] sm:$0xff]  ;;  %v1168_v40 = vmul.f32 %v1101_v17, %v935_v57 }
 0x126   : > { %2518 = vmatprep.subr.mxu1 %v6840_v31  ;;  %2573 = vmatprep.subr.mxu0 %v740_v30 }
 0x127   : > { %2519 = vmatpush1.msra.mxu1 %v6846_v8  ;;  %2552 = vmatprep.mubr.f32.mxu1 %v8688_v59  ;;  %v7042_v8 = vpop.permute.xlu0 %1558 }
 0x128   : > { %2574 = vmatpush1.msra.mxu0 %v739_v33  ;;  %5676 = vmatmul.mubr.msk.f32.vlgmr.msra.gmra.mxu1 %vm1561_vm2, %v6246_v6  ;;  %v5859_v6 = vld [vmem:[%s8614_s1] sm:$0xff] }
 0x129   : > { %2575 = vmatprep.subr.mxu0 %v310_v44  ;;  %2650 = vmatprep.subr.mxu1 %v740_v30 }
 0x12a   : > { %2576 = vmatpush1.msra.mxu0 %v309_v15  ;;  %2651 = vmatpush1.msra.mxu1 %v739_v33 }
 0x12b   : > { %2577 = vmatprep.subr.mxu0 %v1169_v41  ;;  %2652 = vmatprep.subr.mxu1 %v310_v44 }
 0x12c   : > { %2578 = vmatpush1.msra.mxu0 %v1168_v40  ;;  %2653 = vmatpush1.msra.mxu1 %v309_v15 }
 0x12d   : > { %2579 = vmatprep.subr.mxu0 %v6922_v47  ;;  %2654 = vmatprep.subr.mxu1 %v1169_v41 }
 0x12e   : > { %2580 = vmatpush1.msra.mxu0 %v6928_v26  ;;  %2655 = vmatpush1.msra.mxu1 %v1168_v40 }
 0x12f   : > { %2581 = vmatprep.subr.mxu0 %v6940_v23  ;;  %2656 = vmatprep.subr.mxu1 %v6922_v47 }
 0x130   : > { %2582 = vmatpush1.msra.mxu0 %v6950_v19  ;;  %2657 = vmatpush1.msra.mxu1 %v6928_v26 }
 0x131   : > { %2583 = vmatprep.subr.mxu0 %v6954_v21  ;;  %2658 = vmatprep.subr.mxu1 %v6940_v23 }
 0x132   : > { %2584 = vmatpush1.msra.mxu0 %v6958_v58  ;;  %2659 = vmatpush1.msra.mxu1 %v6950_v19 }
 0x133   : > { %2585 = vmatprep.subr.mxu0 %v6873_v39  ;;  %2660 = vmatprep.subr.mxu1 %v6954_v21 }
 0x134   : > { %2586 = vmatpush1.msra.mxu0 %v6902_v46  ;;  %2661 = vmatpush1.msra.mxu1 %v6958_v58 }
 0x135   : > { %2694 = vmatprep.mubr.f32.mxu1 %v8688_v59  ;;  %2587 = vmatprep.subr.mxu0 %v6909_v29 }
 0x136   : > { %5678 = vmatmul.mubr.msk.f32.vlgmr.msra.gmra.mxu1 %vm1561_vm2, %v5859_v6  ;;  %2588 = vmatpush1.msra.mxu0 %v6920_v22 }
 0x137   : > { %2623 = vmatprep.mubr.f32.mxu0 %v8688_v59  ;;  %2589 = vmatprep.subr.mxu0 %v6914_v14 }
 0x138   : > { %4097 = vmatprep.mubr.f32.mxu1 %v8688_v59  ;;  %2590 = vmatpush1.msra.mxu0 %v6945_v42 }
 0x139   : > { %5677 = vmatmul.mubr.msk.f32.vlgmr.msra.gmra.mxu0 %vm1561_vm2, %v5859_v6 }
 0x13a   : > { %4168 = vmatprep.mubr.f32.mxu0 %v8688_v59 }
 0x15f   : > { %v1631_v31 = vpop.f32.mrf.mxu1 }
 0x160   : > { %v1632_v60 = vadd.f32 %v1631_v31, %v7042_v8 }
 0x161   : > { %v1633_v5 = vpop.f32.mrf.mxu1 }
 0x162   : > { %v1634_v39 = vadd.f32 %v1633_v5, %v7042_v8  ;;  %v7060_v50 = vmax.f32 %v1632_v60, 0.0 }
 0x164   : > { %v7050_v56 = vmax.f32 %v1634_v39, 0.0 }
 0x171   : > { %v1702_v55 = vpop.f32.mrf.mxu1 }
 0x172   : > { %v1703_v12 = vadd.f32 %v1702_v55, %v7042_v8 }
 0x173   : > { %v1704_v28 = vpop.f32.mrf.mxu1 }
 0x174   : > { %v7046_v43 = vmax.f32 %v1703_v12, 0.0  ;;  %v1705_v24 = vadd.f32 %v1704_v28, %v7042_v8 }
 0x176   : > { %2929 = vrot.lane.b32.xlu0 %v7046_v43, %s5868_s30  ;;  %v7055_v4 = vmax.f32 %v1705_v24, 0.0 }
 0x17a   : > { %2927 = vrot.lane.b32.xlu0 %v7050_v56, %s5868_s30 }
 0x17e   : > { %3355 = vrot.lane.b32.xlu0 %v7055_v4, %s5869_s8 }
 0x181   : > { %v1773_v48 = vpop.f32.mrf.mxu0 }
 0x182   : > { %3349 = vrot.lane.b32.xlu0 %v7060_v50, %s5869_s8  ;;  %v1774_v0 = vadd.f32 %v1773_v48, %v7042_v8 }
 0x183   : > { %v1775_v14 = vpop.f32.mrf.mxu0 }
 0x184   : > { %v7065_v3 = vmax.f32 %v1774_v0, 0.0  ;;  %v1844_v7 = vpop.f32.mrf.mxu1  ;;  %v1776_v47 = vadd.f32 %v1775_v14, %v7042_v8 }
 0x185   : > { %v1845_v29 = vadd.f32 %v1844_v7, %v7042_v8 }
 0x186   : > { %v1846_v46 = vpop.f32.mrf.mxu1  ;;  %2933 = vrot.lane.b32.xlu1 %v7065_v3, %s5868_s30  ;;  %v7086_v1 = vmax.f32 %v1776_v47, 0.0 }
 0x187   : > { %v1847_v32 = vadd.f32 %v1846_v46, %v7042_v8  ;;  %v7077_v22 = vmax.f32 %v1845_v29, 0.0 }
 0x189   : > { %v7071_v20 = vmax.f32 %v1847_v32, 0.0 }
 0x18a   : > { %3353 = vrot.lane.b32.xlu1 %v7046_v43, %s5869_s8 }
 0x18b   : > { %2939 = vrot.lane.b32.xlu0 %v7071_v20, %s5868_s30 }
 0x18e   : > { %2931 = vrot.lane.b32.xlu1 %v7055_v4, %s5868_s30 }
 0x18f   : > { %2937 = vrot.lane.b32.xlu0 %v7077_v22, %s5868_s30 }
 0x192   : > { %3351 = vrot.lane.b32.xlu1 %v7050_v56, %s5869_s8 }
 0x193   : > { %3363 = vrot.lane.b32.xlu0 %v7071_v20, %s5869_s8 }
 0x196   : > { %2925 = vrot.lane.b32.xlu1 %v7060_v50, %s5868_s30  ;;  %v7095_v23 = vpop.f32.mrf.mxu0 }
 0x197   : > { %2935 = vrot.lane.b32.xlu0 %v7086_v1, %s5868_s30 }
 0x198   : > { %v1986_v26 = vpop.f32.mrf.mxu1  ;;  %v1917_v19 = vpop.f32.mrf.mxu0 }
 0x199   : > { %v1987_v25 = vadd.f32 %v1986_v26, %v7042_v8  ;;  %v1918_v58 = vadd.f32 %v1917_v19, %v7042_v8 }
 0x19a   : > { %v1988_v62 = vpop.f32.mrf.mxu1 }
 0x19b   : > { %v1989_v18 = vadd.f32 %v1988_v62, %v7042_v8  ;;  %v7102_v21 = vmax.f32 %v1987_v25, 0.0  ;;  %v7107_v27 = vmax.f32 %v1918_v58, 0.0 }
 0x19d   : > { %v7098_v42 = vmax.f32 %v1989_v18, 0.0 }
 0x19f   : > { %8696 = vst [vmem:[#allocation7_spill] sm:$0xff] %v7098_v42  ;;  %2947 = vrot.lane.b32.xlu0 %v7098_v42, %s5868_s30 }
 0x1a3   : > { %2945 = vrot.lane.b32.xlu0 %v7102_v21, %s5868_s30 }
 0x1a7   : > { %3371 = vrot.lane.b32.xlu0 %v7098_v42, %s5869_s8 }
 0x1aa   : > { %v7114_v9 = vpop.f32.mrf.mxu0 }
 0x1ab   : > { %2943 = vrot.lane.b32.xlu0 %v7107_v27, %s5868_s30 }
 0x1ac   : > { %v2128_v54 = vpop.f32.mrf.mxu1  ;;  %v2059_v2 = vpop.f32.mrf.mxu0 }
 0x1ad   : > { %v2129_v11 = vadd.f32 %v2128_v54, %v7042_v8  ;;  %v2060_v63 = vadd.f32 %v2059_v2, %v7042_v8 }
 0x1ae   : > { %v2130_v13 = vpop.f32.mrf.mxu1 }
 0x1af   : > { %v2131_v34 = vadd.f32 %v2130_v13, %v7042_v8  ;;  %v7121_v30 = vmax.f32 %v2129_v11, 0.0  ;;  %v7126_v33 = vmax.f32 %v2060_v63, 0.0 }
 0x1b1   : > { %v7117_v16 = vmax.f32 %v2131_v34, 0.0 }
 0x1b3   : > { %8697 = vst [vmem:[#allocation4_spill] sm:$0xff] %v7117_v16  ;;  %2955 = vrot.lane.b32.xlu0 %v7117_v16, %s5868_s30 }
 0x1b7   : > { %2953 = vrot.lane.b32.xlu0 %v7121_v30, %s5868_s30 }
 0x1bb   : > { %3379 = vrot.lane.b32.xlu0 %v7117_v16, %s5869_s8 }
 0x1be   : > { %v7133_v44 = vpop.f32.mrf.mxu0 }
 0x1bf   : > { %2951 = vrot.lane.b32.xlu0 %v7126_v33, %s5868_s30 }
 0x1c0   : > { %v2270_v17 = vpop.f32.mrf.mxu1  ;;  %v2201_v41 = vpop.f32.mrf.mxu0 }
 0x1c1   : > { %v2271_v57 = vadd.f32 %v2270_v17, %v7042_v8  ;;  %v2202_v6 = vadd.f32 %v2201_v41, %v7042_v8 }
 0x1c2   : > { %v2272_v61 = vpop.f32.mrf.mxu1 }
 0x1c3   : > { %v2273_v10 = vadd.f32 %v2272_v61, %v7042_v8  ;;  %v7140_v40 = vmax.f32 %v2271_v57, 0.0  ;;  %v7145_v31 = vmax.f32 %v2202_v6, 0.0  ;;  %v1916_v61 = vadd.f32 %v7095_v23, %v7042_v8 }
 0x1c5   : > { %v7136_v15 = vmax.f32 %v2273_v10, 0.0  ;;  %v7212_v23 = vmax.f32 %v1916_v61, 0.0 }
 0x1c7   : > { %8698 = vst [vmem:[#allocation5_spill] sm:$0xff] %v7136_v15  ;;  %2963 = vrot.lane.b32.xlu0 %v7136_v15, %s5868_s30 }
 0x1cb   : > { %2961 = vrot.lane.b32.xlu0 %v7140_v40, %s5868_s30 }
 0x1cf   : > { %3387 = vrot.lane.b32.xlu0 %v7136_v15, %s5869_s8 }
 0x1d2   : > { %v7155_v24 = vpop.f32.mrf.mxu0 }
 0x1d3   : > { %2959 = vrot.lane.b32.xlu0 %v7145_v31, %s5868_s30 }
 0x1d4   : > { %v2412_v5 = vpop.f32.mrf.mxu1  ;;  %v2343_v48 = vpop.f32.mrf.mxu0 }
 0x1d5   : > { %v2413_v39 = vadd.f32 %v2412_v5, %v7042_v8  ;;  %v2344_v0 = vadd.f32 %v2343_v48, %v7042_v8  ;;  %v7208_v5 = vld [vmem:[%s8618_s5] ss:$2 sm:$0xff] }
 0x1d6   : > { %v2414_v55 = vpop.f32.mrf.mxu1  ;;  %v3044_v48 = vrot.slane %v7208_v5, %v6119_v36 }
 0x1d7   : > { %v2415_v12 = vadd.f32 %v2414_v55, %v7042_v8  ;;  %v7159_v60 = vmax.f32 %v2413_v39, 0.0  ;;  %v7166_v7 = vmax.f32 %v2344_v0, 0.0  ;;  %v3040_v39 = vrot.slane %v7208_v5, %v6123_v38  ;;  %v7223_v0 = vld [vmem:[%s8618_s5 + $0x1] ss:$2 sm:$0xff] }
 0x1d8   : > { %v3464_v61 = vrot.slane %v7223_v0, %v6123_v38 }
 0x1d9   : > { %v7153_v28 = vmax.f32 %v2415_v12, 0.0 }
 0x1db   : > { %8699 = vst [vmem:[#allocation6_spill] sm:$0xff] %v7153_v28  ;;  %2971 = vrot.lane.b32.xlu0 %v7153_v28, %s5868_s30 }
 0x1df   : > { %2969 = vrot.lane.b32.xlu0 %v7159_v60, %s5868_s30 }
 0x1e3   : > { %3395 = vrot.lane.b32.xlu0 %v7153_v28, %s5869_s8  ;;  %v3032_v28 = vrot.slane %v7208_v5, %v6159_v53 }
 0x1e5   : > { %v7176_v18 = vpop.f32.mrf.mxu0 }
 0x1e7   : > { %2967 = vrot.lane.b32.xlu0 %v7166_v7, %s5868_s30  ;;  %v2485_v19 = vpop.f32.mrf.mxu0 }
 0x1e8   : > { %v2930_v46 = vpop.permute.xlu0 %2929  ;;  %v2554_v32 = vpop.f32.mrf.mxu1  ;;  %v2486_v54 = vadd.f32 %v2485_v19, %v7042_v8 }
 0x1e9   : > { %v2555_v47 = vadd.f32 %v2554_v32, %v7042_v8 }
 0x1ea   : > { %v2556_v29 = vpop.f32.mrf.mxu1  ;;  %v7190_v63 = vmax.f32 %v2486_v54, 0.0 }
 0x1eb   : > { %v2557_v14 = vadd.f32 %v2556_v29, %v7042_v8  ;;  %v7180_v25 = vmax.f32 %v2555_v47, 0.0 }
 0x1ec   : > { %v7174_v62 = vpop.permute.xlu0 %2927  ;;  %8702 = vst [vmem:[#allocation11_spill] sm:$0xff] %v7190_v63 }
 0x1ed   : > { %v7172_v26 = vmax.f32 %v2557_v14, 0.0  ;;  %8701 = vst [vmem:[#allocation10_spill] sm:$0xff] %v7180_v25 }
 0x1ef   : > { %8700 = vst [vmem:[#allocation8_spill] sm:$0xff] %v7172_v26  ;;  %2979 = vrot.lane.b32.xlu0 %v7172_v26, %s5868_s30 }
 0x1f0   : > { %v7184_v58 = vpop.permute.xlu0 %3355 }
 0x1f3   : > { %2977 = vrot.lane.b32.xlu0 %v7180_v25, %s5868_s30 }
 0x1f4   : > { %v7192_v17 = vpop.permute.xlu0 %3349 }
 0x1f6   : > { %v2696_v13 = vpop.f32.mrf.mxu1 }
 0x1f7   : > { %3403 = vrot.lane.b32.xlu0 %v7172_v26, %s5869_s8  ;;  %v2697_v6 = vadd.f32 %v2696_v13, %v7042_v8  ;;  %v3468_v13 = vrot.slane %v7223_v0, %v6119_v36 }
 0x1f8   : > { %v2698_v34 = vpop.f32.mrf.mxu1  ;;  %v2934_v2 = vpop.permute.xlu1 %2933 }
 0x1f9   : > { %v2699_v11 = vadd.f32 %v2698_v34, %v7042_v8  ;;  %v7198_v57 = vpop.f32.mrf.mxu0  ;;  %v7227_v29 = vmax.f32 %v2697_v6, 0.0 }
 0x1fb   : > { %v7196_v10 = vmax.f32 %v2699_v11, 0.0  ;;  %2975 = vrot.lane.b32.xlu0 %v7190_v63, %s5868_s30  ;;  %v2627_v12 = vpop.f32.mrf.mxu0  ;;  %8704 = vst [vmem:[#allocation13_spill] sm:$0xff] %v7227_v29 }
 0x1fc   : > { %v3354_v41 = vpop.permute.xlu1 %3353  ;;  %v2628_v14 = vadd.f32 %v2627_v12, %v7042_v8  ;;  %v3036_v12 = vrot.slane %v7208_v5, %v6148_v49 }
 0x1fd   : > { %8703 = vst [vmem:[#allocation12_spill] sm:$0xff] %v7196_v10  ;;  %3411 = vrot.lane.b32.xlu1 %v7196_v10, %s5869_s8  ;;  %v7210_v55 = vpop.permute.xlu0 %2939  ;;  %v3441_v6 = vsel %vm933_vm1, %v3354_v41, %v7184_v58 }
 0x1ff   : > { %2987 = vrot.lane.b32.xlu0 %v7196_v10, %s5868_s30  ;;  %v7264_v10 = vmul.f32 %v3468_v13, %v3441_v6  ;;  %v5233_v13 = vld [vmem:[%s8617_s4] sm:$0xff]  ;;  %v2058_v6 = vadd.f32 %v7114_v9, %v7042_v8 }
 0x200   : > { %v2932_v32 = vpop.permute.xlu1 %2931 }
 0x201   : > { %2941 = vrot.lane.b32.xlu1 %v7212_v23, %s5868_s30  ;;  %v3016_v47 = vsel %vm505_vm0, %v2932_v32, %v2934_v2  ;;  %v3017_v19 = vsel %vm505_vm0, %v2930_v46, %v2932_v32  ;;  %v7234_v54 = vpop.permute.xlu0 %2937  ;;  %v7257_v32 = vmax.f32 %v2628_v14, 0.0 }
 0x202   : > { %v7238_v34 = vmul.f32 %v3040_v39, %v3017_v19  ;;  %v7240_v11 = vmul.f32 %v3044_v48, %v3016_v47  ;;  %v3018_v48 = vsel %vm505_vm0, %v7174_v62, %v2930_v46  ;;  %v3048_v46 = vrot.slane %v7208_v5, %v6221_v45 }
 0x203   : > { %3409 = vrot.lane.b32.xlu0 %v7227_v29, %s5869_s8  ;;  %8705 = vst [vmem:[#allocation14_spill] sm:$0xff] %v7257_v32  ;;  %v7278_v14 = vmul.f32 %v3036_v12, %v3018_v48 }
 0x204   : > { %4047 = vmatprep.subr.mxu1 %v7240_v11  ;;  %v3352_v39 = vpop.permute.xlu1 %3351 }
 0x205   : > { %3361 = vrot.lane.b32.xlu1 %v7077_v22, %s5869_s8  ;;  %v3442_v47 = vsel %vm933_vm1, %v3352_v39, %v3354_v41  ;;  %v7261_v19 = vpop.permute.xlu0 %3363  ;;  %4048 = vmatpush1.msra.mxu1 %v7238_v34  ;;  %v3052_v41 = vrot.slane %v7208_v5, %v6206_v37  ;;  %v3443_v48 = vsel %vm933_vm1, %v7192_v17, %v3352_v39 }
 0x206   : > { %v7266_v26 = vmul.f32 %v3464_v61, %v3442_v47  ;;  %4049 = vmatprep.subr.mxu1 %v7055_v4  ;;  %v3460_v47 = vrot.slane %v7223_v0, %v6148_v49 }
 0x207   : > { %2983 = vrot.lane.b32.xlu0 %v7257_v32, %s5868_s30  ;;  %4050 = vmatpush1.msra.mxu1 %v7046_v43 }
 0x208   : > { %4051 = vmatprep.subr.mxu1 %v7264_v10  ;;  %v7286_v61 = vpop.permute.xlu1 %2925  ;;  %v7315_v39 = vmul.f32 %v3460_v47, %v3443_v48  ;;  %v3060_v48 = vrot.slane %v7208_v5, %v6273_v51 }
 0x209   : > { %3359 = vrot.lane.b32.xlu1 %v7086_v1, %s5869_s8  ;;  %8706 = vst [vmem:[#allocation15_spill] sm:$0xff] %v7286_v61  ;;  %v2936_v15 = vpop.permute.xlu0 %2935  ;;  %v3019_v12 = vsel %vm505_vm0, %v7286_v61, %v7174_v62  ;;  %4052 = vmatpush1.msra.mxu1 %v7266_v26 }
 0x20a   : > { %v3014_v16 = vsel %vm505_vm0, %v2936_v15, %v7234_v54  ;;  %v3015_v9 = vsel %vm505_vm0, %v2934_v2, %v2936_v15  ;;  %v7305_v42 = vmul.f32 %v3032_v28, %v3019_v12  ;;  %4053 = vmatprep.subr.mxu1 %v7278_v14  ;;  %v7319_v15 = vmax.f32 %v2058_v6, 0.0 }
 0x20b   : > { %5236 = vperm.xlu0 %5774, %v5233_v13   ;;  %v7308_v49 = vmul.f32 %v3048_v46, %v3015_v9  ;;  %v7310_v62 = vmul.f32 %v3052_v41, %v3014_v16  ;;  %v2200_v16 = vadd.f32 %v7133_v44, %v7042_v8  ;;  %v2342_v2 = vadd.f32 %v7155_v24, %v7042_v8 }
 0x20c   : > { %4054 = vmatpush1.msra.mxu1 %v7305_v42  ;;  %v2484_v46 = vadd.f32 %v7176_v18, %v7042_v8  ;;  %v2626_v41 = vadd.f32 %v7198_v57, %v7042_v8  ;;  %v3456_v8 = vrot.slane %v7223_v0, %v6159_v53  ;;  %v3056_v9 = vrot.slane %v7208_v5, %v6276_v52  ;;  %v7424_v5 = vld [vmem:[%s8616_s3] sm:$0xff] }
 0x20d   : > { %3357 = vrot.lane.b32.xlu1 %v7065_v3, %s5869_s8  ;;  %4118 = vmatprep.subr.mxu0 %v7310_v62  ;;  %v7336_v28 = vmax.f32 %v2200_v16, 0.0  ;;  %v7348_v44 = vmax.f32 %v2342_v2, 0.0 }
 0x20e   : > { %4055 = vmatprep.subr.mxu1 %v7050_v56  ;;  %4119 = vmatpush1.msra.mxu0 %v7308_v49  ;;  %v7360_v24 = vmax.f32 %v2484_v46, 0.0  ;;  %v7372_v18 = vmax.f32 %v2626_v41, 0.0 }
 0x20f   : > { %4056 = vmatpush1.msra.mxu1 %v7060_v50  ;;  %4120 = vmatprep.subr.mxu0 %v7086_v1 }
 0x210   : > { %4057 = vmatprep.subr.mxu1 %v7315_v39  ;;  %4121 = vmatpush1.msra.mxu0 %v7065_v3  ;;  %8707 = vst [vmem:[#allocation16_spill] sm:$0xff] %v7360_v24  ;;  %8708 = vst [vmem:[#allocation17_spill] sm:$0xff] %v7372_v18 }
 0x211   : > { %2949 = vrot.lane.b32.xlu1 %v7319_v15, %s5868_s30  ;;  %v7392_v13 = vpop.permute.xlu0 %2947 }
 0x215   : > { %3369 = vrot.lane.b32.xlu1 %v7102_v21, %s5869_s8  ;;  %v7417_v2 = vpop.permute.xlu0 %2945 }
 0x219   : > { %3367 = vrot.lane.b32.xlu1 %v7107_v27, %s5869_s8 }
 0x21d   : > { %3365 = vrot.lane.b32.xlu1 %v7212_v23, %s5869_s8 }
 0x221   : > { %2957 = vrot.lane.b32.xlu1 %v7336_v28, %s5868_s30 }
 0x225   : > { %3377 = vrot.lane.b32.xlu1 %v7121_v30, %s5869_s8 }
 0x229   : > { %3375 = vrot.lane.b32.xlu1 %v7126_v33, %s5869_s8 }
 0x22d   : > { %3373 = vrot.lane.b32.xlu1 %v7319_v15, %s5869_s8 }
 0x231   : > { %2965 = vrot.lane.b32.xlu1 %v7348_v44, %s5868_s30 }
 0x235   : > { %3385 = vrot.lane.b32.xlu1 %v7140_v40, %s5869_s8 }
 0x239   : > { %3383 = vrot.lane.b32.xlu1 %v7145_v31, %s5869_s8 }
 0x23d   : > { %3381 = vrot.lane.b32.xlu1 %v7336_v28, %s5869_s8 }
 0x241   : > { %2973 = vrot.lane.b32.xlu1 %v7360_v24, %s5868_s30 }
 0x245   : > { %3393 = vrot.lane.b32.xlu1 %v7159_v60, %s5869_s8 }
 0x249   : > { %3391 = vrot.lane.b32.xlu1 %v7166_v7, %s5869_s8 }
 0x24d   : > { %3389 = vrot.lane.b32.xlu1 %v7348_v44, %s5869_s8 }
 0x251   : > { %2981 = vrot.lane.b32.xlu1 %v7372_v18, %s5868_s30 }
 0x255   : > { %3401 = vrot.lane.b32.xlu1 %v7180_v25, %s5869_s8 }
 0x259   : > { %3399 = vrot.lane.b32.xlu1 %v7190_v63, %s5869_s8 }
 0x25d   : > { %3397 = vrot.lane.b32.xlu1 %v7360_v24, %s5869_s8 }
 0x261   : > { %2985 = vrot.lane.b32.xlu1 %v7227_v29, %s5868_s30  ;;  %v3476_v29 = vrot.slane %v7223_v0, %v6206_v37 }
 0x265   : > { %3407 = vrot.lane.b32.xlu1 %v7257_v32, %s5869_s8  ;;  %v3472_v32 = vrot.slane %v7223_v0, %v6221_v45 }
 0x269   : > { %3405 = vrot.lane.b32.xlu1 %v7372_v18, %s5869_s8 }
 0x26f   : > { %v7390_v57 = vpop.permute.xlu1 %3411 }
 0x270   : > { %8709 = vst [vmem:[#allocation18_spill] sm:$0xff] %v7390_v57  ;;  %v3444_v6 = vsel %vm933_vm1, %v7390_v57, %v7192_v17  ;;  %v3013_v17 = vsel %vm505_vm0, %v7234_v54, %v7210_v55  ;;  %v8710_v57 = vld [vmem:[#allocation9_spill] sm:$0xff] }
 0x271   : > { %v7398_v47 = vmul.f32 %v3456_v8, %v3444_v6  ;;  %v3484_v8 = vrot.slane %v7223_v0, %v6273_v51  ;;  %v3480_v6 = vrot.slane %v7223_v0, %v6276_v52 }
 0x273   : > { %4058 = vmatpush1.msra.mxu1 %v7398_v47  ;;  %v7401_v12 = vpop.permute.xlu1 %2941 }
 0x274   : > { %4059 = vmatprep.subr.mxu1 %v8688_v59  ;;  %v3012_v16 = vsel %vm505_vm0, %v7210_v55, %v7401_v12  ;;  %v7431_v55 = vmul.f32 %v3056_v9, %v3013_v17  ;;  %v7444_v9 = vpop.permute.xlu0 %3371 }
 0x275   : > { %4060 = vmatpush1.msra.mxu1 %v8688_v59  ;;  %v7426_v41 = vmul.f32 %v3060_v48, %v3012_v16 }
 0x276   : > { %4061 = vmatprep.subr.mxu1 %v8688_v59 }
 0x277   : > { %4062 = vmatpush1.msra.mxu1 %v8688_v59  ;;  %v3362_v46 = vpop.permute.xlu1 %3361 }
 0x278   : > { %4063 = vmatprep.subr.mxu1 %v8688_v59  ;;  %v3437_v54 = vsel %vm933_vm1, %v3362_v46, %v7261_v19  ;;  %v2944_v0 = vpop.permute.xlu0 %2943 }
 0x279   : > { %4064 = vmatpush1.msra.mxu1 %v8688_v59  ;;  %v7446_v16 = vmul.f32 %v3484_v8, %v3437_v54 }
 0x27a   : > { %5686 = vmatmul.mubr.msk.f32.vlgmr.msra.gmra.mxu1 %vm1561_vm2, %v7424_v5  ;;  %4189 = vmatprep.subr.mxu1 %v7426_v41 }
 0x27b   : > { %4190 = vmatpush1.msra.mxu1 %v7431_v55  ;;  %v3360_v48 = vpop.permute.xlu1 %3359  ;;  %4239 = vmatprep.mubr.f32.mxu1 %v8688_v59 }
 0x27c   : > { %v3438_v17 = vsel %vm933_vm1, %v3360_v48, %v3362_v46  ;;  %4191 = vmatprep.subr.mxu1 %v7071_v20 }
 0x27d   : > { %v7451_v18 = vmul.f32 %v3480_v6, %v3438_v17  ;;  %4192 = vmatpush1.msra.mxu1 %v7077_v22 }
 0x27e   : > { %4193 = vmatprep.subr.mxu1 %v7446_v16 }
 0x27f   : > { %4194 = vmatpush1.msra.mxu1 %v7451_v18  ;;  %v3358_v8 = vpop.permute.xlu1 %3357 }
 0x280   : > { %v3439_v46 = vsel %vm933_vm1, %v3358_v8, %v3360_v48  ;;  %v3440_v54 = vsel %vm933_vm1, %v7184_v58, %v3358_v8  ;;  %4195 = vmatprep.subr.mxu1 %v7310_v62  ;;  %v7481_v58 = vld [vmem:[%s8618_s5 + $0x10] ss:$2 sm:$0xff] }
 0x281   : > { %v7466_v6 = vmul.f32 %v3472_v32, %v3440_v54  ;;  %v7468_v17 = vmul.f32 %v3476_v29, %v3439_v46  ;;  %4196 = vmatpush1.msra.mxu1 %v7308_v49  ;;  %v7485_v29 = vpop.permute.xlu0 %2955  ;;  %v3076_v32 = vrot.slane %v7481_v58, %v6119_v36  ;;  %v3072_v46 = vrot.slane %v7481_v58, %v6123_v38 }
 0x282   : > { %4197 = vmatprep.subr.mxu1 %v7086_v1  ;;  %v3068_v61 = vrot.slane %v7481_v58, %v8710_v57 }
 0x283   : > { %4122 = vmatprep.subr.mxu0 %v7468_v17  ;;  %4198 = vmatpush1.msra.mxu1 %v7065_v3  ;;  %v7474_v48 = vpop.permute.xlu1 %2949 }
 0x284   : > { %4123 = vmatpush1.msra.mxu0 %v7466_v6  ;;  %4199 = vmatprep.subr.mxu1 %v7468_v17  ;;  %v3008_v54 = vsel %vm505_vm0, %v7392_v13, %v7474_v48 }
 0x285   : > { %4124 = vmatprep.subr.mxu0 %v7240_v11  ;;  %4200 = vmatpush1.msra.mxu1 %v7466_v6  ;;  %v7516_v24 = vmul.f32 %v3076_v32, %v3008_v54 }
 0x286   : > { %4125 = vmatpush1.msra.mxu0 %v7238_v34  ;;  %4201 = vmatprep.subr.mxu1 %v7240_v11  ;;  %v7502_v11 = vld [vmem:[%s8618_s5 + $0x11] ss:$2 sm:$0xff] }
 0x287   : > { %4126 = vmatprep.subr.mxu0 %v7055_v4  ;;  %4202 = vmatpush1.msra.mxu1 %v7238_v34  ;;  %v3370_v8 = vpop.permute.xlu1 %3369  ;;  %v3009_v34 = vsel %vm505_vm0, %v7417_v2, %v7392_v13  ;;  %v3496_v32 = vrot.slane %v7502_v11, %v6123_v38 }
 0x288   : > { %4127 = vmatpush1.msra.mxu0 %v7046_v43  ;;  %4203 = vmatprep.subr.mxu1 %v7055_v4  ;;  %v3500_v4 = vrot.slane %v7502_v11, %v6119_v36  ;;  %v7522_v63 = vmul.f32 %v3072_v46, %v3009_v34 }
 0x289   : > { %4128 = vmatprep.subr.mxu0 %v7264_v10  ;;  %4204 = vmatpush1.msra.mxu1 %v7046_v43  ;;  %v7524_v43 = vpop.permute.xlu0 %2953 }
 0x28a   : > { %4129 = vmatpush1.msra.mxu0 %v7266_v26  ;;  %4205 = vmatprep.subr.mxu1 %v7264_v10  ;;  %v3433_v10 = vsel %vm933_vm1, %v3370_v8, %v7444_v9 }
 0x28b   : > { %4130 = vmatprep.subr.mxu0 %v7278_v14  ;;  %4206 = vmatpush1.msra.mxu1 %v7266_v26  ;;  %v3368_v13 = vpop.permute.xlu1 %3367  ;;  %v3010_v26 = vsel %vm505_vm0, %v2944_v0, %v7417_v2  ;;  %v3064_v14 = vrot.slane %v7481_v58, %v6159_v53  ;;  %v7548_v54 = vmul.f32 %v3500_v4, %v3433_v10  ;;  %v8711_v2 = vld [vmem:[#allocation7_spill] sm:$0xff] }
 0x28c   : > { %4131 = vmatpush1.msra.mxu0 %v7305_v42  ;;  %5688 = vmatmul.mubr.msk.f32.vlgmr.msra.gmra.mxu1 %vm1561_vm2, %v7424_v5  ;;  %v3434_v46 = vsel %vm933_vm1, %v3368_v13, %v3370_v8  ;;  %v3011_v42 = vsel %vm505_vm0, %v7401_v12, %v2944_v0  ;;  %v7552_v8 = vmul.f32 %v3068_v61, %v3010_v26 }
 0x28d   : > { %4331 = vmatprep.subr.mxu1 %v7516_v24  ;;  %4132 = vmatprep.subr.mxu0 %v7050_v56  ;;  %v7554_v25 = vmul.f32 %v3496_v32, %v3434_v46  ;;  %v3492_v56 = vrot.slane %v7502_v11, %v8710_v57  ;;  %v7560_v12 = vmul.f32 %v3064_v14, %v3011_v42  ;;  %v7569_v61 = vpop.permute.xlu0 %3379 }
 0x28e   : > { %4332 = vmatpush1.msra.mxu1 %v7522_v63  ;;  %4133 = vmatpush1.msra.mxu0 %v7060_v50  ;;  %v3488_v50 = vrot.slane %v7502_v11, %v6159_v53  ;;  %v3092_v32 = vrot.slane %v7481_v58, %v6273_v51  ;;  %v3088_v26 = vrot.slane %v7481_v58, %v6276_v52 }
 0x28f   : > { %4333 = vmatprep.subr.mxu1 %v8711_v2  ;;  %4134 = vmatprep.subr.mxu0 %v7315_v39  ;;  %v3366_v34 = vpop.permute.xlu1 %3365  ;;  %v3005_v46 = vsel %vm505_vm0, %v7524_v43, %v7485_v29 }
 0x290   : > { %4334 = vmatpush1.msra.mxu1 %v7102_v21  ;;  %4135 = vmatpush1.msra.mxu0 %v7398_v47  ;;  %v3435_v39 = vsel %vm933_vm1, %v3366_v34, %v3368_v13  ;;  %v3436_v0 = vsel %vm933_vm1, %v7261_v19, %v3366_v34  ;;  %v3084_v34 = vrot.slane %v7481_v58, %v6206_v37 }
 0x291   : > { %4335 = vmatprep.subr.mxu1 %v7548_v54  ;;  %5687 = vmatmul.mubr.msk.f32.vlgmr.msra.gmra.mxu0 %vm1561_vm2, %v7424_v5  ;;  %v7580_v4 = vmul.f32 %v3492_v56, %v3435_v39  ;;  %v7584_v13 = vmul.f32 %v3488_v50, %v3436_v0  ;;  %v2952_v10 = vpop.permute.xlu0 %2951  ;;  %v8712_v0 = vld [vmem:[#allocation4_spill] sm:$0xff] }
 0x292   : > { %4260 = vmatprep.subr.mxu0 %v7552_v8  ;;  %4336 = vmatpush1.msra.mxu1 %v7554_v25  ;;  %v3007_v39 = vsel %vm505_vm0, %v7474_v48, %v2952_v10 }
 0x293   : > { %4261 = vmatpush1.msra.mxu0 %v7560_v12  ;;  %4337 = vmatprep.subr.mxu1 %v7552_v8  ;;  %v7578_v47 = vpop.permute.xlu1 %2957 }
 0x294   : > { %4262 = vmatprep.subr.mxu0 %v7107_v27  ;;  %4338 = vmatpush1.msra.mxu1 %v7560_v12  ;;  %v3004_v14 = vsel %vm505_vm0, %v7485_v29, %v7578_v47  ;;  %v3516_v29 = vrot.slane %v7502_v11, %v6273_v51 }
 0x295   : > { %4263 = vmatpush1.msra.mxu0 %v7212_v23  ;;  %4339 = vmatprep.subr.mxu1 %v7107_v27  ;;  %v7612_v42 = vpop.permute.xlu0 %2963 }
 0x296   : > { %4264 = vmatprep.subr.mxu0 %v7580_v4  ;;  %4340 = vmatpush1.msra.mxu1 %v7212_v23 }
 0x297   : > { %4265 = vmatpush1.msra.mxu0 %v7584_v13  ;;  %4341 = vmatprep.subr.mxu1 %v7580_v4  ;;  %v3378_v19 = vpop.permute.xlu1 %3377 }
 0x298   : > { %4266 = vmatprep.subr.mxu0 %v7426_v41  ;;  %4342 = vmatpush1.msra.mxu1 %v7584_v13 }
 0x299   : > { %4267 = vmatpush1.msra.mxu0 %v7431_v55  ;;  %4343 = vmatprep.subr.mxu1 %v7426_v41  ;;  %v7647_v50 = vpop.permute.xlu0 %2961 }
 0x29a   : > { %4268 = vmatprep.subr.mxu0 %v7071_v20  ;;  %4344 = vmatpush1.msra.mxu1 %v7431_v55  ;;  %v7618_v55 = vmul.f32 %v3092_v32, %v3004_v14  ;;  %v3508_v32 = vrot.slane %v7502_v11, %v6206_v37 }
 0x29b   : > { %4269 = vmatpush1.msra.mxu0 %v7077_v22  ;;  %4345 = vmatprep.subr.mxu1 %v7071_v20  ;;  %v3376_v41 = vpop.permute.xlu1 %3375  ;;  %v7622_v20 = vmul.f32 %v3088_v26, %v3005_v46 }
 0x29c   : > { %4270 = vmatprep.subr.mxu0 %v7446_v16  ;;  %4346 = vmatpush1.msra.mxu1 %v7077_v22  ;;  %v3430_v56 = vsel %vm933_vm1, %v3376_v41, %v3378_v19 }
 0x29d   : > { %4271 = vmatpush1.msra.mxu0 %v7451_v18  ;;  %4347 = vmatprep.subr.mxu1 %v7446_v16  ;;  %v3429_v16 = vsel %vm933_vm1, %v3378_v19, %v7569_v61 }
 0x29e   : > { %4272 = vmatprep.subr.mxu0 %v7310_v62  ;;  %4348 = vmatpush1.msra.mxu1 %v7451_v18  ;;  %v3512_v62 = vrot.slane %v7502_v11, %v6276_v52  ;;  %v3080_v18 = vrot.slane %v7481_v58, %v6221_v45 }
 0x29f   : > { %4381 = vmatprep.mubr.f32.mxu1 %v8688_v59  ;;  %4273 = vmatpush1.msra.mxu0 %v7308_v49  ;;  %v3374_v22 = vpop.permute.xlu1 %3373  ;;  %v3006_v49 = vsel %vm505_vm0, %v2952_v10, %v7524_v43  ;;  %v7654_v43 = vmul.f32 %v3516_v29, %v3429_v16  ;;  %v3001_v16 = vsel %vm505_vm0, %v7647_v50, %v7612_v42 }
 0x2a0   : > { %5690 = vmatmul.mubr.msk.f32.vlgmr.msra.gmra.mxu1 %vm1561_vm2, %v7424_v5  ;;  %4473 = vmatprep.subr.mxu1 %v7618_v55  ;;  %v7662_v19 = vmul.f32 %v3512_v62, %v3430_v56  ;;  %v3431_v48 = vsel %vm933_vm1, %v3374_v22, %v3376_v41  ;;  %v3432_v10 = vsel %vm933_vm1, %v7444_v9, %v3374_v22  ;;  %v7701_v41 = vld [vmem:[%s8618_s5 + $0x20] ss:$2 sm:$0xff] }
 0x2a1   : > { %4274 = vmatprep.subr.mxu0 %v7086_v1  ;;  %4474 = vmatpush1.msra.mxu1 %v7622_v20  ;;  %v7660_v1 = vmul.f32 %v3084_v34, %v3006_v49  ;;  %v7686_v26 = vmul.f32 %v3508_v32, %v3431_v48  ;;  %v3108_v29 = vrot.slane %v7701_v41, %v6119_v36  ;;  %v8713_v32 = vld [vmem:[#allocation5_spill] sm:$0xff] }
 0x2a2   : > { %4275 = vmatpush1.msra.mxu0 %v7065_v3  ;;  %4475 = vmatprep.subr.mxu1 %v8712_v0  ;;  %v7668_v3 = vmul.f32 %v3080_v18, %v3007_v39  ;;  %v3104_v22 = vrot.slane %v7701_v41, %v6123_v38  ;;  %v3096_v18 = vrot.slane %v7701_v41, %v6159_v53 }
 0x2a3   : > { %4276 = vmatprep.subr.mxu0 %v7468_v17  ;;  %4476 = vmatpush1.msra.mxu1 %v7121_v30  ;;  %v7658_v58 = vpop.permute.xlu1 %2965  ;;  %v3504_v17 = vrot.slane %v7502_v11, %v6221_v45  ;;  %v7684_v11 = vpop.permute.xlu0 %3387 }
 0x2a4   : > { %4277 = vmatpush1.msra.mxu0 %v7466_v6  ;;  %4310 = vmatprep.mubr.f32.mxu0 %v8688_v59  ;;  %v3000_v34 = vsel %vm505_vm0, %v7612_v42, %v7658_v58  ;;  %v7738_v42 = vmul.f32 %v3104_v22, %v3001_v16  ;;  %v3124_v22 = vrot.slane %v7701_v41, %v6273_v51 }
 0x2a5   : > { %4477 = vmatprep.subr.mxu1 %v7654_v43  ;;  %5689 = vmatmul.mubr.msk.f32.vlgmr.msra.gmra.mxu0 %vm1561_vm2, %v7424_v5  ;;  %v7690_v14 = vmul.f32 %v3504_v17, %v3432_v10  ;;  %v7734_v62 = vmul.f32 %v3108_v29, %v3000_v34  ;;  %v3120_v34 = vrot.slane %v7701_v41, %v6276_v52 }
 0x2a6   : > { %4402 = vmatprep.subr.mxu0 %v7660_v1  ;;  %4478 = vmatpush1.msra.mxu1 %v7662_v19 }
 0x2a7   : > { %4403 = vmatpush1.msra.mxu0 %v7668_v3  ;;  %4479 = vmatprep.subr.mxu1 %v7660_v1  ;;  %v3386_v6 = vpop.permute.xlu1 %3385  ;;  %v2960_v46 = vpop.permute.xlu0 %2959 }
 0x2a8   : > { %4404 = vmatprep.subr.mxu0 %v7126_v33  ;;  %4480 = vmatpush1.msra.mxu1 %v7668_v3  ;;  %v3003_v39 = vsel %vm505_vm0, %v7578_v47, %v2960_v46 }
 0x2a9   : > { %4405 = vmatpush1.msra.mxu0 %v7319_v15  ;;  %4481 = vmatprep.subr.mxu1 %v7126_v33 }
 0x2aa   : > { %4406 = vmatprep.subr.mxu0 %v7686_v26  ;;  %4482 = vmatpush1.msra.mxu1 %v7319_v15 }
 0x2ab   : > { %4407 = vmatpush1.msra.mxu0 %v7690_v14  ;;  %4483 = vmatprep.subr.mxu1 %v7686_v26  ;;  %v3384_v9 = vpop.permute.xlu1 %3383 }
 0x2ac   : > { %4408 = vmatprep.subr.mxu0 %v7516_v24  ;;  %4484 = vmatpush1.msra.mxu1 %v7690_v14  ;;  %v3426_v56 = vsel %vm933_vm1, %v3384_v9, %v3386_v6 }
 0x2ad   : > { %4409 = vmatpush1.msra.mxu0 %v7522_v63  ;;  %4485 = vmatprep.subr.mxu1 %v7516_v24 }
 0x2ae   : > { %4410 = vmatprep.subr.mxu0 %v8711_v2  ;;  %4486 = vmatpush1.msra.mxu1 %v7522_v63  ;;  %v7726_v63 = vld [vmem:[%s8618_s5 + $0x21] ss:$2 sm:$0xff] }
 0x2af   : > { %4411 = vmatpush1.msra.mxu0 %v7102_v21  ;;  %4487 = vmatprep.subr.mxu1 %v8711_v2  ;;  %v3382_v24 = vpop.permute.xlu1 %3381  ;;  %v7732_v2 = vpop.permute.xlu0 %2971  ;;  %v3532_v49 = vrot.slane %v7726_v63, %v6119_v36  ;;  %v3524_v10 = vrot.slane %v7726_v63, %v8710_v57  ;;  %v3520_v47 = vrot.slane %v7726_v63, %v6159_v53 }
 0x2b0   : > { %4412 = vmatprep.subr.mxu0 %v7548_v54  ;;  %4488 = vmatpush1.msra.mxu1 %v7102_v21  ;;  %v3100_v21 = vrot.slane %v7701_v41, %v8710_v57 }
 0x2b1   : > { %4413 = vmatpush1.msra.mxu0 %v7554_v25  ;;  %4489 = vmatprep.subr.mxu1 %v7548_v54  ;;  %v3425_v54 = vsel %vm933_vm1, %v3386_v6, %v7684_v11  ;;  %v3428_v6 = vsel %vm933_vm1, %v7569_v61, %v3382_v24 }
 0x2b2   : > { %4414 = vmatprep.subr.mxu0 %v7552_v8  ;;  %4490 = vmatpush1.msra.mxu1 %v7554_v25  ;;  %v3528_v8 = vrot.slane %v7726_v63, %v6123_v38  ;;  %v7770_v17 = vmul.f32 %v3532_v49, %v3425_v54 }
 0x2b3   : > { %4523 = vmatprep.mubr.f32.mxu1 %v8688_v59  ;;  %4415 = vmatpush1.msra.mxu0 %v7560_v12  ;;  %v7754_v25 = vpop.permute.xlu1 %2973  ;;  %v3002_v12 = vsel %vm505_vm0, %v2960_v46, %v7647_v50  ;;  %v2970_v48 = vpop.permute.xlu0 %2969 }
 0x2b4   : > { %5692 = vmatmul.mubr.msk.f32.vlgmr.msra.gmra.mxu1 %vm1561_vm2, %v7424_v5  ;;  %4615 = vmatprep.subr.mxu1 %v7734_v62  ;;  %v7774_v50 = vmul.f32 %v3100_v21, %v3002_v12  ;;  %v8714_v12 = vld [vmem:[#allocation6_spill] sm:$0xff] }
 0x2b5   : > { %4416 = vmatprep.subr.mxu0 %v7107_v27  ;;  %4616 = vmatpush1.msra.mxu1 %v7738_v42  ;;  %v7776_v27 = vmul.f32 %v3528_v8, %v3426_v56 }
 0x2b6   : > { %4417 = vmatpush1.msra.mxu0 %v7212_v23  ;;  %4617 = vmatprep.subr.mxu1 %v8713_v32  ;;  %v7782_v23 = vmul.f32 %v3096_v18, %v3003_v39 }
 0x2b7   : > { %4418 = vmatprep.subr.mxu0 %v7580_v4  ;;  %4618 = vmatpush1.msra.mxu1 %v7140_v40  ;;  %v3427_v4 = vsel %vm933_vm1, %v3382_v24, %v3384_v9  ;;  %v7802_v9 = vmul.f32 %v3520_v47, %v3428_v6  ;;  %v7806_v61 = vpop.permute.xlu0 %3395  ;;  %v2996_v24 = vsel %vm505_vm0, %v7732_v2, %v7754_v25  ;;  %v7913_v47 = vld [vmem:[%s8618_s5 + $0x30] ss:$2 sm:$0xff] }
 0x2b8   : > { %4419 = vmatpush1.msra.mxu0 %v7584_v13  ;;  %4452 = vmatprep.mubr.f32.mxu0 %v8688_v59  ;;  %v3394_v13 = vpop.permute.xlu1 %3393  ;;  %v7798_v46 = vmul.f32 %v3524_v10, %v3427_v4  ;;  %v3140_v6 = vrot.slane %v7913_v47, %v6119_v36 }
 0x2b9   : > { %4619 = vmatprep.subr.mxu1 %v7770_v17  ;;  %5691 = vmatmul.mubr.msk.f32.vlgmr.msra.gmra.mxu0 %vm1561_vm2, %v7424_v5  ;;  %v3421_v21 = vsel %vm933_vm1, %v3394_v13, %v7806_v61 }
 0x2ba   : > { %4544 = vmatprep.subr.mxu0 %v7774_v50  ;;  %4620 = vmatpush1.msra.mxu1 %v7776_v27 }
 0x2bb   : > { %4545 = vmatpush1.msra.mxu0 %v7782_v23  ;;  %4621 = vmatprep.subr.mxu1 %v7774_v50  ;;  %v2968_v16 = vpop.permute.xlu0 %2967 }
 0x2bc   : > { %4546 = vmatprep.subr.mxu0 %v7145_v31  ;;  %4622 = vmatpush1.msra.mxu1 %v7782_v23  ;;  %v3392_v29 = vpop.permute.xlu1 %3391  ;;  %v2999_v8 = vsel %vm505_vm0, %v7658_v58, %v2968_v16  ;;  %v3536_v58 = vrot.slane %v7726_v63, %v6221_v45 }
 0x2bd   : > { %4547 = vmatpush1.msra.mxu0 %v7336_v28  ;;  %4623 = vmatprep.subr.mxu1 %v7145_v31  ;;  %v3422_v54 = vsel %vm933_vm1, %v3392_v29, %v3394_v13  ;;  %v3136_v13 = vrot.slane %v7913_v47, %v6123_v38 }
 0x2be   : > { %4548 = vmatprep.subr.mxu0 %v7798_v46  ;;  %4624 = vmatpush1.msra.mxu1 %v7336_v28 }
 0x2bf   : > { %4549 = vmatpush1.msra.mxu0 %v7802_v9  ;;  %4625 = vmatprep.subr.mxu1 %v7798_v46 }
 0x2c0   : > { %4550 = vmatprep.subr.mxu0 %v7618_v55  ;;  %4626 = vmatpush1.msra.mxu1 %v7802_v9  ;;  %v3390_v49 = vpop.permute.xlu1 %3389 }
 0x2c1   : > { %4551 = vmatpush1.msra.mxu0 %v7622_v20  ;;  %4627 = vmatprep.subr.mxu1 %v7618_v55  ;;  %v2997_v55 = vsel %vm505_vm0, %v2970_v48, %v7732_v2  ;;  %v3548_v2 = vrot.slane %v7726_v63, %v6273_v51 }
 0x2c2   : > { %4552 = vmatprep.subr.mxu0 %v8712_v0  ;;  %4628 = vmatpush1.msra.mxu1 %v7622_v20  ;;  %v7835_v20 = vmul.f32 %v3124_v22, %v2996_v24 }
 0x2c3   : > { %4553 = vmatpush1.msra.mxu0 %v7121_v30  ;;  %4629 = vmatprep.subr.mxu1 %v8712_v0  ;;  %v7839_v0 = vmul.f32 %v3120_v34, %v2997_v55  ;;  %v7868_v18 = vmul.f32 %v3548_v2, %v3421_v21  ;;  %v7941_v34 = vld [vmem:[%s8618_s5 + $0x31] ss:$2 sm:$0xff] }
 0x2c4   : > { %4554 = vmatprep.subr.mxu0 %v7654_v43  ;;  %4630 = vmatpush1.msra.mxu1 %v7121_v30  ;;  %v3116_v30 = vrot.slane %v7701_v41, %v6206_v37  ;;  %v7878_v39 = vpop.permute.xlu1 %2981  ;;  %v3556_v21 = vrot.slane %v7941_v34, %v8710_v57 }
 0x2c5   : > { %4555 = vmatpush1.msra.mxu0 %v7662_v19  ;;  %4631 = vmatprep.subr.mxu1 %v7654_v43  ;;  %v2980_v43 = vpop.permute.xlu0 %2979 }
 0x2c6   : > { %4556 = vmatprep.subr.mxu0 %v7660_v1  ;;  %4632 = vmatpush1.msra.mxu1 %v7662_v19  ;;  %v3544_v1 = vrot.slane %v7726_v63, %v6276_v52  ;;  %v2998_v19 = vsel %vm505_vm0, %v2968_v16, %v2970_v48 }
 0x2c7   : > { %4665 = vmatprep.mubr.f32.mxu1 %v8688_v59  ;;  %4557 = vmatpush1.msra.mxu0 %v7668_v3  ;;  %v3112_v3 = vrot.slane %v7701_v41, %v6221_v45  ;;  %v7872_v41 = vmul.f32 %v3116_v30, %v2998_v19  ;;  %v8716_v30 = vld [vmem:[#allocation10_spill] sm:$0xff] }
 0x2c8   : > { %5694 = vmatmul.mubr.msk.f32.vlgmr.msra.gmra.mxu1 %vm1561_vm2, %v7424_v5  ;;  %4757 = vmatprep.subr.mxu1 %v7835_v20  ;;  %v7874_v56 = vmul.f32 %v3544_v1, %v3422_v54  ;;  %v8717_v1 = vld [vmem:[#allocation11_spill] sm:$0xff]  ;;  %v3156_v54 = vrot.slane %v7913_v47, %v6273_v51 }
 0x2c9   : > { %4558 = vmatprep.subr.mxu0 %v7126_v33  ;;  %4758 = vmatpush1.msra.mxu1 %v7839_v0  ;;  %v3540_v33 = vrot.slane %v7726_v63, %v6206_v37  ;;  %v2978_v48 = vpop.permute.xlu0 %2977 }
 0x2ca   : > { %4559 = vmatpush1.msra.mxu0 %v7319_v15  ;;  %4759 = vmatprep.subr.mxu1 %v8714_v12  ;;  %v7882_v15 = vmul.f32 %v3112_v3, %v2999_v8  ;;  %v8718_v3 = vld [vmem:[#allocation16_spill] sm:$0xff] }
 0x2cb   : > { %4560 = vmatprep.subr.mxu0 %v7686_v26  ;;  %4760 = vmatpush1.msra.mxu1 %v7159_v60  ;;  %v3423_v26 = vsel %vm933_vm1, %v3390_v49, %v3392_v29  ;;  %v2992_v29 = vsel %vm505_vm0, %v2980_v43, %v7878_v39 }
 0x2cc   : > { %4561 = vmatpush1.msra.mxu0 %v7690_v14  ;;  %4594 = vmatprep.mubr.f32.mxu0 %v8688_v59  ;;  %v3424_v14 = vsel %vm933_vm1, %v7684_v11, %v3390_v49  ;;  %v7898_v63 = vmul.f32 %v3540_v33, %v3423_v26  ;;  %v3402_v11 = vpop.permute.xlu1 %3401  ;;  %v7943_v24 = vmul.f32 %v3140_v6, %v2992_v29  ;;  %v8715_v49 = vld [vmem:[#allocation8_spill] sm:$0xff]  ;;  %v8719_v33 = vld [vmem:[#allocation15_spill] sm:$0xff] }
 0x2cd   : > { %4761 = vmatprep.subr.mxu1 %v7868_v18  ;;  %5693 = vmatmul.mubr.msk.f32.vlgmr.msra.gmra.mxu0 %vm1561_vm2, %v7424_v5  ;;  %v7902_v10 = vmul.f32 %v3536_v58, %v3424_v14  ;;  %v7915_v4 = vpop.permute.xlu0 %3403  ;;  %v3152_v26 = vrot.slane %v7913_v47, %v6276_v52  ;;  %v3148_v6 = vrot.slane %v7913_v47, %v6206_v37  ;;  %v8721_v29 = vld [vmem:[#allocation12_spill] sm:$0xff] }
 0x2ce   : > { %4686 = vmatprep.subr.mxu0 %v7872_v41  ;;  %4762 = vmatpush1.msra.mxu1 %v7874_v56  ;;  %v3417_v55 = vsel %vm933_vm1, %v3402_v11, %v7915_v4 }
 0x2cf   : > { %4687 = vmatpush1.msra.mxu0 %v7882_v15  ;;  %4763 = vmatprep.subr.mxu1 %v7872_v41 }
 0x2d0   : > { %4688 = vmatprep.subr.mxu0 %v7166_v7  ;;  %4764 = vmatpush1.msra.mxu1 %v7882_v15  ;;  %v3400_v22 = vpop.permute.xlu1 %3399 }
 0x2d1   : > { %4689 = vmatpush1.msra.mxu0 %v7348_v44  ;;  %4765 = vmatprep.subr.mxu1 %v7166_v7 }
 0x2d2   : > { %4690 = vmatprep.subr.mxu0 %v7898_v63  ;;  %4766 = vmatpush1.msra.mxu1 %v7348_v44 }
 0x2d3   : > { %4691 = vmatpush1.msra.mxu0 %v7902_v10  ;;  %4767 = vmatprep.subr.mxu1 %v7898_v63 }
 0x2d4   : > { %4692 = vmatprep.subr.mxu0 %v7734_v62  ;;  %4768 = vmatpush1.msra.mxu1 %v7902_v10  ;;  %v3398_v16 = vpop.permute.xlu1 %3397 }
 0x2d5   : > { %4693 = vmatpush1.msra.mxu0 %v7738_v42  ;;  %4769 = vmatprep.subr.mxu1 %v7734_v62  ;;  %v2993_v62 = vsel %vm505_vm0, %v2978_v48, %v2980_v43 }
 0x2d6   : > { %4694 = vmatprep.subr.mxu0 %v8713_v32  ;;  %4770 = vmatpush1.msra.mxu1 %v7738_v42  ;;  %v2976_v42 = vpop.permute.xlu0 %2975 }
 0x2d7   : > { %4695 = vmatpush1.msra.mxu0 %v7140_v40  ;;  %4771 = vmatprep.subr.mxu1 %v8713_v32  ;;  %v7947_v32 = vmul.f32 %v3136_v13, %v2993_v62  ;;  %v8722_v62 = vld [vmem:[#allocation13_spill] sm:$0xff] }
 0x2d8   : > { %4696 = vmatprep.subr.mxu0 %v7770_v17  ;;  %4772 = vmatpush1.msra.mxu1 %v7140_v40  ;;  %v3564_v40 = vrot.slane %v7941_v34, %v6119_v36  ;;  %v2994_v36 = vsel %vm505_vm0, %v2976_v42, %v2978_v48 }
 0x2d9   : > { %4697 = vmatpush1.msra.mxu0 %v7776_v27  ;;  %4773 = vmatprep.subr.mxu1 %v7770_v17  ;;  %v3132_v17 = vrot.slane %v7913_v47, %v8710_v57  ;;  %v3420_v57 = vsel %vm933_vm1, %v7806_v61, %v3398_v16  ;;  %v2986_v61 = vpop.permute.xlu1 %2985 }
 0x2da   : > { %4698 = vmatprep.subr.mxu0 %v7774_v50  ;;  %4774 = vmatpush1.msra.mxu1 %v7776_v27  ;;  %v3560_v50 = vrot.slane %v7941_v34, %v6123_v38  ;;  %v3128_v27 = vrot.slane %v7913_v47, %v6159_v53  ;;  %v2995_v38 = vsel %vm505_vm0, %v7754_v25, %v2976_v42 }
 0x2db   : > { %4807 = vmatprep.mubr.f32.mxu1 %v8688_v59  ;;  %4699 = vmatpush1.msra.mxu0 %v7782_v23  ;;  %v3418_v23 = vsel %vm933_vm1, %v3400_v22, %v3402_v11  ;;  %v7976_v2 = vmul.f32 %v3564_v40, %v3417_v55  ;;  %v7980_v43 = vmul.f32 %v3132_v17, %v2994_v36  ;;  %v5476_v17 = vld [vmem:[%s8619_s6 + $0xe8] sm:$0xff]  ;;  %v5475_v36 = vld [vmem:[%s8619_s6 + $0xe0] sm:$0xff] }
 0x2dc   : > { %5696 = vmatmul.mubr.msk.f32.vlgmr.msra.gmra.mxu1 %vm1561_vm2, %v7424_v5  ;;  %4899 = vmatprep.subr.mxu1 %v7943_v24  ;;  %v3552_v25 = vrot.slane %v7941_v34, %v6159_v53  ;;  %v2988_v53 = vpop.permute.xlu0 %2987  ;;  %v5460_v55 = vld [vmem:[%s8619_s6 + $0x68] sm:$0xff] }
 0x2dd   : > { %4700 = vmatprep.subr.mxu0 %v7145_v31  ;;  %4900 = vmatpush1.msra.mxu1 %v7947_v32  ;;  %v7982_v31 = vmul.f32 %v3560_v50, %v3418_v23  ;;  %v3020_v58 = vsel %vm505_vm0, %v2988_v53, %v8719_v33  ;;  %v3408_v48 = vpop.permute.xlu1 %3407  ;;  %v5459_v23 = vld [vmem:[%s8619_s6 + $0x60] sm:$0xff] }
 0x2de   : > { %4701 = vmatpush1.msra.mxu0 %v7336_v28  ;;  %4901 = vmatprep.subr.mxu1 %v8715_v49  ;;  %v7988_v28 = vmul.f32 %v3128_v27, %v2995_v38  ;;  %v8008_v19 = vmul.f32 %v3552_v25, %v3420_v57  ;;  %v5170_v27 = vld [vmem:[%s5926_s29 + $0x8] sm:$0xff]  ;;  %v5171_v25 = vld [vmem:[%s5926_s29 + $0x10] sm:$0xff] }
 0x2df   : > { %4702 = vmatprep.subr.mxu0 %v7798_v46  ;;  %4902 = vmatpush1.msra.mxu1 %v8716_v30  ;;  %v3419_v46 = vsel %vm933_vm1, %v3398_v16, %v3400_v22  ;;  %v5474_v16 = vld [vmem:[%s8619_s6 + $0xd8] sm:$0xff] }
 0x2e0   : > { %4703 = vmatpush1.msra.mxu0 %v7802_v9  ;;  %4736 = vmatprep.mubr.f32.mxu0 %v8688_v59  ;;  %v8004_v9 = vmul.f32 %v3556_v21, %v3419_v46  ;;  %v3410_v8 = vpop.permute.xlu0 %3409  ;;  %v5473_v21 = vld [vmem:[%s8619_s6 + $0xd0] sm:$0xff] }
 0x2e1   : > { %4903 = vmatprep.subr.mxu1 %v7976_v2  ;;  %5695 = vmatmul.mubr.msk.f32.vlgmr.msra.gmra.mxu0 %vm1561_vm2, %v7424_v5  ;;  %v3406_v13 = vpop.permute.xlu1 %3405  ;;  %v5457_v46 = vld [vmem:[%s8619_s6 + $0x50] sm:$0xff] }
 0x2e2   : > { %4828 = vmatprep.subr.mxu0 %v7980_v43  ;;  %4904 = vmatpush1.msra.mxu1 %v7982_v31  ;;  %v3415_v40 = vsel %vm933_vm1, %v3406_v13, %v3408_v48 }
 0x2e3   : > { %4829 = vmatpush1.msra.mxu0 %v7988_v28  ;;  %4905 = vmatprep.subr.mxu1 %v7980_v43 }
 0x2e4   : > { %4830 = vmatprep.subr.mxu0 %v8717_v1  ;;  %4906 = vmatpush1.msra.mxu1 %v7988_v28 }
 0x2e5   : > { %4831 = vmatpush1.msra.mxu0 %v8718_v3  ;;  %4907 = vmatprep.subr.mxu1 %v8717_v1 }
 0x2e6   : > { %4832 = vmatprep.subr.mxu0 %v8004_v9  ;;  %4908 = vmatpush1.msra.mxu1 %v8718_v3 }
 0x2e7   : > { %4833 = vmatpush1.msra.mxu0 %v8008_v19  ;;  %4909 = vmatprep.subr.mxu1 %v8004_v9 }
 0x2e8   : > { %4834 = vmatprep.subr.mxu0 %v7835_v20  ;;  %4910 = vmatpush1.msra.mxu1 %v8008_v19 }
 0x2e9   : > { %4835 = vmatpush1.msra.mxu0 %v7839_v0  ;;  %4911 = vmatprep.subr.mxu1 %v7835_v20  ;;  %v2989_v20 = vsel %vm505_vm0, %v2986_v61, %v2988_v53 }
 0x2ea   : > { %4836 = vmatprep.subr.mxu0 %v8714_v12  ;;  %4912 = vmatpush1.msra.mxu1 %v7839_v0  ;;  %v8037_v0 = vmul.f32 %v3156_v54, %v3020_v58  ;;  %v8043_v14 = vmul.f32 %v3152_v26, %v2989_v20  ;;  %v5471_v58 = vld [vmem:[%s8619_s6 + $0xc0] sm:$0xff] }
 0x2eb   : > { %4837 = vmatpush1.msra.mxu0 %v7159_v60  ;;  %4913 = vmatprep.subr.mxu1 %v8714_v12  ;;  %v3580_v12 = vrot.slane %v7941_v34, %v6273_v51  ;;  %v3144_v51 = vrot.slane %v7913_v47, %v6221_v45  ;;  %v5455_v20 = vld [vmem:[%s8619_s6 + $0x40] sm:$0xff] }
 0x2ec   : > { %4838 = vmatprep.subr.mxu0 %v7868_v18  ;;  %4914 = vmatpush1.msra.mxu1 %v7159_v60  ;;  %v8720_v60 = vld [vmem:[#allocation18_spill] sm:$0xff] }
 0x2ed   : > { %4839 = vmatpush1.msra.mxu0 %v7874_v56  ;;  %4915 = vmatprep.subr.mxu1 %v7868_v18  ;;  %v3413_v11 = vsel %vm933_vm1, %v3410_v8, %v8720_v60  ;;  %v2984_v18 = vpop.permute.xlu0 %2983  ;;  %v5470_v60 = vld [vmem:[%s8619_s6 + $0xb8] sm:$0xff] }
 0x2ee   : > { %4840 = vmatprep.subr.mxu0 %v7872_v41  ;;  %4916 = vmatpush1.msra.mxu1 %v7874_v56  ;;  %v3576_v41 = vrot.slane %v7941_v34, %v6276_v52  ;;  %v2990_v56 = vsel %vm505_vm0, %v2984_v18, %v2986_v61  ;;  %v2991_v52 = vsel %vm505_vm0, %v7878_v39, %v2984_v18  ;;  %v5456_v61 = vld [vmem:[%s8619_s6 + $0x48] sm:$0xff] }
 0x2ef   : > { %4949 = vmatprep.mubr.f32.mxu1 %v8688_v59  ;;  %4841 = vmatpush1.msra.mxu0 %v7882_v15  ;;  %v3414_v15 = vsel %vm933_vm1, %v3408_v48, %v3410_v8  ;;  %v3644_v47 = vmul.f32 %v3580_v12, %v3413_v11  ;;  %v3218_v22 = vmul.f32 %v3148_v6, %v2990_v56  ;;  %v5454_v11 = vld [vmem:[%s8619_s6 + $0x38] sm:$0xff]  ;;  %v5469_v56 = vld [vmem:[%s8619_s6 + $0xb0] sm:$0xff] }
 0x2f0   : > { %5698 = vmatmul.mubr.msk.f32.vlgmr.msra.gmra.mxu1 %vm1561_vm2, %v7424_v5  ;;  %5041 = vmatprep.subr.mxu1 %v8037_v0  ;;  %v3643_v42 = vmul.f32 %v3576_v41, %v3414_v15  ;;  %v3217_v39 = vmul.f32 %v3144_v51, %v2991_v52  ;;  %v5453_v15 = vld [vmem:[%s8619_s6 + $0x30] sm:$0xff] }
 0x2f1   : > { %4842 = vmatprep.subr.mxu0 %v7166_v7  ;;  %5042 = vmatpush1.msra.mxu1 %v8043_v14  ;;  %v3572_v7 = vrot.slane %v7941_v34, %v6206_v37 }
 0x2f2   : > { %4843 = vmatpush1.msra.mxu0 %v7348_v44  ;;  %5043 = vmatprep.subr.mxu1 %v8721_v29  ;;  %v3568_v44 = vrot.slane %v7941_v34, %v6221_v45  ;;  %v8724_v34 = vld [vmem:[#allocation17_spill] sm:$0xff] }
 0x2f3   : > { %4844 = vmatprep.subr.mxu0 %v7898_v63  ;;  %5044 = vmatpush1.msra.mxu1 %v8722_v62  ;;  %v3416_v63 = vsel %vm933_vm1, %v7915_v4, %v3406_v13  ;;  %v3642_v37 = vmul.f32 %v3572_v7, %v3415_v40  ;;  %v5478_v4 = vld [vmem:[%s8619_s6 + $0xf8] sm:$0xff] }
 0x2f4   : > { %4845 = vmatpush1.msra.mxu0 %v7902_v10  ;;  %4878 = vmatprep.mubr.f32.mxu0 %v8688_v59  ;;  %v8723_v10 = vld [vmem:[#allocation14_spill] sm:$0xff]  ;;  %v3641_v45 = vmul.f32 %v3568_v44, %v3416_v63  ;;  %v5451_v44 = vld [vmem:[%s8619_s6 + $0x20] sm:$0xff]  ;;  %v5466_v63 = vld [vmem:[%s8619_s6 + $0x98] sm:$0xff] }
 0x2f5   : > { %5045 = vmatprep.subr.mxu1 %v3644_v47  ;;  %5697 = vmatmul.mubr.msk.f32.vlgmr.msra.gmra.mxu0 %vm1561_vm2, %v7424_v5 }
 0x2f6   : > { %4970 = vmatprep.subr.mxu0 %v3218_v22  ;;  %5046 = vmatpush1.msra.mxu1 %v3643_v42 }
 0x2f7   : > { %4971 = vmatpush1.msra.mxu0 %v3217_v39  ;;  %5047 = vmatprep.subr.mxu1 %v3218_v22 }
 0x2f8   : > { %4972 = vmatprep.subr.mxu0 %v8723_v10  ;;  %5048 = vmatpush1.msra.mxu1 %v3217_v39 }
 0x2f9   : > { %4973 = vmatpush1.msra.mxu0 %v8724_v34  ;;  %5049 = vmatprep.subr.mxu1 %v8723_v10 }
 0x2fa   : > { %4974 = vmatprep.subr.mxu0 %v3642_v37  ;;  %5050 = vmatpush1.msra.mxu1 %v8724_v34 }
 0x2fb   : > { %4975 = vmatpush1.msra.mxu0 %v3641_v45  ;;  %5051 = vmatprep.subr.mxu1 %v3642_v37 }
 0x2fc   : > { %4976 = vmatprep.subr.mxu0 %v7943_v24  ;;  %5052 = vmatpush1.msra.mxu1 %v3641_v45 }
 0x2fd   : > { %4977 = vmatpush1.msra.mxu0 %v7947_v32  ;;  %5053 = vmatprep.subr.mxu1 %v7943_v24 }
 0x2fe   : > { %4978 = vmatprep.subr.mxu0 %v8715_v49  ;;  %5054 = vmatpush1.msra.mxu1 %v7947_v32  ;;  %v5477_v32 = vld [vmem:[%s8619_s6 + $0xf0] sm:$0xff] }
 0x2ff   : > { %4979 = vmatpush1.msra.mxu0 %v8716_v30  ;;  %5055 = vmatprep.subr.mxu1 %v8715_v49  ;;  %v5173_v49 = vld [vmem:[%s5926_s29 + $0x20] sm:$0xff] }
 0x300   : > { %4980 = vmatprep.subr.mxu0 %v7976_v2  ;;  %5056 = vmatpush1.msra.mxu1 %v8716_v30  ;;  %v5458_v30 = vld [vmem:[%s8619_s6 + $0x58] sm:$0xff] }
 0x301   : > { %4981 = vmatpush1.msra.mxu0 %v7982_v31  ;;  %5057 = vmatprep.subr.mxu1 %v7976_v2  ;;  %v5174_v2 = vld [vmem:[%s5926_s29 + $0x28] sm:$0xff] }
 0x302   : > { %4982 = vmatprep.subr.mxu0 %v7980_v43  ;;  %5058 = vmatpush1.msra.mxu1 %v7982_v31 }
 0x303   : > { %5091 = vmatprep.mubr.f32.mxu1 %v8688_v59  ;;  %4983 = vmatpush1.msra.mxu0 %v7988_v28  ;;  %v5169_v28 = vld [vmem:[%s5926_s29] sm:$0xff] }
 0x304   : > { %5700 = vmatmul.mubr.msk.f32.vlgmr.msra.gmra.mxu1 %vm1561_vm2, %v7424_v5  ;;  %5118 = vmatprep.subr.mxu1 %v8037_v0 }
 0x305   : > { %4984 = vmatprep.subr.mxu0 %v8717_v1  ;;  %5119 = vmatpush1.msra.mxu1 %v8043_v14  ;;  %v8166_v1 = vpop.permute.xlu0 %5236 }
 0x306   : > { %4985 = vmatpush1.msra.mxu0 %v8718_v3  ;;  %5120 = vmatprep.subr.mxu1 %v8721_v29  ;;  %v5172_v3 = vld [vmem:[%s5926_s29 + $0x18] sm:$0xff] }
 0x307   : > { %4986 = vmatprep.subr.mxu0 %v8004_v9  ;;  %5121 = vmatpush1.msra.mxu1 %v8722_v62  ;;  %v5472_v9 = vld [vmem:[%s8619_s6 + $0xc8] sm:$0xff] }
 0x308   : > { %4987 = vmatpush1.msra.mxu0 %v8008_v19  ;;  %5020 = vmatprep.mubr.f32.mxu0 %v8688_v59  ;;  %v5468_v62 = vld [vmem:[%s8619_s6 + $0xa8] sm:$0xff] }
 0x309   : > { %5122 = vmatprep.subr.mxu1 %v3644_v47  ;;  %5699 = vmatmul.mubr.msk.f32.vlgmr.msra.gmra.mxu0 %vm1561_vm2, %v7424_v5 }
 0x30a   : > { %5123 = vmatpush1.msra.mxu1 %v3643_v42  ;;  %5162 = vmatprep.mubr.f32.mxu1 %v8688_v59  ;;  %v5462_v59 = vld [vmem:[%s8619_s6 + $0x78] sm:$0xff] }
 0x30b   : > { %5124 = vmatprep.subr.mxu1 %v3218_v22  ;;  %5706 = vmatprep.subr.mxu0 %v5478_v4  ;;  %v5452_v22 = vld [vmem:[%s8619_s6 + $0x28] sm:$0xff] }
 0x30c   : > { %5125 = vmatpush1.msra.mxu1 %v3217_v39  ;;  %5707 = vmatpush3.msra.mxu0 %v5462_v59  ;;  %v5467_v39 = vld [vmem:[%s8619_s6 + $0xa0] sm:$0xff]  ;;  %v5464_v4 = vld [vmem:[%s8619_s6 + $0x88] sm:$0xff] }
 0x30d   : > { %5126 = vmatprep.subr.mxu1 %v8723_v10  ;;  %5708 = vmatprep.subr.mxu0 %v5477_v32  ;;  %v5465_v10 = vld [vmem:[%s8619_s6 + $0x90] sm:$0xff]  ;;  %v5448_v59 = vld [vmem:[%s8619_s6 + $0x8] sm:$0xff] }
 0x30e   : > { %5127 = vmatpush1.msra.mxu1 %v8724_v34  ;;  %v5177_v34 = vld [vmem:[%s5926_s29 + $0x40] sm:$0xff]  ;;  %v5178_v32 = vld [vmem:[%s5926_s29 + $0x48] sm:$0xff] }
 0x30f   : > { %5128 = vmatprep.subr.mxu1 %v3642_v37  ;;  %v5450_v37 = vld [vmem:[%s8619_s6 + $0x18] sm:$0xff] }
 0x310   : > { %5129 = vmatpush1.msra.mxu1 %v3641_v45  ;;  %v5449_v45 = vld [vmem:[%s8619_s6 + $0x10] sm:$0xff] }
 0x311   : > { %5701 = vmatmul.mubr.msk.f32.vlgmr.msra.gmra.mxu1 %vm1561_vm2, %v7424_v5  ;;  %v5461_v5 = vld [vmem:[%s8619_s6 + $0x70] sm:$0xff] }
 0x312   : > { %5709 = vmatpush3.msra.mxu0 %v5461_v5  ;;  %v5463_v5 = vld [vmem:[%s8619_s6 + $0x80] sm:$0xff] }
 0x313   : > { %5710 = vmatprep.subr.mxu0 %v5476_v17 }
 0x314   : > { %5711 = vmatpush3.msra.mxu0 %v5460_v55  ;;  %v5447_v55 = vld [vmem:[%s8619_s6] sm:$0xff] }
 0x315   : > { %5712 = vmatprep.subr.mxu0 %v5475_v36 }
 0x316   : > { %5713 = vmatpush3.msra.mxu0 %v5459_v23  ;;  %v5175_v23 = vld [vmem:[%s5926_s29 + $0x30] sm:$0xff] }
 0x317   : > { %5714 = vmatprep.subr.mxu0 %v5474_v16 }
 0x318   : > { %5715 = vmatpush3.msra.mxu0 %v5458_v30 }
 0x319   : > { %5716 = vmatprep.subr.mxu0 %v5473_v21 }
 0x31a   : > { %5717 = vmatpush3.msra.mxu0 %v5457_v46 }
 0x31b   : > { %5718 = vmatprep.subr.mxu0 %v5472_v9 }
 0x31c   : > { %5719 = vmatpush3.msra.mxu0 %v5456_v61  ;;  %v5182_v61 = vld [vmem:[%s5926_s29 + $0x68] sm:$0xff] }
 0x31d   : > { %5720 = vmatprep.subr.mxu0 %v5471_v58 }
 0x31e   : > { %5721 = vmatpush3.msra.mxu0 %v5455_v20  ;;  %v5179_v20 = vld [vmem:[%s5926_s29 + $0x50] sm:$0xff] }
 0x31f   : > { %5722 = vmatprep.subr.mxu0 %v5470_v60 }
 0x320   : > { %5723 = vmatpush3.msra.mxu0 %v5454_v11  ;;  %v5180_v11 = vld [vmem:[%s5926_s29 + $0x58] sm:$0xff] }
 0x321   : > { %5724 = vmatprep.subr.mxu0 %v5469_v56 }
 0x322   : > { %5725 = vmatpush3.msra.mxu0 %v5453_v15 }
 0x323   : > { %5726 = vmatprep.subr.mxu0 %v5468_v62 }
 0x324   : > { %5727 = vmatpush3.msra.mxu0 %v5452_v22 }
 0x325   : > { %5728 = vmatprep.subr.mxu0 %v5467_v39 }
 0x326   : > { %5729 = vmatpush3.msra.mxu0 %v5451_v44 }
 0x327   : > { %5730 = vmatprep.subr.mxu0 %v5466_v63 }
 0x328   : > { %5731 = vmatpush3.msra.mxu0 %v5450_v37 }
 0x329   : > { %5732 = vmatprep.subr.mxu0 %v5465_v10  ;;  %v5185_v10 = vld [vmem:[%s5926_s29 + $0x80] sm:$0xff] }
 0x32a   : > { %5733 = vmatpush3.msra.mxu0 %v5449_v45 }
 0x32b   : > { %5734 = vmatprep.subr.mxu0 %v5464_v4 }
 0x32c   : > { %5735 = vmatpush3.msra.mxu0 %v5448_v59 }
 0x32d   : > { %5736 = vmatprep.subr.mxu0 %v5463_v5  ;;  %v5183_v5 = vld [vmem:[%s5926_s29 + $0x70] sm:$0xff] }
 0x32e   : > { %5737 = vmatpush3.msra.mxu0 %v5447_v55 }
 0x33a   : > { %v4099_v24 = vpop.f32.mrf.mxu1 }
 0x33b   : > { %v5201_v54 = vadd.f32 %v5169_v28, %v4099_v24 }
 0x33c   : > { %v4101_v50 = vpop.f32.mrf.mxu1 }
 0x33d   : > { %v5202_v43 = vadd.f32 %v5170_v27, %v4101_v50  ;;  %v8197_v18 = vadd.f32 %v8166_v1, %v5201_v54 }
 0x33f   : > { %v8173_v8 = vadd.f32 %v8166_v1, %v5202_v43  ;;  %v5271_v42 = vmax.f32 %v8197_v18, 0.0 }
 0x341   : > { %v5272_v6 = vmax.f32 %v8173_v8, 0.0 }
 0x34c   : > { %v4241_v38 = vpop.f32.mrf.mxu1 }
 0x34d   : > { %v5205_v57 = vadd.f32 %v5173_v49, %v4241_v38  ;;  %v5176_v49 = vld [vmem:[%s5926_s29 + $0x38] sm:$0xff] }
 0x34e   : > { %v4243_v31 = vpop.f32.mrf.mxu1 }
 0x34f   : > { %v5206_v53 = vadd.f32 %v5174_v2, %v4243_v31  ;;  %v8182_v48 = vadd.f32 %v8166_v1, %v5205_v57 }
 0x351   : > { %v4170_v19 = vpop.f32.mrf.mxu0  ;;  %v8185_v0 = vadd.f32 %v8166_v1, %v5206_v53  ;;  %v5275_v52 = vmax.f32 %v8182_v48, 0.0 }
 0x352   : > { %v5203_v33 = vadd.f32 %v5171_v25, %v4170_v19  ;;  %v5181_v19 = vld [vmem:[%s5926_s29 + $0x60] sm:$0xff] }
 0x353   : > { %v4172_v26 = vpop.f32.mrf.mxu0  ;;  %v5276_v13 = vmax.f32 %v8185_v0, 0.0 }
 0x354   : > { %v8188_v12 = vadd.f32 %v8166_v1, %v5203_v33  ;;  %v5204_v14 = vadd.f32 %v5172_v3, %v4172_v26 }
 0x355   : > { %v5790_v40 = vpack.i.bf16 %v5276_v13, %v5271_v42 }
 0x356   : > { %v5273_v41 = vmax.f32 %v8188_v12, 0.0  ;;  %v8202_v51 = vadd.f32 %v8166_v1, %v5204_v14 }
 0x358   : > { %v5775_v29 = vpack.i.bf16 %v5273_v41, %v5272_v6  ;;  %v5274_v47 = vmax.f32 %v8202_v51, 0.0 }
 0x35a   : > { %v5780_v7 = vpack.i.bf16 %v5275_v52, %v5274_v47  ;;  %5776 = vrot.lane.b32.xlu1 %v5775_v29, %s5868_s30 }
 0x35c   : > { %5781 = vrot.lane.b32.xlu0 %v5780_v7, %s5868_s30 }
 0x35e   : > { %5791 = vrot.lane.b32.xlu1 %v5790_v40, %s5868_s30 }
 0x360   : > { %v4383_v24 = vpop.f32.mrf.mxu1 }
 0x361   : > { %v5209_v17 = vadd.f32 %v5177_v34, %v4383_v24  ;;  %v5186_v34 = vld [vmem:[%s5926_s29 + $0x88] sm:$0xff] }
 0x362   : > { %v4385_v50 = vpop.f32.mrf.mxu1 }
 0x363   : > { %v8268_v36 = vadd.f32 %v8166_v1, %v5209_v17  ;;  %v5210_v27 = vadd.f32 %v5178_v32, %v4385_v50  ;;  %v5184_v50 = vld [vmem:[%s5926_s29 + $0x78] sm:$0xff] }
 0x365   : > { %v8272_v38 = vadd.f32 %v8166_v1, %v5210_v27  ;;  %v4312_v16 = vpop.f32.mrf.mxu0  ;;  %v5279_v30 = vmax.f32 %v8268_v36, 0.0 }
 0x366   : > { %v5207_v2 = vadd.f32 %v5175_v23, %v4312_v16 }
 0x367   : > { %v5280_v43 = vmax.f32 %v8272_v38, 0.0  ;;  %v4314_v31 = vpop.f32.mrf.mxu0 }
 0x368   : > { %v8278_v21 = vadd.f32 %v8166_v1, %v5207_v2  ;;  %v5208_v28 = vadd.f32 %v5176_v49, %v4314_v31 }
 0x369   : > { %v5800_v25 = vpack.i.bf16 %v5280_v43, %v5279_v30 }
 0x36a   : > { %v8285_v46 = vadd.f32 %v8166_v1, %v5208_v28  ;;  %v5277_v57 = vmax.f32 %v8278_v21, 0.0 }
 0x36b   : > { %5801 = vrot.lane.b32.xlu1 %v5800_v25, %s5868_s30 }
 0x36c   : > { %v5278_v53 = vmax.f32 %v8285_v46, 0.0 }
 0x36e   : > { %v5785_v9 = vpack.i.bf16 %v5278_v53, %v5277_v57 }
 0x370   : > { %5786 = vrot.lane.b32.xlu0 %v5785_v9, %s5868_s30 }
 0x374   : > { %v4525_v3 = vpop.f32.mrf.mxu1 }
 0x375   : > { %v5213_v54 = vadd.f32 %v5181_v19, %v4525_v3 }
 0x376   : > { %v4527_v33 = vpop.f32.mrf.mxu1 }
 0x377   : > { %v8298_v58 = vadd.f32 %v8166_v1, %v5213_v54  ;;  %v5214_v26 = vadd.f32 %v5182_v61, %v4527_v33  ;;  %v5189_v61 = vld [vmem:[%s5926_s29 + $0xa0] sm:$0xff]  ;;  %v5190_v33 = vld [vmem:[%s5926_s29 + $0xa8] sm:$0xff] }
 0x379   : > { %v8302_v14 = vadd.f32 %v8166_v1, %v5214_v26  ;;  %v4454_v60 = vpop.f32.mrf.mxu0  ;;  %v8676_v15 = vmax.f32 %v8298_v58, 0.0 }
 0x37a   : > { %v5211_v56 = vadd.f32 %v5179_v20, %v4454_v60 }
 0x37b   : > { %v8678_v29 = vmax.f32 %v8302_v14, 0.0  ;;  %v4456_v62 = vpop.f32.mrf.mxu0 }
 0x37c   : > { %v8308_v22 = vadd.f32 %v8166_v1, %v5211_v56  ;;  %v5212_v7 = vadd.f32 %v5180_v11, %v4456_v62  ;;  %v5187_v56 = vld [vmem:[%s5926_s29 + $0x90] sm:$0xff] }
 0x37d   : > { %v5810_v39 = vpack.i.bf16 %v8678_v29, %v8676_v15 }
 0x37e   : > { %v8315_v44 = vadd.f32 %v8166_v1, %v5212_v7  ;;  %v5281_v40 = vmax.f32 %v8308_v22, 0.0 }
 0x37f   : > { %5811 = vrot.lane.b32.xlu1 %v5810_v39, %s5868_s30  ;;  %v5188_v39 = vld [vmem:[%s5926_s29 + $0x98] sm:$0xff] }
 0x380   : > { %v5282_v63 = vmax.f32 %v8315_v44, 0.0 }
 0x382   : > { %v5795_v37 = vpack.i.bf16 %v5282_v63, %v5281_v40 }
 0x384   : > { %5796 = vrot.lane.b32.xlu0 %v5795_v37, %s5868_s30 }
 0x388   : > { %v4667_v45 = vpop.f32.mrf.mxu1 }
 0x389   : > { %v5217_v4 = vadd.f32 %v5185_v10, %v4667_v45 }
 0x38a   : > { %v4669_v59 = vpop.f32.mrf.mxu1 }
 0x38b   : > { %v8328_v24 = vadd.f32 %v8166_v1, %v5217_v4  ;;  %v5218_v32 = vadd.f32 %v5186_v34, %v4669_v59 }
 0x38d   : > { %v8332_v17 = vadd.f32 %v8166_v1, %v5218_v32  ;;  %v4596_v55 = vpop.f32.mrf.mxu0  ;;  %v8670_v23 = vmax.f32 %v8328_v24, 0.0 }
 0x38e   : > { %v5215_v27 = vadd.f32 %v5183_v5, %v4596_v55 }
 0x38f   : > { %v8674_v16 = vmax.f32 %v8332_v17, 0.0  ;;  %v4598_v49 = vpop.f32.mrf.mxu0 }
 0x390   : > { %v8338_v2 = vadd.f32 %v8166_v1, %v5215_v27  ;;  %v5216_v31 = vadd.f32 %v5184_v50, %v4598_v49  ;;  %v5193_v49 = vld [vmem:[%s5926_s29 + $0xc0] sm:$0xff] }
 0x391   : > { %v5820_v28 = vpack.i.bf16 %v8674_v16, %v8670_v23 }
 0x392   : > { %v8345_v25 = vadd.f32 %v8166_v1, %v5216_v31  ;;  %v8675_v9 = vmax.f32 %v8338_v2, 0.0 }
 0x393   : > { %5821 = vrot.lane.b32.xlu1 %v5820_v28, %s5868_s30  ;;  %v5194_v28 = vld [vmem:[%s5926_s29 + $0xc8] sm:$0xff] }
 0x394   : > { %v8677_v19 = vmax.f32 %v8345_v25, 0.0 }
 0x396   : > { %v5805_v3 = vpack.i.bf16 %v8677_v19, %v8675_v9 }
 0x398   : > { %5806 = vrot.lane.b32.xlu0 %v5805_v3, %s5868_s30 }
 0x39c   : > { %v4809_v54 = vpop.f32.mrf.mxu1 }
 0x39d   : > { %v5221_v26 = vadd.f32 %v5189_v61, %v4809_v54 }
 0x39e   : > { %v4811_v20 = vpop.f32.mrf.mxu1 }
 0x39f   : > { %v8358_v60 = vadd.f32 %v8166_v1, %v5221_v26  ;;  %v5222_v11 = vadd.f32 %v5190_v33, %v4811_v20  ;;  %v5191_v26 = vld [vmem:[%s5926_s29 + $0xb0] sm:$0xff] }
 0x3a1   : > { %v8362_v62 = vadd.f32 %v8166_v1, %v5222_v11  ;;  %v4738_v7 = vpop.f32.mrf.mxu0  ;;  %v8665_v10 = vmax.f32 %v8358_v60, 0.0 }
 0x3a2   : > { %v5219_v37 = vadd.f32 %v5187_v56, %v4738_v7  ;;  %v5192_v56 = vld [vmem:[%s5926_s29 + $0xb8] sm:$0xff] }
 0x3a3   : > { %v8668_v45 = vmax.f32 %v8362_v62, 0.0  ;;  %v4740_v34 = vpop.f32.mrf.mxu0 }
 0x3a4   : > { %v8368_v4 = vadd.f32 %v8166_v1, %v5219_v37  ;;  %v5220_v59 = vadd.f32 %v5188_v39, %v4740_v34 }
 0x3a5   : > { %v5830_v32 = vpack.i.bf16 %v8668_v45, %v8665_v10  ;;  %v5199_v45 = vld [vmem:[%s5926_s29 + $0xf0] sm:$0xff] }
 0x3a6   : > { %v8375_v5 = vadd.f32 %v8166_v1, %v5220_v59  ;;  %v8669_v55 = vmax.f32 %v8368_v4, 0.0 }
 0x3a7   : > { %5831 = vrot.lane.b32.xlu1 %v5830_v32, %s5868_s30 }
 0x3a8   : > { %v8671_v50 = vmax.f32 %v8375_v5, 0.0 }
 0x3aa   : > { %v5815_v27 = vpack.i.bf16 %v8671_v50, %v8669_v55 }
 0x3ac   : > { %5816 = vrot.lane.b32.xlu0 %v5815_v27, %s5868_s30 }
 0x3b0   : > { %v4951_v31 = vpop.f32.mrf.mxu1 }
 0x3b1   : > { %v5225_v3 = vadd.f32 %v5193_v49, %v4951_v31 }
 0x3b2   : > { %v4953_v61 = vpop.f32.mrf.mxu1 }
 0x3b3   : > { %v8388_v54 = vadd.f32 %v8166_v1, %v5225_v3  ;;  %v5226_v33 = vadd.f32 %v5194_v28, %v4953_v61  ;;  %v5197_v61 = vld [vmem:[%s5926_s29 + $0xe0] sm:$0xff] }
 0x3b5   : > { %v8392_v20 = vadd.f32 %v8166_v1, %v5226_v33  ;;  %v4880_v11 = vpop.f32.mrf.mxu0  ;;  %v8663_v39 = vmax.f32 %v8388_v54, 0.0 }
 0x3b6   : > { %v5223_v7 = vadd.f32 %v5191_v26, %v4880_v11  ;;  %v5198_v26 = vld [vmem:[%s5926_s29 + $0xe8] sm:$0xff] }
 0x3b7   : > { %v8664_v37 = vmax.f32 %v8392_v20, 0.0  ;;  %v4882_v34 = vpop.f32.mrf.mxu0 }
 0x3b8   : > { %v8398_v59 = vadd.f32 %v8166_v1, %v5223_v7  ;;  %v5224_v32 = vadd.f32 %v5192_v56, %v4882_v34 }
 0x3b9   : > { %v5840_v27 = vpack.i.bf16 %v8664_v37, %v8663_v39  ;;  %v5196_v37 = vld [vmem:[%s5926_s29 + $0xd8] sm:$0xff] }
 0x3ba   : > { %v8405_v49 = vadd.f32 %v8166_v1, %v5224_v32  ;;  %v8666_v31 = vmax.f32 %v8398_v59, 0.0  ;;  %v5195_v32 = vld [vmem:[%s5926_s29 + $0xd0] sm:$0xff] }
 0x3bb   : > { %5841 = vrot.lane.b32.xlu1 %v5840_v27, %s5868_s30 }
 0x3bc   : > { %v8667_v28 = vmax.f32 %v8405_v49, 0.0 }
 0x3be   : > { %v5825_v3 = vpack.i.bf16 %v8667_v28, %v8666_v31 }
 0x3c0   : > { %5826 = vrot.lane.b32.xlu0 %v5825_v3, %s5868_s30 }
 0x3c4   : > { %v5093_v33 = vpop.f32.mrf.mxu1 }
 0x3c5   : > { %v5229_v11 = vadd.f32 %v5197_v61, %v5093_v33 }
 0x3c6   : > { %v5095_v56 = vpop.f32.mrf.mxu1 }
 0x3c7   : > { %v8418_v7 = vadd.f32 %v8166_v1, %v5229_v11  ;;  %v5230_v34 = vadd.f32 %v5198_v26, %v5095_v56 }
 0x3c9   : > { %v8422_v27 = vadd.f32 %v8166_v1, %v5230_v34  ;;  %v5022_v39 = vpop.f32.mrf.mxu0  ;;  %v8672_v31 = vmax.f32 %v8418_v7, 0.0 }
 0x3ca   : > { %v5227_v10 = vadd.f32 %v5195_v32, %v5022_v39 }
 0x3cb   : > { %v8673_v3 = vmax.f32 %v8422_v27, 0.0  ;;  %v5024_v28 = vpop.f32.mrf.mxu0 }
 0x3cc   : > { %v8428_v61 = vadd.f32 %v8166_v1, %v5227_v10  ;;  %v5228_v33 = vadd.f32 %v5196_v37, %v5024_v28  ;;  %v5777_v11 = vpop.permute.xlu1 %5776 }
 0x3cd   : > { %v5845_v26 = vpack.i.bf16 %v8673_v3, %v8672_v31  ;;  %v5779_v56 = vunpack.i.h.bf16 %v5777_v11  ;;  %v5778_v34 = vunpack.i.l.bf16 %v5777_v11  ;;  %v5200_v11 = vld [vmem:[%s5926_s29 + $0xf8] sm:$0xff]  ;;  %s5705_s29 = sshll.u32 %s8743_s25, 6 }
 0x3ce   : > { %v8435_v39 = vadd.f32 %v8166_v1, %v5228_v33  ;;  %v5782_v32 = vpop.permute.xlu0 %5781  ;;  %v8679_v55 = vmax.f32 %v8428_v61, 0.0  ;;  %s8600_s21 = scalar_lea.vmem %s8620_s7, %s5705_s29 }
 0x3cf   : > { %5846 = vrot.lane.b32.xlu1 %v5845_v26, %s5868_s30  ;;  %v5396_v10 = vsel %vm505_vm0, %v5778_v34, %v5779_v56  ;;  %v5784_v37 = vunpack.i.h.bf16 %v5782_v32  ;;  %v5783_v28 = vunpack.i.l.bf16 %v5782_v32 }
 0x3d0   : > { %v5298_v23 = vmax.f32 %v8435_v39, 0.0  ;;  %v8443_v50 = vpop.permute.xlu1 %5791  ;;  %v5400_v9 = vmax.f32 %v5272_v6, %v5396_v10  ;;  %v8740_v39 = vmax.f32 %v8422_v27, 0.0 }
 0x3d1   : > { %v5164_v31 = vpop.f32.mrf.mxu1  ;;  %v5394_v33 = vsel %vm505_vm0, %v5783_v28, %v5784_v37  ;;  %v5395_v26 = vsel %vm505_vm0, %v5779_v56, %v5783_v28  ;;  %v5793_v3 = vunpack.i.l.bf16 %v8443_v50  ;;  %v5794_v18 = vunpack.i.h.bf16 %v8443_v50 }
 0x3d2   : > { %v5835_v32 = vpack.i.bf16 %v5298_v23, %v8679_v55  ;;  %v5231_v16 = vadd.f32 %v5199_v45, %v5164_v31  ;;  %v5402_v15 = vmax.f32 %v5274_v47, %v5394_v33  ;;  %v5401_v29 = vmax.f32 %v5273_v41, %v5395_v26 }
 0x3d3   : > { %v5166_v19 = vpop.f32.mrf.mxu1  ;;  %v5397_v56 = vsel %vm505_vm0, %v5793_v3, %v5778_v34 }
 0x3d4   : > { %v8466_v28 = vadd.f32 %v8166_v1, %v5231_v16  ;;  %v5232_v55 = vadd.f32 %v5200_v11, %v5166_v19  ;;  %5836 = vrot.lane.b32.xlu0 %v5835_v32, %s5868_s30  ;;  %v5399_v8 = vmax.f32 %v5271_v42, %v5397_v56  ;;  %v5432_v6 = vmax.f32 %v5400_v9, %v5402_v15 }
 0x3d6   : > { %v8472_v51 = vadd.f32 %v8166_v1, %v5232_v55  ;;  %5543 = vmatprep.mubr.f32.mxu0 %v5432_v6  ;;  %v5431_v12 = vmax.f32 %v5399_v8, %v5401_v29  ;;  %v5301_v41 = vmax.f32 %v8466_v28, 0.0  ;;  %v5393_v1 = vsel %vm505_vm0, %v5784_v37, %v5794_v18 }
 0x3d7   : > { %v5403_v37 = vmax.f32 %v5275_v52, %v5393_v1 }
 0x3d8   : > { %v5302_v47 = vmax.f32 %v8472_v51, 0.0  ;;  %5544 = vmatmul.mubr.f32.vlgmr.msra.gmra.mxu0 %v5431_v12 }
 0x3da   : > { %v5850_v16 = vpack.i.bf16 %v5302_v47, %v5301_v41 }
 0x3dc   : > { %5851 = vrot.lane.b32.xlu0 %v5850_v16, %s5868_s30 }
 0x3dd   : > { %v5802_v42 = vpop.permute.xlu1 %5801 }
 0x3de   : > { %v5803_v29 = vunpack.i.l.bf16 %v5802_v42  ;;  %v5804_v32 = vunpack.i.h.bf16 %v5802_v42 }
 0x3e0   : > { %v5389_v0 = vsel %vm505_vm0, %v5803_v29, %v5804_v32 }
 0x3e1   : > { %v5407_v12 = vmax.f32 %v5279_v30, %v5389_v0 }
 0x3e2   : > { %v5787_v15 = vpop.permute.xlu0 %5786 }
 0x3e3   : > { %v5789_v9 = vunpack.i.h.bf16 %v5787_v15  ;;  %v5788_v19 = vunpack.i.l.bf16 %v5787_v15 }
 0x3e5   : > { %v5390_v45 = vsel %vm505_vm0, %v5789_v9, %v5803_v29  ;;  %v5391_v55 = vsel %vm505_vm0, %v5788_v19, %v5789_v9  ;;  %v5392_v31 = vsel %vm505_vm0, %v5794_v18, %v5788_v19  ;;  %v8726_v19 = vmax.f32 %v8345_v25, 0.0 }
 0x3e6   : > { %v5404_v34 = vmax.f32 %v5276_v13, %v5392_v31  ;;  %v5406_v10 = vmax.f32 %v5278_v53, %v5390_v45  ;;  %v5405_v11 = vmax.f32 %v5277_v57, %v5391_v55  ;;  %v8727_v55 = vmax.f32 %v8298_v58, 0.0 }
 0x3e8   : > { %v5434_v33 = vmax.f32 %v5404_v34, %v5406_v10  ;;  %v5433_v26 = vmax.f32 %v5403_v37, %v5405_v11  ;;  %v8728_v34 = vmax.f32 %v8338_v2, 0.0 }
 0x3ea   : > { %5548 = vmatprep.mubr.f32.mxu0 %v5434_v33 }
 0x3eb   : > { %5549 = vmatmul.mubr.f32.gmra.mxu0 %v5433_v26 }
 0x3f1   : > { %v5812_v56 = vpop.permute.xlu1 %5811 }
 0x3f2   : > { %v5813_v13 = vunpack.i.l.bf16 %v5812_v56  ;;  %v5814_v15 = vunpack.i.h.bf16 %v5812_v56 }
 0x3f4   : > { %v5385_v38 = vsel %vm505_vm0, %v5813_v13, %v5814_v15 }
 0x3f5   : > { %v5411_v31 = vmax.f32 %v8727_v55, %v5385_v38 }
 0x3f6   : > { %v5797_v8 = vpop.permute.xlu0 %5796 }
 0x3f7   : > { %v5799_v6 = vunpack.i.h.bf16 %v5797_v8  ;;  %v5798_v46 = vunpack.i.l.bf16 %v5797_v8 }
 0x3f9   : > { %v5386_v48 = vsel %vm505_vm0, %v5799_v6, %v5813_v13  ;;  %v5387_v52 = vsel %vm505_vm0, %v5798_v46, %v5799_v6  ;;  %v5388_v21 = vsel %vm505_vm0, %v5804_v32, %v5798_v46  ;;  %v8729_v13 = vmax.f32 %v8332_v17, 0.0 }
 0x3fa   : > { %v5408_v57 = vmax.f32 %v5280_v43, %v5388_v21  ;;  %v5410_v53 = vmax.f32 %v5282_v63, %v5386_v48  ;;  %v5409_v16 = vmax.f32 %v5281_v40, %v5387_v52  ;;  %v8725_v40 = vmax.f32 %v8302_v14, 0.0 }
 0x3fb   : > { %v8730_v46 = vmax.f32 %v8375_v5, 0.0  ;;  %v8731_v52 = vmax.f32 %v8328_v24, 0.0 }
 0x3fc   : > { %v5436_v18 = vmax.f32 %v5408_v57, %v5410_v53  ;;  %v5435_v42 = vmax.f32 %v5407_v12, %v5409_v16  ;;  %v8732_v57 = vmax.f32 %v8368_v4, 0.0 }
 0x3fe   : > { %5553 = vmatprep.mubr.f32.mxu0 %v5436_v18 }
 0x3ff   : > { %5554 = vmatmul.mubr.f32.gmra.mxu0 %v5435_v42 }
 0x405   : > { %v5822_v1 = vpop.permute.xlu1 %5821 }
 0x406   : > { %v5823_v43 = vunpack.i.l.bf16 %v5822_v1  ;;  %v5824_v33 = vunpack.i.h.bf16 %v5822_v1 }
 0x408   : > { %v5381_v14 = vsel %vm505_vm0, %v5823_v43, %v5824_v33 }
 0x409   : > { %v5415_v21 = vmax.f32 %v8731_v52, %v5381_v14  ;;  %v8738_v14 = vmax.f32 %v8388_v54, 0.0 }
 0x40a   : > { %v5807_v29 = vpop.permute.xlu0 %5806 }
 0x40b   : > { %v5809_v9 = vunpack.i.h.bf16 %v5807_v29  ;;  %v5808_v44 = vunpack.i.l.bf16 %v5807_v29 }
 0x40d   : > { %v5382_v36 = vsel %vm505_vm0, %v5809_v9, %v5823_v43  ;;  %v5383_v30 = vsel %vm505_vm0, %v5808_v44, %v5809_v9  ;;  %v5384_v22 = vsel %vm505_vm0, %v5814_v15, %v5808_v44  ;;  %v8733_v43 = vmax.f32 %v8362_v62, 0.0 }
 0x40e   : > { %v5412_v63 = vmax.f32 %v8725_v40, %v5384_v22  ;;  %v5414_v45 = vmax.f32 %v8726_v19, %v5382_v36  ;;  %v5413_v10 = vmax.f32 %v8728_v34, %v5383_v30  ;;  %v8734_v44 = vmax.f32 %v8405_v49, 0.0 }
 0x40f   : > { %v8735_v30 = vmax.f32 %v8358_v60, 0.0  ;;  %v8736_v40 = vmax.f32 %v8398_v59, 0.0 }
 0x410   : > { %v5438_v37 = vmax.f32 %v5412_v63, %v5414_v45  ;;  %v5437_v11 = vmax.f32 %v5411_v31, %v5413_v10 }
 0x412   : > { %5558 = vmatprep.mubr.f32.mxu0 %v5438_v37 }
 0x413   : > { %5559 = vmatmul.mubr.f32.gmra.mxu0 %v5437_v11 }
 0x419   : > { %v5832_v26 = vpop.permute.xlu1 %5831 }
 0x41a   : > { %v5833_v56 = vunpack.i.l.bf16 %v5832_v26  ;;  %v5834_v18 = vunpack.i.h.bf16 %v5832_v26 }
 0x41c   : > { %v5377_v17 = vsel %vm505_vm0, %v5833_v56, %v5834_v18 }
 0x41d   : > { %v5419_v22 = vmax.f32 %v8735_v30, %v5377_v17 }
 0x41e   : > { %v5817_v32 = vpop.permute.xlu0 %5816 }
 0x41f   : > { %v5819_v8 = vunpack.i.h.bf16 %v5817_v32  ;;  %v5818_v25 = vunpack.i.l.bf16 %v5817_v32 }
 0x421   : > { %v5378_v58 = vsel %vm505_vm0, %v5819_v8, %v5833_v56  ;;  %v5379_v2 = vsel %vm505_vm0, %v5818_v25, %v5819_v8  ;;  %v5380_v0 = vsel %vm505_vm0, %v5824_v33, %v5818_v25  ;;  %v8737_v33 = vmax.f32 %v8392_v20, 0.0 }
 0x422   : > { %v5416_v6 = vmax.f32 %v8729_v13, %v5380_v0  ;;  %v5418_v48 = vmax.f32 %v8730_v46, %v5378_v58  ;;  %v5417_v53 = vmax.f32 %v8732_v57, %v5379_v2  ;;  %v8739_v8 = vmax.f32 %v8428_v61, 0.0 }
 0x424   : > { %v5440_v12 = vmax.f32 %v5416_v6, %v5418_v48  ;;  %v5439_v16 = vmax.f32 %v5415_v21, %v5417_v53  ;;  %v8741_v21 = vmax.f32 %v8418_v7, 0.0 }
 0x426   : > { %5563 = vmatprep.mubr.f32.mxu0 %v5440_v12 }
 0x427   : > { %5564 = vmatmul.mubr.f32.gmra.mxu0 %v5439_v16 }
 0x42d   : > { %v5842_v42 = vpop.permute.xlu1 %5841 }
 0x42e   : > { %v5843_v1 = vunpack.i.l.bf16 %v5842_v42  ;;  %v5844_v55 = vunpack.i.h.bf16 %v5842_v42 }
 0x430   : > { %v5373_v62 = vsel %vm505_vm0, %v5843_v1, %v5844_v55 }
 0x431   : > { %v5423_v56 = vmax.f32 %v8738_v14, %v5373_v62 }
 0x432   : > { %v5827_v15 = vpop.permute.xlu0 %5826 }
 0x433   : > { %v5829_v29 = vunpack.i.h.bf16 %v5827_v15  ;;  %v5828_v5 = vunpack.i.l.bf16 %v5827_v15 }
 0x435   : > { %v5374_v24 = vsel %vm505_vm0, %v5829_v29, %v5843_v1  ;;  %v5375_v4 = vsel %vm505_vm0, %v5828_v5, %v5829_v29  ;;  %v5376_v38 = vsel %vm505_vm0, %v5834_v18, %v5828_v5 }
 0x436   : > { %v5420_v9 = vmax.f32 %v8733_v43, %v5376_v38  ;;  %v5422_v36 = vmax.f32 %v8734_v44, %v5374_v24  ;;  %v5421_v63 = vmax.f32 %v8736_v40, %v5375_v4 }
 0x438   : > { %v5442_v19 = vmax.f32 %v5420_v9, %v5422_v36  ;;  %v5441_v45 = vmax.f32 %v5419_v22, %v5421_v63 }
 0x43a   : > { %5568 = vmatprep.mubr.f32.mxu0 %v5442_v19 }
 0x43b   : > { %5569 = vmatmul.mubr.f32.gmra.mxu0 %v5441_v45 }
 0x441   : > { %v5847_v31 = vpop.permute.xlu1 %5846 }
 0x442   : > { %v5848_v10 = vunpack.i.l.bf16 %v5847_v31  ;;  %v5849_v58 = vunpack.i.h.bf16 %v5847_v31 }
 0x444   : > { %v5369_v6 = vsel %vm505_vm0, %v5848_v10, %v5849_v58 }
 0x445   : > { %v5427_v57 = vmax.f32 %v8741_v21, %v5369_v6 }
 0x446   : > { %v5837_v34 = vpop.permute.xlu0 %5836 }
 0x447   : > { %v5839_v37 = vunpack.i.h.bf16 %v5837_v34  ;;  %v5838_v49 = vunpack.i.l.bf16 %v5837_v34 }
 0x449   : > { %v5370_v60 = vsel %vm505_vm0, %v5839_v37, %v5848_v10  ;;  %v5371_v59 = vsel %vm505_vm0, %v5838_v49, %v5839_v37  ;;  %v5372_v11 = vsel %vm505_vm0, %v5844_v55, %v5838_v49 }
 0x44a   : > { %v5424_v26 = vmax.f32 %v8737_v33, %v5372_v11  ;;  %v5426_v32 = vmax.f32 %v5298_v23, %v5370_v60  ;;  %v5425_v25 = vmax.f32 %v8739_v8, %v5371_v59 }
 0x44c   : > { %v5444_v2 = vmax.f32 %v5424_v26, %v5426_v32  ;;  %v5443_v0 = vmax.f32 %v5423_v56, %v5425_v25 }
 0x44e   : > { %v5852_v13 = vpop.permute.xlu0 %5851  ;;  %5573 = vmatprep.mubr.f32.mxu0 %v5444_v2 }
 0x44f   : > { %v5854_v20 = vunpack.i.h.bf16 %v5852_v13  ;;  %v5853_v46 = vunpack.i.l.bf16 %v5852_v13  ;;  %5574 = vmatmul.mubr.f32.gmra.mxu0 %v5443_v0 }
 0x451   : > { %v5367_v23 = vsel %vm505_vm0, %v5853_v46, %v5854_v20  ;;  %v5368_v54 = vsel %vm505_vm0, %v5849_v58, %v5853_v46  ;;  %v5398_v61 = vsel %vm505_vm0, %v5854_v20, %v5793_v3 }
 0x452   : > { %v5428_v48 = vmax.f32 %v8740_v39, %v5368_v54  ;;  %v5430_v52 = vmax.f32 %v5302_v47, %v5398_v61  ;;  %v5429_v53 = vmax.f32 %v5301_v41, %v5367_v23 }
 0x454   : > { %v5446_v12 = vmax.f32 %v5428_v48, %v5430_v52  ;;  %v5445_v16 = vmax.f32 %v5427_v57, %v5429_v53 }
 0x456   : > { %5578 = vmatprep.mubr.f32.mxu0 %v5446_v12 }
 0x457   : > { %5579 = vmatmul.mubr.f32.gmra.mxu0 %v5445_v16 }
 0x498   : > { %v5738_v50 = vpop.f32.mrf.mxu0 }
 0x49a   : > { %v5739_v35 = vpop.f32.mrf.mxu0 }
 0x49b   : > { %v5740_v7 = vadd.f32 %v5739_v35, %v5738_v50 }
 0x49d   : > { %5584 = vst [vmem:[%s8600_s21] sm:$0xff] %v5740_v7 }
 0x4ab   : > { %v5741_v27 = vpop.f32.mrf.mxu0 }
 0x4ad   : > { %v5742_v3 = vpop.f32.mrf.mxu0 }
 0x4ae   : > { %v5743_v28 = vadd.f32 %v5742_v3, %v5741_v27 }
 0x4b0   : > { %5585 = vst [vmem:[%s8600_s21 + $0x8] sm:$0xff] %v5743_v28 }
 0x4bf   : > { %v5744_v51 = vpop.f32.mrf.mxu0 }
 0x4c1   : > { %v5745_v41 = vpop.f32.mrf.mxu0 }
 0x4c2   : > { %v5746_v47 = vadd.f32 %v5745_v41, %v5744_v51 }
 0x4c4   : > { %5586 = vst [vmem:[%s8600_s21 + $0x10] sm:$0xff] %v5746_v47 }
 0x4d3   : > { %v5747_v18 = vpop.f32.mrf.mxu0 }
 0x4d5   : > { %v5748_v42 = vpop.f32.mrf.mxu0 }
 0x4d6   : > { %v5749_v15 = vadd.f32 %v5748_v42, %v5747_v18 }
 0x4d8   : > { %5587 = vst [vmem:[%s8600_s21 + $0x18] sm:$0xff] %v5749_v15 }
 0x4e7   : > { %v5750_v17 = vpop.f32.mrf.mxu0 }
 0x4e9   : > { %v5751_v1 = vpop.f32.mrf.mxu0 }
 0x4ea   : > { %v5752_v29 = vadd.f32 %v5751_v1, %v5750_v17 }
 0x4ec   : > { %5588 = vst [vmem:[%s8600_s21 + $0x20] sm:$0xff] %v5752_v29 }
 0x4fb   : > { %v5753_v5 = vpop.f32.mrf.mxu0 }
 0x4fd   : > { %v5754_v24 = vpop.f32.mrf.mxu0 }
 0x4fe   : > { %v5755_v4 = vadd.f32 %v5754_v24, %v5753_v5 }
 0x500   : > { %5589 = vst [vmem:[%s8600_s21 + $0x28] sm:$0xff] %v5755_v4 }
 0x50f   : > { %v5756_v38 = vpop.f32.mrf.mxu0 }
 0x511   : > { %v5757_v43 = vpop.f32.mrf.mxu0 }
 0x512   : > { %v5758_v9 = vadd.f32 %v5757_v43, %v5756_v38 }
 0x514   : > { %5590 = vst [vmem:[%s8600_s21 + $0x30] sm:$0xff] %v5758_v9 }
 0x517   : > { %v5759_v44 = vpop.f32.mrf.mxu0 }
 0x519   : > { %v5760_v36 = vpop.f32.mrf.mxu0 }
 0x51a   : > { %v5761_v30 = vadd.f32 %v5760_v36, %v5759_v44 }
 0x51c   : > { %5591 = vst [vmem:[%s8600_s21 + $0x38] sm:$0xff] %v5761_v30 }
 0x51d PF: > { %s17_s24 = sadd.s32 1, %s5866_s24  }
 0x51e   : > { %p14_p4 = scmp.ge.s32.totalorder %s17_s24, 4  }
 0x520   :  { %16 = sbr.rel (!%p14_p4) target bundleno = 1 (0x1), region = 85 }

</bundles_post_ra>
